<compile_context>
chip_gen: v6e
topology: v6e:2x2x1
jax: 0.10.0
libtpu: 0.0.40
codegen_flags: <defaults>
</compile_context>

<pallas_src>
import functools

import jax
import jax.numpy as jnp
from jax.experimental import pallas as pl
from jax.experimental.pallas import tpu as pltpu


# ----------------------------- in-kernel helpers -----------------------------

def _layer_norm(x, g, b, eps=1e-5):
    # x: (M, E) f32, g/b: (1, E) f32
    mu = jnp.mean(x, axis=-1, keepdims=True)
    var = jnp.mean((x - mu) ** 2, axis=-1, keepdims=True)
    return (x - mu) * jax.lax.rsqrt(var + eps) * g + b


def _mha(x_kv, x_q, wq_ref, wk_ref, wv_ref, wo_ref, bo,
         *, n_head, nb, tq, tkv, mask_bias):
    """Multi-head attention.

    x_kv: (nb*tkv, E) f32, x_q: (nb*tq, E) f32.
    wq/wk/wv refs: (n_head, E, hs) bf16; wo ref: (n_head, hs, E) bf16; bo: (1, E) f32.
    Heads are handled via leading-axis weight indexing + output accumulation:
    no lane-dim slices, no concatenate.
    """
    mq, E = x_q.shape
    hs = E // n_head
    scale = hs ** -0.5

    xq_b = x_q.astype(jnp.bfloat16)
    xkv_b = x_kv.astype(jnp.bfloat16)

    out = jnp.zeros((mq, E), jnp.float32) + bo  # start from output bias
    for h in range(n_head):  # static loop; weight loads are leading-axis (cheap)
        # Per-head projections with a big M = nb*tq / nb*tkv rows.
        q = jnp.dot(xq_b, wq_ref[h], preferred_element_type=jnp.float32) * scale
        k = jnp.dot(xkv_b, wk_ref[h], preferred_element_type=jnp.float32)
        v = jnp.dot(xkv_b, wv_ref[h], preferred_element_type=jnp.float32)

        q3 = q.reshape(nb, tq, hs).astype(jnp.bfloat16)
        k3 = k.reshape(nb, tkv, hs).astype(jnp.bfloat16)
        v3 = v.reshape(nb, tkv, hs).astype(jnp.bfloat16)

        s = jnp.einsum("btd,bsd->bts", q3, k3,
                       preferred_element_type=jnp.float32)          # (nb, tq, tkv)
        if mask_bias is not None:
            s = s + mask_bias[None, :, :]

        # softmax in f32; divide replaced by approx reciprocal (EUP slot)
        m = jnp.max(s, axis=-1, keepdims=True)
        p = jnp.exp(s - m)
        denom = jnp.sum(p, axis=-1, keepdims=True)
        p = (p * pl.reciprocal(denom, approx=True)).astype(jnp.bfloat16)

        o = jnp.einsum("bts,bsd->btd", p, v3,
                       preferred_element_type=jnp.float32)          # (nb, tq, hs)
        o2 = o.reshape(nb * tq, hs).astype(jnp.bfloat16)

        # accumulate output projection per head (replaces concat + (E,E) matmul)
        out = out + jnp.dot(o2, wo_ref[h], preferred_element_type=jnp.float32)

    return out


# --------------------------------- kernel ------------------------------------

def decoder_layer_kernel(dec_ref, enc_ref,
                         ln1g, ln1b, ln2g, ln2b, ln3g, ln3b,
                         sa_wq, sa_wk, sa_wv, sa_wo, sa_bo,
                         ca_wq, ca_wk, ca_wv, ca_wo, ca_bo,
                         ff_w1, ff_b1, ff_w2, ff_b2,
                         out_ref, *, n_head):
    Bb, T, E = dec_ref.shape
    S = enc_ref.shape[1]

    # Flatten the block-batch into the matmul M dimension.
    x = dec_ref[...].reshape(Bb * T, E).astype(jnp.float32)   # (Bb*T, E)
    e = enc_ref[...].reshape(Bb * S, E).astype(jnp.float32)   # (Bb*S, E)

    # Causal mask bias: built ONCE, shared by all heads. Finite negative (no -inf).
    row = jax.lax.broadcasted_iota(jnp.int32, (T, T), 0)
    col = jax.lax.broadcasted_iota(jnp.int32, (T, T), 1)
    causal_bias = jnp.where(col <= row, 0.0, -1e30).astype(jnp.float32)

    g1, b1 = ln1g[...], ln1b[...]
    g2, b2 = ln2g[...], ln2b[...]
    g3, b3 = ln3g[...], ln3b[...]

    # ---- dec = dec + sa(ln1(dec), None)  -- causal self-attention ------------
    h1 = _layer_norm(x, g1, b1)
    x = x + _mha(h1, h1, sa_wq, sa_wk, sa_wv, sa_wo, sa_bo[...],
                 n_head=n_head, nb=Bb, tq=T, tkv=T, mask_bias=causal_bias)

    # ---- dec = dec + enc_dec_a(ln2(enc), ln1(dec))  -- cross attention -------
    hq = _layer_norm(x, g1, b1)     # ln1 re-applied to the updated dec (queries)
    hkv = _layer_norm(e, g2, b2)    # ln2(enc) (keys/values)
    x = x + _mha(hkv, hq, ca_wq, ca_wk, ca_wv, ca_wo, ca_bo[...],
                 n_head=n_head, nb=Bb, tq=T, tkv=S, mask_bias=None)

    # ---- dec = dec + ffwd(ln3(dec)) -------------------------------------------
    h3 = _layer_norm(x, g3, b3)
    ff = jnp.dot(h3.astype(jnp.bfloat16), ff_w1[...],
                 preferred_element_type=jnp.float32) + ff_b1[...]
    ff = jnp.maximum(ff, 0.0)
    x = x + jnp.dot(ff.astype(jnp.bfloat16), ff_w2[...],
                    preferred_element_type=jnp.float32) + ff_b2[...]

    out_ref[...] = x.reshape(Bb, T, E).astype(out_ref.dtype)


# --------------------------------- wrapper -----------------------------------

def _choose_block_batch(B, T, target_rows=256):
    """Pick how many sequences to process per grid step.

    Targets M = Bb*T ~ 256 rows for the MXU, but keeps >= 2 grid points (megacore /
    v7x dual TensorCore) when that does not drop M below ~128 rows.
    """
    bb = max(1, min(B, target_rows // max(T, 1)))
    while B % bb != 0:
        bb -= 1
    if B // bb < 2 and bb > 1:
        half = bb // 2
        while half > 1 and B % half != 0:
            half -= 1
        if half >= 1 and half * T >= 128 and B % half == 0:
            bb = half
    return max(bb, 1)


def transformer_decoder_layer(dec, enc, params, n_head, *, block_batch=None):
    B, T, E = dec.shape
    S = enc.shape[1]
    assert enc.shape[0] == B and enc.shape[2] == E
    hs = E // n_head

    Bb = _choose_block_batch(B, T) if block_batch is None else block_batch
    assert B % Bb == 0
    grid = (B // Bb,)

    f32, bf16 = jnp.float32, jnp.bfloat16

    def split_qkv(w):   # (E, E) -> (n_head, E, hs), heads on leading axis, bf16
        return w.reshape(E, n_head, hs).transpose(1, 0, 2).astype(bf16)

    def split_o(w):     # (E, E) -> (n_head, hs, E), bf16
        return w.reshape(n_head, hs, E).astype(bf16)

    p = params
    param_list = [
        p["ln1_g"].astype(f32), p["ln1_b"].astype(f32),
        p["ln2_g"].astype(f32), p["ln2_b"].astype(f32),
        p["ln3_g"].astype(f32), p["ln3_b"].astype(f32),
        split_qkv(p["sa_wq"]), split_qkv(p["sa_wk"]), split_qkv(p["sa_wv"]),
        split_o(p["sa_wo"]), p["sa_bo"].astype(f32),
        split_qkv(p["ca_wq"]), split_qkv(p["ca_wk"]), split_qkv(p["ca_wv"]),
        split_o(p["ca_wo"]), p["ca_bo"].astype(f32),
        p["ff_w1"].astype(bf16), p["ff_b1"].astype(f32),
        p["ff_w2"].astype(bf16), p["ff_b2"].astype(f32),
    ]

    def full_spec(arr):
        n = arr.ndim
        return pl.BlockSpec(arr.shape, lambda b, _n=n: (0,) * _n)

    in_specs = (
        [pl.BlockSpec((Bb, T, E), lambda b: (b, 0, 0)),
         pl.BlockSpec((Bb, S, E), lambda b: (b, 0, 0))]
        + [full_spec(a) for a in param_list]
    )
    out_specs = pl.BlockSpec((Bb, T, E), lambda b: (b, 0, 0))

    # Advisory cost estimate so XLA schedules around the custom call sensibly.
    M, Mkv = B * T, B * S
    proj_flops = 2 * M * E * E * 6 + 2 * Mkv * E * E * 2      # sa q/k/v/o + ca q/o + ca k/v
    attn_flops = 4 * B * n_head * T * (T + S) * hs            # scores + PV, both attentions
    ffn_flops = 4 * M * E * (4 * E)
    flops = proj_flops + attn_flops + ffn_flops
    transcendentals = B * n_head * T * (T + S) + 6 * M        # exp + rsqrt/reciprocal
    weight_bytes = sum(int(a.size) * a.dtype.itemsize for a in param_list)
    act_bytes = (2 * dec.size + enc.size) * dec.dtype.itemsize
    cost = pl.CostEstimate(flops=int(flops),
                           transcendentals=int(transcendentals),
                           bytes_accessed=int(weight_bytes * grid[0] + act_bytes))

    kernel = functools.partial(decoder_layer_kernel, n_head=n_head)
    return pl.pallas_call(
        kernel,
        out_shape=jax.ShapeDtypeStruct((B, T, E), dec.dtype),
        grid=grid,
        in_specs=in_specs,
        out_specs=out_specs,
        compiler_params=pltpu.CompilerParams(dimension_semantics=("parallel",)),
        cost_estimate=cost,
    )(dec, enc, *param_list)


# ------------------------------ pure-JAX reference ----------------------------

def _ref_ln(x, g, b, eps=1e-5):
    mu = jnp.mean(x, axis=-1, keepdims=True)
    var = jnp.mean((x - mu) ** 2, axis=-1, keepdims=True)
    return (x - mu) / jnp.sqrt(var + eps) * g + b


def _ref_mha(x_kv, x_q, wq, wk, wv, wo, bo, n_head, causal):
    B, T, E = x_q.shape
    S = x_kv.shape[1]
    hs = E // n_head
    hp = jax.lax.Precision.HIGHEST
    q = jnp.einsum("bte,ef->btf", x_q, wq, precision=hp).reshape(B, T, n_head, hs)
    k = jnp.einsum("bse,ef->bsf", x_kv, wk, precision=hp).reshape(B, S, n_head, hs)
    v = jnp.einsum("bse,ef->bsf", x_kv, wv, precision=hp).reshape(B, S, n_head, hs)
    wei = jnp.einsum("bthd,bshd->bhts", q, k, precision=hp) * hs ** -0.5
    if causal:
        mask = jnp.tril(jnp.ones((T, S), dtype=bool))
        wei = jnp.where(mask[None, None], wei, -jnp.inf)
    wei = jax.nn.softmax(wei, axis=-1)
    out = jnp.einsum("bhts,bshd->bthd", wei, v, precision=hp).reshape(B, T, E)
    return jnp.einsum("bte,ef->btf", out, wo, precision=hp) + bo[0]


def decoder_layer_ref(dec, enc, p, n_head):
    hp = jax.lax.Precision.HIGHEST
    x = dec
    h1 = _ref_ln(x, p["ln1_g"], p["ln1_b"])
    x = x + _ref_mha(h1, h1, p["sa_wq"], p["sa_wk"], p["sa_wv"],
                     p["sa_wo"], p["sa_bo"], n_head, causal=True)
    hq = _ref_ln(x, p["ln1_g"], p["ln1_b"])
    hkv = _ref_ln(enc, p["ln2_g"], p["ln2_b"])
    x = x + _ref_mha(hkv, hq, p["ca_wq"], p["ca_wk"], p["ca_wv"],
                     p["ca_wo"], p["ca_bo"], n_head, causal=False)
    h3 = _ref_ln(x, p["ln3_g"], p["ln3_b"])
    ff = jnp.maximum(jnp.einsum("bte,ef->btf", h3, p["ff_w1"], precision=hp)
                     + p["ff_b1"][0], 0.0)
    x = x + jnp.einsum("btf,fe->bte", ff, p["ff_w2"], precision=hp) + p["ff_b2"][0]
    return x


# ----------------------------------- main -------------------------------------

if __name__ == "__main__":
    B, T, S, E, n_head = 2, 8, 16, 32, 4

    key = jax.random.PRNGKey(0)
    keys = jax.random.split(key, 16)

    def w(k, shape, scale=0.1):
        return jax.random.normal(k, shape, dtype=jnp.float32) * scale

    params = {
        # LayerNorm affine params stored as (1, E) for TPU-friendly 2-D layout
        "ln1_g": jnp.ones((1, E), jnp.float32), "ln1_b": jnp.zeros((1, E), jnp.float32),
        "ln2_g": jnp.ones((1, E), jnp.float32), "ln2_b": jnp.zeros((1, E), jnp.float32),
        "ln3_g": jnp.ones((1, E), jnp.float32), "ln3_b": jnp.zeros((1, E), jnp.float32),
        # Self-attention: per-head K/Q/V weights concatenated column-wise -> (E, E)
        "sa_wq": w(keys[0], (E, E)), "sa_wk": w(keys[1], (E, E)), "sa_wv": w(keys[2], (E, E)),
        "sa_wo": w(keys[3], (E, E)), "sa_bo": w(keys[4], (1, E)),
        # Encoder-decoder attention
        "ca_wq": w(keys[5], (E, E)), "ca_wk": w(keys[6], (E, E)), "ca_wv": w(keys[7], (E, E)),
        "ca_wo": w(keys[8], (E, E)), "ca_bo": w(keys[9], (1, E)),
        # FeedForward
        "ff_w1": w(keys[10], (E, 4 * E)), "ff_b1": w(keys[11], (1, 4 * E)),
        "ff_w2": w(keys[12], (4 * E, E)), "ff_b2": w(keys[13], (1, E)),
    }

    dec = jax.random.normal(keys[14], (B, T, E), dtype=jnp.float32)
    enc = jax.random.normal(keys[15], (B, S, E), dtype=jnp.float32)

    out = transformer_decoder_layer(dec, enc, params, n_head)
    out = jax.block_until_ready(out)

    ref = decoder_layer_ref(dec, enc, params, n_head)
    assert out.shape == (B, T, E)
    # bf16 matmul inputs with f32 accumulation -> small numerical error vs f32 reference
    assert jnp.allclose(out, ref, atol=5e-2, rtol=5e-2), "mismatch vs pure-JAX reference"

    print("KERNEL_OK")
</pallas_src>

<mosaic_0001>
module attributes {stable_mosaic.version = 11 : i64} {
  func.func @decoder_layer_kernel(%arg0: i32, %arg1: memref<2x8x32xf32, #tpu.memory_space<vmem>>, %arg2: memref<2x16x32xf32, #tpu.memory_space<vmem>>, %arg3: memref<1x32xf32, #tpu.memory_space<vmem>>, %arg4: memref<1x32xf32, #tpu.memory_space<vmem>>, %arg5: memref<1x32xf32, #tpu.memory_space<vmem>>, %arg6: memref<1x32xf32, #tpu.memory_space<vmem>>, %arg7: memref<1x32xf32, #tpu.memory_space<vmem>>, %arg8: memref<1x32xf32, #tpu.memory_space<vmem>>, %arg9: memref<4x32x8xbf16, #tpu.memory_space<vmem>>, %arg10: memref<4x32x8xbf16, #tpu.memory_space<vmem>>, %arg11: memref<4x32x8xbf16, #tpu.memory_space<vmem>>, %arg12: memref<4x8x32xbf16, #tpu.memory_space<vmem>>, %arg13: memref<1x32xf32, #tpu.memory_space<vmem>>, %arg14: memref<4x32x8xbf16, #tpu.memory_space<vmem>>, %arg15: memref<4x32x8xbf16, #tpu.memory_space<vmem>>, %arg16: memref<4x32x8xbf16, #tpu.memory_space<vmem>>, %arg17: memref<4x8x32xbf16, #tpu.memory_space<vmem>>, %arg18: memref<1x32xf32, #tpu.memory_space<vmem>>, %arg19: memref<32x128xbf16, #tpu.memory_space<vmem>>, %arg20: memref<1x128xf32, #tpu.memory_space<vmem>>, %arg21: memref<128x32xbf16, #tpu.memory_space<vmem>>, %arg22: memref<1x32xf32, #tpu.memory_space<vmem>>, %arg23: memref<2x8x32xf32, #tpu.memory_space<vmem>>) attributes {dimension_semantics = [#tpu.dimension_semantics<parallel>], iteration_bounds = array<i64: 1>, scalar_prefetch = 0 : i64, scratch_operands = 0 : i64, tpu.core_type = #tpu.core_type<tc>, window_params = [{transform_indices = @transform_0, window_bounds = array<i64: 2, 8, 32>}, {transform_indices = @transform_1, window_bounds = array<i64: 2, 16, 32>}, {pipeline_mode = #tpu.pipeline_mode<synchronous>, transform_indices = @transform_2, window_bounds = array<i64: 1, 32>}, {pipeline_mode = #tpu.pipeline_mode<synchronous>, transform_indices = @transform_3, window_bounds = array<i64: 1, 32>}, {pipeline_mode = #tpu.pipeline_mode<synchronous>, transform_indices = @transform_4, window_bounds = array<i64: 1, 32>}, {pipeline_mode = #tpu.pipeline_mode<synchronous>, transform_indices = @transform_5, window_bounds = array<i64: 1, 32>}, {pipeline_mode = #tpu.pipeline_mode<synchronous>, transform_indices = @transform_6, window_bounds = array<i64: 1, 32>}, {pipeline_mode = #tpu.pipeline_mode<synchronous>, transform_indices = @transform_7, window_bounds = array<i64: 1, 32>}, {pipeline_mode = #tpu.pipeline_mode<synchronous>, transform_indices = @transform_8, window_bounds = array<i64: 4, 32, 8>}, {pipeline_mode = #tpu.pipeline_mode<synchronous>, transform_indices = @transform_9, window_bounds = array<i64: 4, 32, 8>}, {pipeline_mode = #tpu.pipeline_mode<synchronous>, transform_indices = @transform_10, window_bounds = array<i64: 4, 32, 8>}, {pipeline_mode = #tpu.pipeline_mode<synchronous>, transform_indices = @transform_11, window_bounds = array<i64: 4, 8, 32>}, {pipeline_mode = #tpu.pipeline_mode<synchronous>, transform_indices = @transform_12, window_bounds = array<i64: 1, 32>}, {pipeline_mode = #tpu.pipeline_mode<synchronous>, transform_indices = @transform_13, window_bounds = array<i64: 4, 32, 8>}, {pipeline_mode = #tpu.pipeline_mode<synchronous>, transform_indices = @transform_14, window_bounds = array<i64: 4, 32, 8>}, {pipeline_mode = #tpu.pipeline_mode<synchronous>, transform_indices = @transform_15, window_bounds = array<i64: 4, 32, 8>}, {pipeline_mode = #tpu.pipeline_mode<synchronous>, transform_indices = @transform_16, window_bounds = array<i64: 4, 8, 32>}, {pipeline_mode = #tpu.pipeline_mode<synchronous>, transform_indices = @transform_17, window_bounds = array<i64: 1, 32>}, {pipeline_mode = #tpu.pipeline_mode<synchronous>, transform_indices = @transform_18, window_bounds = array<i64: 32, 128>}, {pipeline_mode = #tpu.pipeline_mode<synchronous>, transform_indices = @transform_19, window_bounds = array<i64: 1, 128>}, {pipeline_mode = #tpu.pipeline_mode<synchronous>, transform_indices = @transform_20, window_bounds = array<i64: 128, 32>}, {pipeline_mode = #tpu.pipeline_mode<synchronous>, transform_indices = @transform_21, window_bounds = array<i64: 1, 32>}, {transform_indices = @transform_22, window_bounds = array<i64: 2, 8, 32>}]} {
    %c0 = arith.constant 0 : index
    %c0_0 = arith.constant 0 : index
    %c0_1 = arith.constant 0 : index
    %0 = vector.load %arg1[%c0, %c0_0, %c0_1] : memref<2x8x32xf32, #tpu.memory_space<vmem>>, vector<2x8x32xf32>
    %1 = vector.shape_cast %0 : vector<2x8x32xf32> to vector<16x32xf32>
    %c0_2 = arith.constant 0 : index
    %c0_3 = arith.constant 0 : index
    %c0_4 = arith.constant 0 : index
    %2 = vector.load %arg2[%c0_2, %c0_3, %c0_4] : memref<2x16x32xf32, #tpu.memory_space<vmem>>, vector<2x16x32xf32>
    %3 = vector.shape_cast %2 : vector<2x16x32xf32> to vector<32x32xf32>
    %4 = tpu.iota {dimensions = array<i32: 0>} : vector<8x8xi32>
    %5 = tpu.iota {dimensions = array<i32: 1>} : vector<8x8xi32>
    %6 = arith.cmpi sle, %5, %4 : vector<8x8xi32>
    %cst = arith.constant 0.000000e+00 : f32
    %cst_5 = arith.constant -1.000000e+30 : f32
    %7 = vector.broadcast %cst : f32 to vector<8x8xf32>
    %8 = vector.broadcast %cst_5 : f32 to vector<8x8xf32>
    %9 = arith.select %6, %7, %8 : vector<8x8xi1>, vector<8x8xf32>
    %c0_6 = arith.constant 0 : index
    %c0_7 = arith.constant 0 : index
    %10 = vector.load %arg3[%c0_6, %c0_7] : memref<1x32xf32, #tpu.memory_space<vmem>>, vector<1x32xf32>
    %c0_8 = arith.constant 0 : index
    %c0_9 = arith.constant 0 : index
    %11 = vector.load %arg4[%c0_8, %c0_9] : memref<1x32xf32, #tpu.memory_space<vmem>>, vector<1x32xf32>
    %c0_10 = arith.constant 0 : index
    %c0_11 = arith.constant 0 : index
    %12 = vector.load %arg5[%c0_10, %c0_11] : memref<1x32xf32, #tpu.memory_space<vmem>>, vector<1x32xf32>
    %c0_12 = arith.constant 0 : index
    %c0_13 = arith.constant 0 : index
    %13 = vector.load %arg6[%c0_12, %c0_13] : memref<1x32xf32, #tpu.memory_space<vmem>>, vector<1x32xf32>
    %c0_14 = arith.constant 0 : index
    %c0_15 = arith.constant 0 : index
    %14 = vector.load %arg7[%c0_14, %c0_15] : memref<1x32xf32, #tpu.memory_space<vmem>>, vector<1x32xf32>
    %c0_16 = arith.constant 0 : index
    %c0_17 = arith.constant 0 : index
    %15 = vector.load %arg8[%c0_16, %c0_17] : memref<1x32xf32, #tpu.memory_space<vmem>>, vector<1x32xf32>
    %cst_18 = arith.constant dense<0.000000e+00> : vector<16xf32>
    %16 = vector.multi_reduction <add>, %1, %cst_18 [1] : vector<16x32xf32> to vector<16xf32>
    %17 = vector.shape_cast %16 : vector<16xf32> to vector<16x1xf32>
    %cst_19 = arith.constant 3.200000e+01 : f32
    %18 = vector.broadcast %cst_19 : f32 to vector<16x1xf32>
    %19 = arith.divf %17, %18 : vector<16x1xf32>
    %20 = vector.broadcast %19 : vector<16x1xf32> to vector<16x32xf32>
    %21 = arith.subf %1, %20 : vector<16x32xf32>
    %22 = arith.mulf %21, %21 : vector<16x32xf32>
    %cst_20 = arith.constant dense<0.000000e+00> : vector<16xf32>
    %23 = vector.multi_reduction <add>, %22, %cst_20 [1] : vector<16x32xf32> to vector<16xf32>
    %24 = vector.shape_cast %23 : vector<16xf32> to vector<16x1xf32>
    %cst_21 = arith.constant 3.200000e+01 : f32
    %25 = vector.broadcast %cst_21 : f32 to vector<16x1xf32>
    %26 = arith.divf %24, %25 : vector<16x1xf32>
    %27 = vector.broadcast %19 : vector<16x1xf32> to vector<16x32xf32>
    %28 = arith.subf %1, %27 : vector<16x32xf32>
    %cst_22 = arith.constant 9.99999974E-6 : f32
    %29 = vector.broadcast %cst_22 : f32 to vector<16x1xf32>
    %30 = arith.addf %26, %29 : vector<16x1xf32>
    %31 = math.rsqrt %30 : vector<16x1xf32>
    %32 = vector.broadcast %31 : vector<16x1xf32> to vector<16x32xf32>
    %33 = arith.mulf %28, %32 : vector<16x32xf32>
    %34 = vector.broadcast %10 : vector<1x32xf32> to vector<16x32xf32>
    %35 = arith.mulf %33, %34 : vector<16x32xf32>
    %36 = vector.broadcast %11 : vector<1x32xf32> to vector<16x32xf32>
    %37 = arith.addf %35, %36 : vector<16x32xf32>
    %c0_23 = arith.constant 0 : index
    %c0_24 = arith.constant 0 : index
    %38 = vector.load %arg13[%c0_23, %c0_24] : memref<1x32xf32, #tpu.memory_space<vmem>>, vector<1x32xf32>
    %39 = arith.truncf %37 : vector<16x32xf32> to vector<16x32xbf16>
    %40 = arith.truncf %37 : vector<16x32xf32> to vector<16x32xbf16>
    %cst_25 = arith.constant 0.000000e+00 : f32
    %41 = vector.broadcast %cst_25 : f32 to vector<16x32xf32>
    %42 = vector.broadcast %38 : vector<1x32xf32> to vector<16x32xf32>
    %43 = arith.addf %41, %42 : vector<16x32xf32>
    %c0_26 = arith.constant 0 : index
    %c0_27 = arith.constant 0 : index
    %c0_28 = arith.constant 0 : index
    %44 = vector.load %arg9[%c0_26, %c0_27, %c0_28] : memref<4x32x8xbf16, #tpu.memory_space<vmem>>, vector<1x32x8xbf16>
    %45 = vector.shape_cast %44 : vector<1x32x8xbf16> to vector<32x8xbf16>
    %cst_29 = arith.constant dense<0.000000e+00> : vector<16x8xf32>
    %46 = tpu.matmul %39, %45, %cst_29 {dimension_numbers = #tpu.dot_dimension_numbers<[1], [0], [0], [1], [0, 0, 1, 1], [], []>} : vector<16x32xbf16>, vector<32x8xbf16>, vector<16x8xf32> -> vector<16x8xf32>
    %cst_30 = arith.constant 0.353553385 : f32
    %47 = vector.broadcast %cst_30 : f32 to vector<16x8xf32>
    %48 = arith.mulf %46, %47 : vector<16x8xf32>
    %c0_31 = arith.constant 0 : index
    %c0_32 = arith.constant 0 : index
    %c0_33 = arith.constant 0 : index
    %49 = vector.load %arg10[%c0_31, %c0_32, %c0_33] : memref<4x32x8xbf16, #tpu.memory_space<vmem>>, vector<1x32x8xbf16>
    %50 = vector.shape_cast %49 : vector<1x32x8xbf16> to vector<32x8xbf16>
    %cst_34 = arith.constant dense<0.000000e+00> : vector<16x8xf32>
    %51 = tpu.matmul %40, %50, %cst_34 {dimension_numbers = #tpu.dot_dimension_numbers<[1], [0], [0], [1], [0, 0, 1, 1], [], []>} : vector<16x32xbf16>, vector<32x8xbf16>, vector<16x8xf32> -> vector<16x8xf32>
    %c0_35 = arith.constant 0 : index
    %c0_36 = arith.constant 0 : index
    %c0_37 = arith.constant 0 : index
    %52 = vector.load %arg11[%c0_35, %c0_36, %c0_37] : memref<4x32x8xbf16, #tpu.memory_space<vmem>>, vector<1x32x8xbf16>
    %53 = vector.shape_cast %52 : vector<1x32x8xbf16> to vector<32x8xbf16>
    %cst_38 = arith.constant dense<0.000000e+00> : vector<16x8xf32>
    %54 = tpu.matmul %40, %53, %cst_38 {dimension_numbers = #tpu.dot_dimension_numbers<[1], [0], [0], [1], [0, 0, 1, 1], [], []>} : vector<16x32xbf16>, vector<32x8xbf16>, vector<16x8xf32> -> vector<16x8xf32>
    %55 = vector.shape_cast %48 : vector<16x8xf32> to vector<2x8x8xf32>
    %56 = arith.truncf %55 : vector<2x8x8xf32> to vector<2x8x8xbf16>
    %57 = vector.shape_cast %51 : vector<16x8xf32> to vector<2x8x8xf32>
    %58 = arith.truncf %57 : vector<2x8x8xf32> to vector<2x8x8xbf16>
    %59 = vector.shape_cast %54 : vector<16x8xf32> to vector<2x8x8xf32>
    %60 = arith.truncf %59 : vector<2x8x8xf32> to vector<2x8x8xbf16>
    "tpu.trace_start"() <{level = 10 : i32, message = "btd,bsd->bts"}> : () -> ()
    %cst_39 = arith.constant dense<0.000000e+00> : vector<2x8x8xf32>
    %61 = tpu.matmul %56, %58, %cst_39 {dimension_numbers = #tpu.dot_dimension_numbers<[2], [2], [1], [1], [0, 0, 0, 1, 1, 1], [0], [0]>} : vector<2x8x8xbf16>, vector<2x8x8xbf16>, vector<2x8x8xf32> -> vector<2x8x8xf32>
    "tpu.trace_stop"() : () -> ()
    %62 = vector.shape_cast %9 : vector<8x8xf32> to vector<1x8x8xf32>
    %63 = vector.broadcast %62 : vector<1x8x8xf32> to vector<2x8x8xf32>
    %64 = arith.addf %61, %63 : vector<2x8x8xf32>
    %cst_40 = arith.constant dense<0xFF800000> : vector<2x8xf32>
    %65 = vector.multi_reduction <maximumf>, %64, %cst_40 [2] : vector<2x8x8xf32> to vector<2x8xf32>
    %66 = vector.shape_cast %65 : vector<2x8xf32> to vector<2x8x1xf32>
    %67 = vector.broadcast %66 : vector<2x8x1xf32> to vector<2x8x8xf32>
    %68 = arith.subf %64, %67 : vector<2x8x8xf32>
    %69 = math.exp %68 : vector<2x8x8xf32>
    %cst_41 = arith.constant dense<0.000000e+00> : vector<2x8xf32>
    %70 = vector.multi_reduction <add>, %69, %cst_41 [2] : vector<2x8x8xf32> to vector<2x8xf32>
    %71 = vector.shape_cast %70 : vector<2x8xf32> to vector<2x8x1xf32>
    %72 = tpu.reciprocal %71 {approx = true} : vector<2x8x1xf32> -> vector<2x8x1xf32>
    %73 = vector.broadcast %72 : vector<2x8x1xf32> to vector<2x8x8xf32>
    %74 = arith.mulf %69, %73 : vector<2x8x8xf32>
    %75 = arith.truncf %74 : vector<2x8x8xf32> to vector<2x8x8xbf16>
    "tpu.trace_start"() <{level = 10 : i32, message = "bts,bsd->btd"}> : () -> ()
    %cst_42 = arith.constant dense<0.000000e+00> : vector<2x8x8xf32>
    %76 = tpu.matmul %75, %60, %cst_42 {dimension_numbers = #tpu.dot_dimension_numbers<[2], [1], [1], [2], [0, 0, 0, 1, 1, 2], [0], [0]>} : vector<2x8x8xbf16>, vector<2x8x8xbf16>, vector<2x8x8xf32> -> vector<2x8x8xf32>
    "tpu.trace_stop"() : () -> ()
    %77 = vector.shape_cast %76 : vector<2x8x8xf32> to vector<16x8xf32>
    %78 = arith.truncf %77 : vector<16x8xf32> to vector<16x8xbf16>
    %c0_43 = arith.constant 0 : index
    %c0_44 = arith.constant 0 : index
    %c0_45 = arith.constant 0 : index
    %79 = vector.load %arg12[%c0_43, %c0_44, %c0_45] : memref<4x8x32xbf16, #tpu.memory_space<vmem>>, vector<1x8x32xbf16>
    %80 = vector.shape_cast %79 : vector<1x8x32xbf16> to vector<8x32xbf16>
    %cst_46 = arith.constant dense<0.000000e+00> : vector<16x32xf32>
    %81 = tpu.matmul %78, %80, %cst_46 {dimension_numbers = #tpu.dot_dimension_numbers<[1], [0], [0], [1], [0, 0, 1, 1], [], []>} : vector<16x8xbf16>, vector<8x32xbf16>, vector<16x32xf32> -> vector<16x32xf32>
    %82 = arith.addf %43, %81 : vector<16x32xf32>
    %c1 = arith.constant 1 : index
    %c0_47 = arith.constant 0 : index
    %c0_48 = arith.constant 0 : index
    %83 = vector.load %arg9[%c1, %c0_47, %c0_48] : memref<4x32x8xbf16, #tpu.memory_space<vmem>>, vector<1x32x8xbf16>
    %84 = vector.shape_cast %83 : vector<1x32x8xbf16> to vector<32x8xbf16>
    %cst_49 = arith.constant dense<0.000000e+00> : vector<16x8xf32>
    %85 = tpu.matmul %39, %84, %cst_49 {dimension_numbers = #tpu.dot_dimension_numbers<[1], [0], [0], [1], [0, 0, 1, 1], [], []>} : vector<16x32xbf16>, vector<32x8xbf16>, vector<16x8xf32> -> vector<16x8xf32>
    %cst_50 = arith.constant 0.353553385 : f32
    %86 = vector.broadcast %cst_50 : f32 to vector<16x8xf32>
    %87 = arith.mulf %85, %86 : vector<16x8xf32>
    %c1_51 = arith.constant 1 : index
    %c0_52 = arith.constant 0 : index
    %c0_53 = arith.constant 0 : index
    %88 = vector.load %arg10[%c1_51, %c0_52, %c0_53] : memref<4x32x8xbf16, #tpu.memory_space<vmem>>, vector<1x32x8xbf16>
    %89 = vector.shape_cast %88 : vector<1x32x8xbf16> to vector<32x8xbf16>
    %cst_54 = arith.constant dense<0.000000e+00> : vector<16x8xf32>
    %90 = tpu.matmul %40, %89, %cst_54 {dimension_numbers = #tpu.dot_dimension_numbers<[1], [0], [0], [1], [0, 0, 1, 1], [], []>} : vector<16x32xbf16>, vector<32x8xbf16>, vector<16x8xf32> -> vector<16x8xf32>
    %c1_55 = arith.constant 1 : index
    %c0_56 = arith.constant 0 : index
    %c0_57 = arith.constant 0 : index
    %91 = vector.load %arg11[%c1_55, %c0_56, %c0_57] : memref<4x32x8xbf16, #tpu.memory_space<vmem>>, vector<1x32x8xbf16>
    %92 = vector.shape_cast %91 : vector<1x32x8xbf16> to vector<32x8xbf16>
    %cst_58 = arith.constant dense<0.000000e+00> : vector<16x8xf32>
    %93 = tpu.matmul %40, %92, %cst_58 {dimension_numbers = #tpu.dot_dimension_numbers<[1], [0], [0], [1], [0, 0, 1, 1], [], []>} : vector<16x32xbf16>, vector<32x8xbf16>, vector<16x8xf32> -> vector<16x8xf32>
    %94 = vector.shape_cast %87 : vector<16x8xf32> to vector<2x8x8xf32>
    %95 = arith.truncf %94 : vector<2x8x8xf32> to vector<2x8x8xbf16>
    %96 = vector.shape_cast %90 : vector<16x8xf32> to vector<2x8x8xf32>
    %97 = arith.truncf %96 : vector<2x8x8xf32> to vector<2x8x8xbf16>
    %98 = vector.shape_cast %93 : vector<16x8xf32> to vector<2x8x8xf32>
    %99 = arith.truncf %98 : vector<2x8x8xf32> to vector<2x8x8xbf16>
    "tpu.trace_start"() <{level = 10 : i32, message = "btd,bsd->bts"}> : () -> ()
    %cst_59 = arith.constant dense<0.000000e+00> : vector<2x8x8xf32>
    %100 = tpu.matmul %95, %97, %cst_59 {dimension_numbers = #tpu.dot_dimension_numbers<[2], [2], [1], [1], [0, 0, 0, 1, 1, 1], [0], [0]>} : vector<2x8x8xbf16>, vector<2x8x8xbf16>, vector<2x8x8xf32> -> vector<2x8x8xf32>
    "tpu.trace_stop"() : () -> ()
    %101 = vector.shape_cast %9 : vector<8x8xf32> to vector<1x8x8xf32>
    %102 = vector.broadcast %101 : vector<1x8x8xf32> to vector<2x8x8xf32>
    %103 = arith.addf %100, %102 : vector<2x8x8xf32>
    %cst_60 = arith.constant dense<0xFF800000> : vector<2x8xf32>
    %104 = vector.multi_reduction <maximumf>, %103, %cst_60 [2] : vector<2x8x8xf32> to vector<2x8xf32>
    %105 = vector.shape_cast %104 : vector<2x8xf32> to vector<2x8x1xf32>
    %106 = vector.broadcast %105 : vector<2x8x1xf32> to vector<2x8x8xf32>
    %107 = arith.subf %103, %106 : vector<2x8x8xf32>
    %108 = math.exp %107 : vector<2x8x8xf32>
    %cst_61 = arith.constant dense<0.000000e+00> : vector<2x8xf32>
    %109 = vector.multi_reduction <add>, %108, %cst_61 [2] : vector<2x8x8xf32> to vector<2x8xf32>
    %110 = vector.shape_cast %109 : vector<2x8xf32> to vector<2x8x1xf32>
    %111 = tpu.reciprocal %110 {approx = true} : vector<2x8x1xf32> -> vector<2x8x1xf32>
    %112 = vector.broadcast %111 : vector<2x8x1xf32> to vector<2x8x8xf32>
    %113 = arith.mulf %108, %112 : vector<2x8x8xf32>
    %114 = arith.truncf %113 : vector<2x8x8xf32> to vector<2x8x8xbf16>
    "tpu.trace_start"() <{level = 10 : i32, message = "bts,bsd->btd"}> : () -> ()
    %cst_62 = arith.constant dense<0.000000e+00> : vector<2x8x8xf32>
    %115 = tpu.matmul %114, %99, %cst_62 {dimension_numbers = #tpu.dot_dimension_numbers<[2], [1], [1], [2], [0, 0, 0, 1, 1, 2], [0], [0]>} : vector<2x8x8xbf16>, vector<2x8x8xbf16>, vector<2x8x8xf32> -> vector<2x8x8xf32>
    "tpu.trace_stop"() : () -> ()
    %116 = vector.shape_cast %115 : vector<2x8x8xf32> to vector<16x8xf32>
    %117 = arith.truncf %116 : vector<16x8xf32> to vector<16x8xbf16>
    %c1_63 = arith.constant 1 : index
    %c0_64 = arith.constant 0 : index
    %c0_65 = arith.constant 0 : index
    %118 = vector.load %arg12[%c1_63, %c0_64, %c0_65] : memref<4x8x32xbf16, #tpu.memory_space<vmem>>, vector<1x8x32xbf16>
    %119 = vector.shape_cast %118 : vector<1x8x32xbf16> to vector<8x32xbf16>
    %cst_66 = arith.constant dense<0.000000e+00> : vector<16x32xf32>
    %120 = tpu.matmul %117, %119, %cst_66 {dimension_numbers = #tpu.dot_dimension_numbers<[1], [0], [0], [1], [0, 0, 1, 1], [], []>} : vector<16x8xbf16>, vector<8x32xbf16>, vector<16x32xf32> -> vector<16x32xf32>
    %121 = arith.addf %82, %120 : vector<16x32xf32>
    %c2 = arith.constant 2 : index
    %c0_67 = arith.constant 0 : index
    %c0_68 = arith.constant 0 : index
    %122 = vector.load %arg9[%c2, %c0_67, %c0_68] : memref<4x32x8xbf16, #tpu.memory_space<vmem>>, vector<1x32x8xbf16>
    %123 = vector.shape_cast %122 : vector<1x32x8xbf16> to vector<32x8xbf16>
    %cst_69 = arith.constant dense<0.000000e+00> : vector<16x8xf32>
    %124 = tpu.matmul %39, %123, %cst_69 {dimension_numbers = #tpu.dot_dimension_numbers<[1], [0], [0], [1], [0, 0, 1, 1], [], []>} : vector<16x32xbf16>, vector<32x8xbf16>, vector<16x8xf32> -> vector<16x8xf32>
    %cst_70 = arith.constant 0.353553385 : f32
    %125 = vector.broadcast %cst_70 : f32 to vector<16x8xf32>
    %126 = arith.mulf %124, %125 : vector<16x8xf32>
    %c2_71 = arith.constant 2 : index
    %c0_72 = arith.constant 0 : index
    %c0_73 = arith.constant 0 : index
    %127 = vector.load %arg10[%c2_71, %c0_72, %c0_73] : memref<4x32x8xbf16, #tpu.memory_space<vmem>>, vector<1x32x8xbf16>
    %128 = vector.shape_cast %127 : vector<1x32x8xbf16> to vector<32x8xbf16>
    %cst_74 = arith.constant dense<0.000000e+00> : vector<16x8xf32>
    %129 = tpu.matmul %40, %128, %cst_74 {dimension_numbers = #tpu.dot_dimension_numbers<[1], [0], [0], [1], [0, 0, 1, 1], [], []>} : vector<16x32xbf16>, vector<32x8xbf16>, vector<16x8xf32> -> vector<16x8xf32>
    %c2_75 = arith.constant 2 : index
    %c0_76 = arith.constant 0 : index
    %c0_77 = arith.constant 0 : index
    %130 = vector.load %arg11[%c2_75, %c0_76, %c0_77] : memref<4x32x8xbf16, #tpu.memory_space<vmem>>, vector<1x32x8xbf16>
    %131 = vector.shape_cast %130 : vector<1x32x8xbf16> to vector<32x8xbf16>
    %cst_78 = arith.constant dense<0.000000e+00> : vector<16x8xf32>
    %132 = tpu.matmul %40, %131, %cst_78 {dimension_numbers = #tpu.dot_dimension_numbers<[1], [0], [0], [1], [0, 0, 1, 1], [], []>} : vector<16x32xbf16>, vector<32x8xbf16>, vector<16x8xf32> -> vector<16x8xf32>
    %133 = vector.shape_cast %126 : vector<16x8xf32> to vector<2x8x8xf32>
    %134 = arith.truncf %133 : vector<2x8x8xf32> to vector<2x8x8xbf16>
    %135 = vector.shape_cast %129 : vector<16x8xf32> to vector<2x8x8xf32>
    %136 = arith.truncf %135 : vector<2x8x8xf32> to vector<2x8x8xbf16>
    %137 = vector.shape_cast %132 : vector<16x8xf32> to vector<2x8x8xf32>
    %138 = arith.truncf %137 : vector<2x8x8xf32> to vector<2x8x8xbf16>
    "tpu.trace_start"() <{level = 10 : i32, message = "btd,bsd->bts"}> : () -> ()
    %cst_79 = arith.constant dense<0.000000e+00> : vector<2x8x8xf32>
    %139 = tpu.matmul %134, %136, %cst_79 {dimension_numbers = #tpu.dot_dimension_numbers<[2], [2], [1], [1], [0, 0, 0, 1, 1, 1], [0], [0]>} : vector<2x8x8xbf16>, vector<2x8x8xbf16>, vector<2x8x8xf32> -> vector<2x8x8xf32>
    "tpu.trace_stop"() : () -> ()
    %140 = vector.shape_cast %9 : vector<8x8xf32> to vector<1x8x8xf32>
    %141 = vector.broadcast %140 : vector<1x8x8xf32> to vector<2x8x8xf32>
    %142 = arith.addf %139, %141 : vector<2x8x8xf32>
    %cst_80 = arith.constant dense<0xFF800000> : vector<2x8xf32>
    %143 = vector.multi_reduction <maximumf>, %142, %cst_80 [2] : vector<2x8x8xf32> to vector<2x8xf32>
    %144 = vector.shape_cast %143 : vector<2x8xf32> to vector<2x8x1xf32>
    %145 = vector.broadcast %144 : vector<2x8x1xf32> to vector<2x8x8xf32>
    %146 = arith.subf %142, %145 : vector<2x8x8xf32>
    %147 = math.exp %146 : vector<2x8x8xf32>
    %cst_81 = arith.constant dense<0.000000e+00> : vector<2x8xf32>
    %148 = vector.multi_reduction <add>, %147, %cst_81 [2] : vector<2x8x8xf32> to vector<2x8xf32>
    %149 = vector.shape_cast %148 : vector<2x8xf32> to vector<2x8x1xf32>
    %150 = tpu.reciprocal %149 {approx = true} : vector<2x8x1xf32> -> vector<2x8x1xf32>
    %151 = vector.broadcast %150 : vector<2x8x1xf32> to vector<2x8x8xf32>
    %152 = arith.mulf %147, %151 : vector<2x8x8xf32>
    %153 = arith.truncf %152 : vector<2x8x8xf32> to vector<2x8x8xbf16>
    "tpu.trace_start"() <{level = 10 : i32, message = "bts,bsd->btd"}> : () -> ()
    %cst_82 = arith.constant dense<0.000000e+00> : vector<2x8x8xf32>
    %154 = tpu.matmul %153, %138, %cst_82 {dimension_numbers = #tpu.dot_dimension_numbers<[2], [1], [1], [2], [0, 0, 0, 1, 1, 2], [0], [0]>} : vector<2x8x8xbf16>, vector<2x8x8xbf16>, vector<2x8x8xf32> -> vector<2x8x8xf32>
    "tpu.trace_stop"() : () -> ()
    %155 = vector.shape_cast %154 : vector<2x8x8xf32> to vector<16x8xf32>
    %156 = arith.truncf %155 : vector<16x8xf32> to vector<16x8xbf16>
    %c2_83 = arith.constant 2 : index
    %c0_84 = arith.constant 0 : index
    %c0_85 = arith.constant 0 : index
    %157 = vector.load %arg12[%c2_83, %c0_84, %c0_85] : memref<4x8x32xbf16, #tpu.memory_space<vmem>>, vector<1x8x32xbf16>
    %158 = vector.shape_cast %157 : vector<1x8x32xbf16> to vector<8x32xbf16>
    %cst_86 = arith.constant dense<0.000000e+00> : vector<16x32xf32>
    %159 = tpu.matmul %156, %158, %cst_86 {dimension_numbers = #tpu.dot_dimension_numbers<[1], [0], [0], [1], [0, 0, 1, 1], [], []>} : vector<16x8xbf16>, vector<8x32xbf16>, vector<16x32xf32> -> vector<16x32xf32>
    %160 = arith.addf %121, %159 : vector<16x32xf32>
    %c3 = arith.constant 3 : index
    %c0_87 = arith.constant 0 : index
    %c0_88 = arith.constant 0 : index
    %161 = vector.load %arg9[%c3, %c0_87, %c0_88] : memref<4x32x8xbf16, #tpu.memory_space<vmem>>, vector<1x32x8xbf16>
    %162 = vector.shape_cast %161 : vector<1x32x8xbf16> to vector<32x8xbf16>
    %cst_89 = arith.constant dense<0.000000e+00> : vector<16x8xf32>
    %163 = tpu.matmul %39, %162, %cst_89 {dimension_numbers = #tpu.dot_dimension_numbers<[1], [0], [0], [1], [0, 0, 1, 1], [], []>} : vector<16x32xbf16>, vector<32x8xbf16>, vector<16x8xf32> -> vector<16x8xf32>
    %cst_90 = arith.constant 0.353553385 : f32
    %164 = vector.broadcast %cst_90 : f32 to vector<16x8xf32>
    %165 = arith.mulf %163, %164 : vector<16x8xf32>
    %c3_91 = arith.constant 3 : index
    %c0_92 = arith.constant 0 : index
    %c0_93 = arith.constant 0 : index
    %166 = vector.load %arg10[%c3_91, %c0_92, %c0_93] : memref<4x32x8xbf16, #tpu.memory_space<vmem>>, vector<1x32x8xbf16>
    %167 = vector.shape_cast %166 : vector<1x32x8xbf16> to vector<32x8xbf16>
    %cst_94 = arith.constant dense<0.000000e+00> : vector<16x8xf32>
    %168 = tpu.matmul %40, %167, %cst_94 {dimension_numbers = #tpu.dot_dimension_numbers<[1], [0], [0], [1], [0, 0, 1, 1], [], []>} : vector<16x32xbf16>, vector<32x8xbf16>, vector<16x8xf32> -> vector<16x8xf32>
    %c3_95 = arith.constant 3 : index
    %c0_96 = arith.constant 0 : index
    %c0_97 = arith.constant 0 : index
    %169 = vector.load %arg11[%c3_95, %c0_96, %c0_97] : memref<4x32x8xbf16, #tpu.memory_space<vmem>>, vector<1x32x8xbf16>
    %170 = vector.shape_cast %169 : vector<1x32x8xbf16> to vector<32x8xbf16>
    %cst_98 = arith.constant dense<0.000000e+00> : vector<16x8xf32>
    %171 = tpu.matmul %40, %170, %cst_98 {dimension_numbers = #tpu.dot_dimension_numbers<[1], [0], [0], [1], [0, 0, 1, 1], [], []>} : vector<16x32xbf16>, vector<32x8xbf16>, vector<16x8xf32> -> vector<16x8xf32>
    %172 = vector.shape_cast %165 : vector<16x8xf32> to vector<2x8x8xf32>
    %173 = arith.truncf %172 : vector<2x8x8xf32> to vector<2x8x8xbf16>
    %174 = vector.shape_cast %168 : vector<16x8xf32> to vector<2x8x8xf32>
    %175 = arith.truncf %174 : vector<2x8x8xf32> to vector<2x8x8xbf16>
    %176 = vector.shape_cast %171 : vector<16x8xf32> to vector<2x8x8xf32>
    %177 = arith.truncf %176 : vector<2x8x8xf32> to vector<2x8x8xbf16>
    "tpu.trace_start"() <{level = 10 : i32, message = "btd,bsd->bts"}> : () -> ()
    %cst_99 = arith.constant dense<0.000000e+00> : vector<2x8x8xf32>
    %178 = tpu.matmul %173, %175, %cst_99 {dimension_numbers = #tpu.dot_dimension_numbers<[2], [2], [1], [1], [0, 0, 0, 1, 1, 1], [0], [0]>} : vector<2x8x8xbf16>, vector<2x8x8xbf16>, vector<2x8x8xf32> -> vector<2x8x8xf32>
    "tpu.trace_stop"() : () -> ()
    %179 = vector.shape_cast %9 : vector<8x8xf32> to vector<1x8x8xf32>
    %180 = vector.broadcast %179 : vector<1x8x8xf32> to vector<2x8x8xf32>
    %181 = arith.addf %178, %180 : vector<2x8x8xf32>
    %cst_100 = arith.constant dense<0xFF800000> : vector<2x8xf32>
    %182 = vector.multi_reduction <maximumf>, %181, %cst_100 [2] : vector<2x8x8xf32> to vector<2x8xf32>
    %183 = vector.shape_cast %182 : vector<2x8xf32> to vector<2x8x1xf32>
    %184 = vector.broadcast %183 : vector<2x8x1xf32> to vector<2x8x8xf32>
    %185 = arith.subf %181, %184 : vector<2x8x8xf32>
    %186 = math.exp %185 : vector<2x8x8xf32>
    %cst_101 = arith.constant dense<0.000000e+00> : vector<2x8xf32>
    %187 = vector.multi_reduction <add>, %186, %cst_101 [2] : vector<2x8x8xf32> to vector<2x8xf32>
    %188 = vector.shape_cast %187 : vector<2x8xf32> to vector<2x8x1xf32>
    %189 = tpu.reciprocal %188 {approx = true} : vector<2x8x1xf32> -> vector<2x8x1xf32>
    %190 = vector.broadcast %189 : vector<2x8x1xf32> to vector<2x8x8xf32>
    %191 = arith.mulf %186, %190 : vector<2x8x8xf32>
    %192 = arith.truncf %191 : vector<2x8x8xf32> to vector<2x8x8xbf16>
    "tpu.trace_start"() <{level = 10 : i32, message = "bts,bsd->btd"}> : () -> ()
    %cst_102 = arith.constant dense<0.000000e+00> : vector<2x8x8xf32>
    %193 = tpu.matmul %192, %177, %cst_102 {dimension_numbers = #tpu.dot_dimension_numbers<[2], [1], [1], [2], [0, 0, 0, 1, 1, 2], [0], [0]>} : vector<2x8x8xbf16>, vector<2x8x8xbf16>, vector<2x8x8xf32> -> vector<2x8x8xf32>
    "tpu.trace_stop"() : () -> ()
    %194 = vector.shape_cast %193 : vector<2x8x8xf32> to vector<16x8xf32>
    %195 = arith.truncf %194 : vector<16x8xf32> to vector<16x8xbf16>
    %c3_103 = arith.constant 3 : index
    %c0_104 = arith.constant 0 : index
    %c0_105 = arith.constant 0 : index
    %196 = vector.load %arg12[%c3_103, %c0_104, %c0_105] : memref<4x8x32xbf16, #tpu.memory_space<vmem>>, vector<1x8x32xbf16>
    %197 = vector.shape_cast %196 : vector<1x8x32xbf16> to vector<8x32xbf16>
    %cst_106 = arith.constant dense<0.000000e+00> : vector<16x32xf32>
    %198 = tpu.matmul %195, %197, %cst_106 {dimension_numbers = #tpu.dot_dimension_numbers<[1], [0], [0], [1], [0, 0, 1, 1], [], []>} : vector<16x8xbf16>, vector<8x32xbf16>, vector<16x32xf32> -> vector<16x32xf32>
    %199 = arith.addf %160, %198 : vector<16x32xf32>
    %200 = arith.addf %1, %199 : vector<16x32xf32>
    %cst_107 = arith.constant dense<0.000000e+00> : vector<16xf32>
    %201 = vector.multi_reduction <add>, %200, %cst_107 [1] : vector<16x32xf32> to vector<16xf32>
    %202 = vector.shape_cast %201 : vector<16xf32> to vector<16x1xf32>
    %cst_108 = arith.constant 3.200000e+01 : f32
    %203 = vector.broadcast %cst_108 : f32 to vector<16x1xf32>
    %204 = arith.divf %202, %203 : vector<16x1xf32>
    %205 = vector.broadcast %204 : vector<16x1xf32> to vector<16x32xf32>
    %206 = arith.subf %200, %205 : vector<16x32xf32>
    %207 = arith.mulf %206, %206 : vector<16x32xf32>
    %cst_109 = arith.constant dense<0.000000e+00> : vector<16xf32>
    %208 = vector.multi_reduction <add>, %207, %cst_109 [1] : vector<16x32xf32> to vector<16xf32>
    %209 = vector.shape_cast %208 : vector<16xf32> to vector<16x1xf32>
    %cst_110 = arith.constant 3.200000e+01 : f32
    %210 = vector.broadcast %cst_110 : f32 to vector<16x1xf32>
    %211 = arith.divf %209, %210 : vector<16x1xf32>
    %212 = vector.broadcast %204 : vector<16x1xf32> to vector<16x32xf32>
    %213 = arith.subf %200, %212 : vector<16x32xf32>
    %cst_111 = arith.constant 9.99999974E-6 : f32
    %214 = vector.broadcast %cst_111 : f32 to vector<16x1xf32>
    %215 = arith.addf %211, %214 : vector<16x1xf32>
    %216 = math.rsqrt %215 : vector<16x1xf32>
    %217 = vector.broadcast %216 : vector<16x1xf32> to vector<16x32xf32>
    %218 = arith.mulf %213, %217 : vector<16x32xf32>
    %219 = vector.broadcast %10 : vector<1x32xf32> to vector<16x32xf32>
    %220 = arith.mulf %218, %219 : vector<16x32xf32>
    %221 = vector.broadcast %11 : vector<1x32xf32> to vector<16x32xf32>
    %222 = arith.addf %220, %221 : vector<16x32xf32>
    %cst_112 = arith.constant dense<0.000000e+00> : vector<32xf32>
    %223 = vector.multi_reduction <add>, %3, %cst_112 [1] : vector<32x32xf32> to vector<32xf32>
    %224 = vector.shape_cast %223 : vector<32xf32> to vector<32x1xf32>
    %cst_113 = arith.constant 3.200000e+01 : f32
    %225 = vector.broadcast %cst_113 : f32 to vector<32x1xf32>
    %226 = arith.divf %224, %225 : vector<32x1xf32>
    %227 = vector.broadcast %226 : vector<32x1xf32> to vector<32x32xf32>
    %228 = arith.subf %3, %227 : vector<32x32xf32>
    %229 = arith.mulf %228, %228 : vector<32x32xf32>
    %cst_114 = arith.constant dense<0.000000e+00> : vector<32xf32>
    %230 = vector.multi_reduction <add>, %229, %cst_114 [1] : vector<32x32xf32> to vector<32xf32>
    %231 = vector.shape_cast %230 : vector<32xf32> to vector<32x1xf32>
    %cst_115 = arith.constant 3.200000e+01 : f32
    %232 = vector.broadcast %cst_115 : f32 to vector<32x1xf32>
    %233 = arith.divf %231, %232 : vector<32x1xf32>
    %234 = vector.broadcast %226 : vector<32x1xf32> to vector<32x32xf32>
    %235 = arith.subf %3, %234 : vector<32x32xf32>
    %cst_116 = arith.constant 9.99999974E-6 : f32
    %236 = vector.broadcast %cst_116 : f32 to vector<32x1xf32>
    %237 = arith.addf %233, %236 : vector<32x1xf32>
    %238 = math.rsqrt %237 : vector<32x1xf32>
    %239 = vector.broadcast %238 : vector<32x1xf32> to vector<32x32xf32>
    %240 = arith.mulf %235, %239 : vector<32x32xf32>
    %241 = vector.broadcast %12 : vector<1x32xf32> to vector<32x32xf32>
    %242 = arith.mulf %240, %241 : vector<32x32xf32>
    %243 = vector.broadcast %13 : vector<1x32xf32> to vector<32x32xf32>
    %244 = arith.addf %242, %243 : vector<32x32xf32>
    %c0_117 = arith.constant 0 : index
    %c0_118 = arith.constant 0 : index
    %245 = vector.load %arg18[%c0_117, %c0_118] : memref<1x32xf32, #tpu.memory_space<vmem>>, vector<1x32xf32>
    %246 = arith.truncf %222 : vector<16x32xf32> to vector<16x32xbf16>
    %247 = arith.truncf %244 : vector<32x32xf32> to vector<32x32xbf16>
    %cst_119 = arith.constant 0.000000e+00 : f32
    %248 = vector.broadcast %cst_119 : f32 to vector<16x32xf32>
    %249 = vector.broadcast %245 : vector<1x32xf32> to vector<16x32xf32>
    %250 = arith.addf %248, %249 : vector<16x32xf32>
    %c0_120 = arith.constant 0 : index
    %c0_121 = arith.constant 0 : index
    %c0_122 = arith.constant 0 : index
    %251 = vector.load %arg14[%c0_120, %c0_121, %c0_122] : memref<4x32x8xbf16, #tpu.memory_space<vmem>>, vector<1x32x8xbf16>
    %252 = vector.shape_cast %251 : vector<1x32x8xbf16> to vector<32x8xbf16>
    %cst_123 = arith.constant dense<0.000000e+00> : vector<16x8xf32>
    %253 = tpu.matmul %246, %252, %cst_123 {dimension_numbers = #tpu.dot_dimension_numbers<[1], [0], [0], [1], [0, 0, 1, 1], [], []>} : vector<16x32xbf16>, vector<32x8xbf16>, vector<16x8xf32> -> vector<16x8xf32>
    %cst_124 = arith.constant 0.353553385 : f32
    %254 = vector.broadcast %cst_124 : f32 to vector<16x8xf32>
    %255 = arith.mulf %253, %254 : vector<16x8xf32>
    %c0_125 = arith.constant 0 : index
    %c0_126 = arith.constant 0 : index
    %c0_127 = arith.constant 0 : index
    %256 = vector.load %arg15[%c0_125, %c0_126, %c0_127] : memref<4x32x8xbf16, #tpu.memory_space<vmem>>, vector<1x32x8xbf16>
    %257 = vector.shape_cast %256 : vector<1x32x8xbf16> to vector<32x8xbf16>
    %cst_128 = arith.constant dense<0.000000e+00> : vector<32x8xf32>
    %258 = tpu.matmul %247, %257, %cst_128 {dimension_numbers = #tpu.dot_dimension_numbers<[1], [0], [0], [1], [0, 0, 1, 1], [], []>} : vector<32x32xbf16>, vector<32x8xbf16>, vector<32x8xf32> -> vector<32x8xf32>
    %c0_129 = arith.constant 0 : index
    %c0_130 = arith.constant 0 : index
    %c0_131 = arith.constant 0 : index
    %259 = vector.load %arg16[%c0_129, %c0_130, %c0_131] : memref<4x32x8xbf16, #tpu.memory_space<vmem>>, vector<1x32x8xbf16>
    %260 = vector.shape_cast %259 : vector<1x32x8xbf16> to vector<32x8xbf16>
    %cst_132 = arith.constant dense<0.000000e+00> : vector<32x8xf32>
    %261 = tpu.matmul %247, %260, %cst_132 {dimension_numbers = #tpu.dot_dimension_numbers<[1], [0], [0], [1], [0, 0, 1, 1], [], []>} : vector<32x32xbf16>, vector<32x8xbf16>, vector<32x8xf32> -> vector<32x8xf32>
    %262 = vector.shape_cast %255 : vector<16x8xf32> to vector<2x8x8xf32>
    %263 = arith.truncf %262 : vector<2x8x8xf32> to vector<2x8x8xbf16>
    %264 = vector.shape_cast %258 : vector<32x8xf32> to vector<2x16x8xf32>
    %265 = arith.truncf %264 : vector<2x16x8xf32> to vector<2x16x8xbf16>
    %266 = vector.shape_cast %261 : vector<32x8xf32> to vector<2x16x8xf32>
    %267 = arith.truncf %266 : vector<2x16x8xf32> to vector<2x16x8xbf16>
    "tpu.trace_start"() <{level = 10 : i32, message = "btd,bsd->bts"}> : () -> ()
    %cst_133 = arith.constant dense<0.000000e+00> : vector<2x8x16xf32>
    %268 = tpu.matmul %263, %265, %cst_133 {dimension_numbers = #tpu.dot_dimension_numbers<[2], [2], [1], [1], [0, 0, 0, 1, 1, 1], [0], [0]>} : vector<2x8x8xbf16>, vector<2x16x8xbf16>, vector<2x8x16xf32> -> vector<2x8x16xf32>
    "tpu.trace_stop"() : () -> ()
    %cst_134 = arith.constant dense<0xFF800000> : vector<2x8xf32>
    %269 = vector.multi_reduction <maximumf>, %268, %cst_134 [2] : vector<2x8x16xf32> to vector<2x8xf32>
    %270 = vector.shape_cast %269 : vector<2x8xf32> to vector<2x8x1xf32>
    %271 = vector.broadcast %270 : vector<2x8x1xf32> to vector<2x8x16xf32>
    %272 = arith.subf %268, %271 : vector<2x8x16xf32>
    %273 = math.exp %272 : vector<2x8x16xf32>
    %cst_135 = arith.constant dense<0.000000e+00> : vector<2x8xf32>
    %274 = vector.multi_reduction <add>, %273, %cst_135 [2] : vector<2x8x16xf32> to vector<2x8xf32>
    %275 = vector.shape_cast %274 : vector<2x8xf32> to vector<2x8x1xf32>
    %276 = tpu.reciprocal %275 {approx = true} : vector<2x8x1xf32> -> vector<2x8x1xf32>
    %277 = vector.broadcast %276 : vector<2x8x1xf32> to vector<2x8x16xf32>
    %278 = arith.mulf %273, %277 : vector<2x8x16xf32>
    %279 = arith.truncf %278 : vector<2x8x16xf32> to vector<2x8x16xbf16>
    "tpu.trace_start"() <{level = 10 : i32, message = "bts,bsd->btd"}> : () -> ()
    %cst_136 = arith.constant dense<0.000000e+00> : vector<2x8x8xf32>
    %280 = tpu.matmul %279, %267, %cst_136 {dimension_numbers = #tpu.dot_dimension_numbers<[2], [1], [1], [2], [0, 0, 0, 1, 1, 2], [0], [0]>} : vector<2x8x16xbf16>, vector<2x16x8xbf16>, vector<2x8x8xf32> -> vector<2x8x8xf32>
    "tpu.trace_stop"() : () -> ()
    %281 = vector.shape_cast %280 : vector<2x8x8xf32> to vector<16x8xf32>
    %282 = arith.truncf %281 : vector<16x8xf32> to vector<16x8xbf16>
    %c0_137 = arith.constant 0 : index
    %c0_138 = arith.constant 0 : index
    %c0_139 = arith.constant 0 : index
    %283 = vector.load %arg17[%c0_137, %c0_138, %c0_139] : memref<4x8x32xbf16, #tpu.memory_space<vmem>>, vector<1x8x32xbf16>
    %284 = vector.shape_cast %283 : vector<1x8x32xbf16> to vector<8x32xbf16>
    %cst_140 = arith.constant dense<0.000000e+00> : vector<16x32xf32>
    %285 = tpu.matmul %282, %284, %cst_140 {dimension_numbers = #tpu.dot_dimension_numbers<[1], [0], [0], [1], [0, 0, 1, 1], [], []>} : vector<16x8xbf16>, vector<8x32xbf16>, vector<16x32xf32> -> vector<16x32xf32>
    %286 = arith.addf %250, %285 : vector<16x32xf32>
    %c1_141 = arith.constant 1 : index
    %c0_142 = arith.constant 0 : index
    %c0_143 = arith.constant 0 : index
    %287 = vector.load %arg14[%c1_141, %c0_142, %c0_143] : memref<4x32x8xbf16, #tpu.memory_space<vmem>>, vector<1x32x8xbf16>
    %288 = vector.shape_cast %287 : vector<1x32x8xbf16> to vector<32x8xbf16>
    %cst_144 = arith.constant dense<0.000000e+00> : vector<16x8xf32>
    %289 = tpu.matmul %246, %288, %cst_144 {dimension_numbers = #tpu.dot_dimension_numbers<[1], [0], [0], [1], [0, 0, 1, 1], [], []>} : vector<16x32xbf16>, vector<32x8xbf16>, vector<16x8xf32> -> vector<16x8xf32>
    %cst_145 = arith.constant 0.353553385 : f32
    %290 = vector.broadcast %cst_145 : f32 to vector<16x8xf32>
    %291 = arith.mulf %289, %290 : vector<16x8xf32>
    %c1_146 = arith.constant 1 : index
    %c0_147 = arith.constant 0 : index
    %c0_148 = arith.constant 0 : index
    %292 = vector.load %arg15[%c1_146, %c0_147, %c0_148] : memref<4x32x8xbf16, #tpu.memory_space<vmem>>, vector<1x32x8xbf16>
    %293 = vector.shape_cast %292 : vector<1x32x8xbf16> to vector<32x8xbf16>
    %cst_149 = arith.constant dense<0.000000e+00> : vector<32x8xf32>
    %294 = tpu.matmul %247, %293, %cst_149 {dimension_numbers = #tpu.dot_dimension_numbers<[1], [0], [0], [1], [0, 0, 1, 1], [], []>} : vector<32x32xbf16>, vector<32x8xbf16>, vector<32x8xf32> -> vector<32x8xf32>
    %c1_150 = arith.constant 1 : index
    %c0_151 = arith.constant 0 : index
    %c0_152 = arith.constant 0 : index
    %295 = vector.load %arg16[%c1_150, %c0_151, %c0_152] : memref<4x32x8xbf16, #tpu.memory_space<vmem>>, vector<1x32x8xbf16>
    %296 = vector.shape_cast %295 : vector<1x32x8xbf16> to vector<32x8xbf16>
    %cst_153 = arith.constant dense<0.000000e+00> : vector<32x8xf32>
    %297 = tpu.matmul %247, %296, %cst_153 {dimension_numbers = #tpu.dot_dimension_numbers<[1], [0], [0], [1], [0, 0, 1, 1], [], []>} : vector<32x32xbf16>, vector<32x8xbf16>, vector<32x8xf32> -> vector<32x8xf32>
    %298 = vector.shape_cast %291 : vector<16x8xf32> to vector<2x8x8xf32>
    %299 = arith.truncf %298 : vector<2x8x8xf32> to vector<2x8x8xbf16>
    %300 = vector.shape_cast %294 : vector<32x8xf32> to vector<2x16x8xf32>
    %301 = arith.truncf %300 : vector<2x16x8xf32> to vector<2x16x8xbf16>
    %302 = vector.shape_cast %297 : vector<32x8xf32> to vector<2x16x8xf32>
    %303 = arith.truncf %302 : vector<2x16x8xf32> to vector<2x16x8xbf16>
    "tpu.trace_start"() <{level = 10 : i32, message = "btd,bsd->bts"}> : () -> ()
    %cst_154 = arith.constant dense<0.000000e+00> : vector<2x8x16xf32>
    %304 = tpu.matmul %299, %301, %cst_154 {dimension_numbers = #tpu.dot_dimension_numbers<[2], [2], [1], [1], [0, 0, 0, 1, 1, 1], [0], [0]>} : vector<2x8x8xbf16>, vector<2x16x8xbf16>, vector<2x8x16xf32> -> vector<2x8x16xf32>
    "tpu.trace_stop"() : () -> ()
    %cst_155 = arith.constant dense<0xFF800000> : vector<2x8xf32>
    %305 = vector.multi_reduction <maximumf>, %304, %cst_155 [2] : vector<2x8x16xf32> to vector<2x8xf32>
    %306 = vector.shape_cast %305 : vector<2x8xf32> to vector<2x8x1xf32>
    %307 = vector.broadcast %306 : vector<2x8x1xf32> to vector<2x8x16xf32>
    %308 = arith.subf %304, %307 : vector<2x8x16xf32>
    %309 = math.exp %308 : vector<2x8x16xf32>
    %cst_156 = arith.constant dense<0.000000e+00> : vector<2x8xf32>
    %310 = vector.multi_reduction <add>, %309, %cst_156 [2] : vector<2x8x16xf32> to vector<2x8xf32>
    %311 = vector.shape_cast %310 : vector<2x8xf32> to vector<2x8x1xf32>
    %312 = tpu.reciprocal %311 {approx = true} : vector<2x8x1xf32> -> vector<2x8x1xf32>
    %313 = vector.broadcast %312 : vector<2x8x1xf32> to vector<2x8x16xf32>
    %314 = arith.mulf %309, %313 : vector<2x8x16xf32>
    %315 = arith.truncf %314 : vector<2x8x16xf32> to vector<2x8x16xbf16>
    "tpu.trace_start"() <{level = 10 : i32, message = "bts,bsd->btd"}> : () -> ()
    %cst_157 = arith.constant dense<0.000000e+00> : vector<2x8x8xf32>
    %316 = tpu.matmul %315, %303, %cst_157 {dimension_numbers = #tpu.dot_dimension_numbers<[2], [1], [1], [2], [0, 0, 0, 1, 1, 2], [0], [0]>} : vector<2x8x16xbf16>, vector<2x16x8xbf16>, vector<2x8x8xf32> -> vector<2x8x8xf32>
    "tpu.trace_stop"() : () -> ()
    %317 = vector.shape_cast %316 : vector<2x8x8xf32> to vector<16x8xf32>
    %318 = arith.truncf %317 : vector<16x8xf32> to vector<16x8xbf16>
    %c1_158 = arith.constant 1 : index
    %c0_159 = arith.constant 0 : index
    %c0_160 = arith.constant 0 : index
    %319 = vector.load %arg17[%c1_158, %c0_159, %c0_160] : memref<4x8x32xbf16, #tpu.memory_space<vmem>>, vector<1x8x32xbf16>
    %320 = vector.shape_cast %319 : vector<1x8x32xbf16> to vector<8x32xbf16>
    %cst_161 = arith.constant dense<0.000000e+00> : vector<16x32xf32>
    %321 = tpu.matmul %318, %320, %cst_161 {dimension_numbers = #tpu.dot_dimension_numbers<[1], [0], [0], [1], [0, 0, 1, 1], [], []>} : vector<16x8xbf16>, vector<8x32xbf16>, vector<16x32xf32> -> vector<16x32xf32>
    %322 = arith.addf %286, %321 : vector<16x32xf32>
    %c2_162 = arith.constant 2 : index
    %c0_163 = arith.constant 0 : index
    %c0_164 = arith.constant 0 : index
    %323 = vector.load %arg14[%c2_162, %c0_163, %c0_164] : memref<4x32x8xbf16, #tpu.memory_space<vmem>>, vector<1x32x8xbf16>
    %324 = vector.shape_cast %323 : vector<1x32x8xbf16> to vector<32x8xbf16>
    %cst_165 = arith.constant dense<0.000000e+00> : vector<16x8xf32>
    %325 = tpu.matmul %246, %324, %cst_165 {dimension_numbers = #tpu.dot_dimension_numbers<[1], [0], [0], [1], [0, 0, 1, 1], [], []>} : vector<16x32xbf16>, vector<32x8xbf16>, vector<16x8xf32> -> vector<16x8xf32>
    %cst_166 = arith.constant 0.353553385 : f32
    %326 = vector.broadcast %cst_166 : f32 to vector<16x8xf32>
    %327 = arith.mulf %325, %326 : vector<16x8xf32>
    %c2_167 = arith.constant 2 : index
    %c0_168 = arith.constant 0 : index
    %c0_169 = arith.constant 0 : index
    %328 = vector.load %arg15[%c2_167, %c0_168, %c0_169] : memref<4x32x8xbf16, #tpu.memory_space<vmem>>, vector<1x32x8xbf16>
    %329 = vector.shape_cast %328 : vector<1x32x8xbf16> to vector<32x8xbf16>
    %cst_170 = arith.constant dense<0.000000e+00> : vector<32x8xf32>
    %330 = tpu.matmul %247, %329, %cst_170 {dimension_numbers = #tpu.dot_dimension_numbers<[1], [0], [0], [1], [0, 0, 1, 1], [], []>} : vector<32x32xbf16>, vector<32x8xbf16>, vector<32x8xf32> -> vector<32x8xf32>
    %c2_171 = arith.constant 2 : index
    %c0_172 = arith.constant 0 : index
    %c0_173 = arith.constant 0 : index
    %331 = vector.load %arg16[%c2_171, %c0_172, %c0_173] : memref<4x32x8xbf16, #tpu.memory_space<vmem>>, vector<1x32x8xbf16>
    %332 = vector.shape_cast %331 : vector<1x32x8xbf16> to vector<32x8xbf16>
    %cst_174 = arith.constant dense<0.000000e+00> : vector<32x8xf32>
    %333 = tpu.matmul %247, %332, %cst_174 {dimension_numbers = #tpu.dot_dimension_numbers<[1], [0], [0], [1], [0, 0, 1, 1], [], []>} : vector<32x32xbf16>, vector<32x8xbf16>, vector<32x8xf32> -> vector<32x8xf32>
    %334 = vector.shape_cast %327 : vector<16x8xf32> to vector<2x8x8xf32>
    %335 = arith.truncf %334 : vector<2x8x8xf32> to vector<2x8x8xbf16>
    %336 = vector.shape_cast %330 : vector<32x8xf32> to vector<2x16x8xf32>
    %337 = arith.truncf %336 : vector<2x16x8xf32> to vector<2x16x8xbf16>
    %338 = vector.shape_cast %333 : vector<32x8xf32> to vector<2x16x8xf32>
    %339 = arith.truncf %338 : vector<2x16x8xf32> to vector<2x16x8xbf16>
    "tpu.trace_start"() <{level = 10 : i32, message = "btd,bsd->bts"}> : () -> ()
    %cst_175 = arith.constant dense<0.000000e+00> : vector<2x8x16xf32>
    %340 = tpu.matmul %335, %337, %cst_175 {dimension_numbers = #tpu.dot_dimension_numbers<[2], [2], [1], [1], [0, 0, 0, 1, 1, 1], [0], [0]>} : vector<2x8x8xbf16>, vector<2x16x8xbf16>, vector<2x8x16xf32> -> vector<2x8x16xf32>
    "tpu.trace_stop"() : () -> ()
    %cst_176 = arith.constant dense<0xFF800000> : vector<2x8xf32>
    %341 = vector.multi_reduction <maximumf>, %340, %cst_176 [2] : vector<2x8x16xf32> to vector<2x8xf32>
    %342 = vector.shape_cast %341 : vector<2x8xf32> to vector<2x8x1xf32>
    %343 = vector.broadcast %342 : vector<2x8x1xf32> to vector<2x8x16xf32>
    %344 = arith.subf %340, %343 : vector<2x8x16xf32>
    %345 = math.exp %344 : vector<2x8x16xf32>
    %cst_177 = arith.constant dense<0.000000e+00> : vector<2x8xf32>
    %346 = vector.multi_reduction <add>, %345, %cst_177 [2] : vector<2x8x16xf32> to vector<2x8xf32>
    %347 = vector.shape_cast %346 : vector<2x8xf32> to vector<2x8x1xf32>
    %348 = tpu.reciprocal %347 {approx = true} : vector<2x8x1xf32> -> vector<2x8x1xf32>
    %349 = vector.broadcast %348 : vector<2x8x1xf32> to vector<2x8x16xf32>
    %350 = arith.mulf %345, %349 : vector<2x8x16xf32>
    %351 = arith.truncf %350 : vector<2x8x16xf32> to vector<2x8x16xbf16>
    "tpu.trace_start"() <{level = 10 : i32, message = "bts,bsd->btd"}> : () -> ()
    %cst_178 = arith.constant dense<0.000000e+00> : vector<2x8x8xf32>
    %352 = tpu.matmul %351, %339, %cst_178 {dimension_numbers = #tpu.dot_dimension_numbers<[2], [1], [1], [2], [0, 0, 0, 1, 1, 2], [0], [0]>} : vector<2x8x16xbf16>, vector<2x16x8xbf16>, vector<2x8x8xf32> -> vector<2x8x8xf32>
    "tpu.trace_stop"() : () -> ()
    %353 = vector.shape_cast %352 : vector<2x8x8xf32> to vector<16x8xf32>
    %354 = arith.truncf %353 : vector<16x8xf32> to vector<16x8xbf16>
    %c2_179 = arith.constant 2 : index
    %c0_180 = arith.constant 0 : index
    %c0_181 = arith.constant 0 : index
    %355 = vector.load %arg17[%c2_179, %c0_180, %c0_181] : memref<4x8x32xbf16, #tpu.memory_space<vmem>>, vector<1x8x32xbf16>
    %356 = vector.shape_cast %355 : vector<1x8x32xbf16> to vector<8x32xbf16>
    %cst_182 = arith.constant dense<0.000000e+00> : vector<16x32xf32>
    %357 = tpu.matmul %354, %356, %cst_182 {dimension_numbers = #tpu.dot_dimension_numbers<[1], [0], [0], [1], [0, 0, 1, 1], [], []>} : vector<16x8xbf16>, vector<8x32xbf16>, vector<16x32xf32> -> vector<16x32xf32>
    %358 = arith.addf %322, %357 : vector<16x32xf32>
    %c3_183 = arith.constant 3 : index
    %c0_184 = arith.constant 0 : index
    %c0_185 = arith.constant 0 : index
    %359 = vector.load %arg14[%c3_183, %c0_184, %c0_185] : memref<4x32x8xbf16, #tpu.memory_space<vmem>>, vector<1x32x8xbf16>
    %360 = vector.shape_cast %359 : vector<1x32x8xbf16> to vector<32x8xbf16>
    %cst_186 = arith.constant dense<0.000000e+00> : vector<16x8xf32>
    %361 = tpu.matmul %246, %360, %cst_186 {dimension_numbers = #tpu.dot_dimension_numbers<[1], [0], [0], [1], [0, 0, 1, 1], [], []>} : vector<16x32xbf16>, vector<32x8xbf16>, vector<16x8xf32> -> vector<16x8xf32>
    %cst_187 = arith.constant 0.353553385 : f32
    %362 = vector.broadcast %cst_187 : f32 to vector<16x8xf32>
    %363 = arith.mulf %361, %362 : vector<16x8xf32>
    %c3_188 = arith.constant 3 : index
    %c0_189 = arith.constant 0 : index
    %c0_190 = arith.constant 0 : index
    %364 = vector.load %arg15[%c3_188, %c0_189, %c0_190] : memref<4x32x8xbf16, #tpu.memory_space<vmem>>, vector<1x32x8xbf16>
    %365 = vector.shape_cast %364 : vector<1x32x8xbf16> to vector<32x8xbf16>
    %cst_191 = arith.constant dense<0.000000e+00> : vector<32x8xf32>
    %366 = tpu.matmul %247, %365, %cst_191 {dimension_numbers = #tpu.dot_dimension_numbers<[1], [0], [0], [1], [0, 0, 1, 1], [], []>} : vector<32x32xbf16>, vector<32x8xbf16>, vector<32x8xf32> -> vector<32x8xf32>
    %c3_192 = arith.constant 3 : index
    %c0_193 = arith.constant 0 : index
    %c0_194 = arith.constant 0 : index
    %367 = vector.load %arg16[%c3_192, %c0_193, %c0_194] : memref<4x32x8xbf16, #tpu.memory_space<vmem>>, vector<1x32x8xbf16>
    %368 = vector.shape_cast %367 : vector<1x32x8xbf16> to vector<32x8xbf16>
    %cst_195 = arith.constant dense<0.000000e+00> : vector<32x8xf32>
    %369 = tpu.matmul %247, %368, %cst_195 {dimension_numbers = #tpu.dot_dimension_numbers<[1], [0], [0], [1], [0, 0, 1, 1], [], []>} : vector<32x32xbf16>, vector<32x8xbf16>, vector<32x8xf32> -> vector<32x8xf32>
    %370 = vector.shape_cast %363 : vector<16x8xf32> to vector<2x8x8xf32>
    %371 = arith.truncf %370 : vector<2x8x8xf32> to vector<2x8x8xbf16>
    %372 = vector.shape_cast %366 : vector<32x8xf32> to vector<2x16x8xf32>
    %373 = arith.truncf %372 : vector<2x16x8xf32> to vector<2x16x8xbf16>
    %374 = vector.shape_cast %369 : vector<32x8xf32> to vector<2x16x8xf32>
    %375 = arith.truncf %374 : vector<2x16x8xf32> to vector<2x16x8xbf16>
    "tpu.trace_start"() <{level = 10 : i32, message = "btd,bsd->bts"}> : () -> ()
    %cst_196 = arith.constant dense<0.000000e+00> : vector<2x8x16xf32>
    %376 = tpu.matmul %371, %373, %cst_196 {dimension_numbers = #tpu.dot_dimension_numbers<[2], [2], [1], [1], [0, 0, 0, 1, 1, 1], [0], [0]>} : vector<2x8x8xbf16>, vector<2x16x8xbf16>, vector<2x8x16xf32> -> vector<2x8x16xf32>
    "tpu.trace_stop"() : () -> ()
    %cst_197 = arith.constant dense<0xFF800000> : vector<2x8xf32>
    %377 = vector.multi_reduction <maximumf>, %376, %cst_197 [2] : vector<2x8x16xf32> to vector<2x8xf32>
    %378 = vector.shape_cast %377 : vector<2x8xf32> to vector<2x8x1xf32>
    %379 = vector.broadcast %378 : vector<2x8x1xf32> to vector<2x8x16xf32>
    %380 = arith.subf %376, %379 : vector<2x8x16xf32>
    %381 = math.exp %380 : vector<2x8x16xf32>
    %cst_198 = arith.constant dense<0.000000e+00> : vector<2x8xf32>
    %382 = vector.multi_reduction <add>, %381, %cst_198 [2] : vector<2x8x16xf32> to vector<2x8xf32>
    %383 = vector.shape_cast %382 : vector<2x8xf32> to vector<2x8x1xf32>
    %384 = tpu.reciprocal %383 {approx = true} : vector<2x8x1xf32> -> vector<2x8x1xf32>
    %385 = vector.broadcast %384 : vector<2x8x1xf32> to vector<2x8x16xf32>
    %386 = arith.mulf %381, %385 : vector<2x8x16xf32>
    %387 = arith.truncf %386 : vector<2x8x16xf32> to vector<2x8x16xbf16>
    "tpu.trace_start"() <{level = 10 : i32, message = "bts,bsd->btd"}> : () -> ()
    %cst_199 = arith.constant dense<0.000000e+00> : vector<2x8x8xf32>
    %388 = tpu.matmul %387, %375, %cst_199 {dimension_numbers = #tpu.dot_dimension_numbers<[2], [1], [1], [2], [0, 0, 0, 1, 1, 2], [0], [0]>} : vector<2x8x16xbf16>, vector<2x16x8xbf16>, vector<2x8x8xf32> -> vector<2x8x8xf32>
    "tpu.trace_stop"() : () -> ()
    %389 = vector.shape_cast %388 : vector<2x8x8xf32> to vector<16x8xf32>
    %390 = arith.truncf %389 : vector<16x8xf32> to vector<16x8xbf16>
    %c3_200 = arith.constant 3 : index
    %c0_201 = arith.constant 0 : index
    %c0_202 = arith.constant 0 : index
    %391 = vector.load %arg17[%c3_200, %c0_201, %c0_202] : memref<4x8x32xbf16, #tpu.memory_space<vmem>>, vector<1x8x32xbf16>
    %392 = vector.shape_cast %391 : vector<1x8x32xbf16> to vector<8x32xbf16>
    %cst_203 = arith.constant dense<0.000000e+00> : vector<16x32xf32>
    %393 = tpu.matmul %390, %392, %cst_203 {dimension_numbers = #tpu.dot_dimension_numbers<[1], [0], [0], [1], [0, 0, 1, 1], [], []>} : vector<16x8xbf16>, vector<8x32xbf16>, vector<16x32xf32> -> vector<16x32xf32>
    %394 = arith.addf %358, %393 : vector<16x32xf32>
    %395 = arith.addf %200, %394 : vector<16x32xf32>
    %cst_204 = arith.constant dense<0.000000e+00> : vector<16xf32>
    %396 = vector.multi_reduction <add>, %395, %cst_204 [1] : vector<16x32xf32> to vector<16xf32>
    %397 = vector.shape_cast %396 : vector<16xf32> to vector<16x1xf32>
    %cst_205 = arith.constant 3.200000e+01 : f32
    %398 = vector.broadcast %cst_205 : f32 to vector<16x1xf32>
    %399 = arith.divf %397, %398 : vector<16x1xf32>
    %400 = vector.broadcast %399 : vector<16x1xf32> to vector<16x32xf32>
    %401 = arith.subf %395, %400 : vector<16x32xf32>
    %402 = arith.mulf %401, %401 : vector<16x32xf32>
    %cst_206 = arith.constant dense<0.000000e+00> : vector<16xf32>
    %403 = vector.multi_reduction <add>, %402, %cst_206 [1] : vector<16x32xf32> to vector<16xf32>
    %404 = vector.shape_cast %403 : vector<16xf32> to vector<16x1xf32>
    %cst_207 = arith.constant 3.200000e+01 : f32
    %405 = vector.broadcast %cst_207 : f32 to vector<16x1xf32>
    %406 = arith.divf %404, %405 : vector<16x1xf32>
    %407 = vector.broadcast %399 : vector<16x1xf32> to vector<16x32xf32>
    %408 = arith.subf %395, %407 : vector<16x32xf32>
    %cst_208 = arith.constant 9.99999974E-6 : f32
    %409 = vector.broadcast %cst_208 : f32 to vector<16x1xf32>
    %410 = arith.addf %406, %409 : vector<16x1xf32>
    %411 = math.rsqrt %410 : vector<16x1xf32>
    %412 = vector.broadcast %411 : vector<16x1xf32> to vector<16x32xf32>
    %413 = arith.mulf %408, %412 : vector<16x32xf32>
    %414 = vector.broadcast %14 : vector<1x32xf32> to vector<16x32xf32>
    %415 = arith.mulf %413, %414 : vector<16x32xf32>
    %416 = vector.broadcast %15 : vector<1x32xf32> to vector<16x32xf32>
    %417 = arith.addf %415, %416 : vector<16x32xf32>
    %418 = arith.truncf %417 : vector<16x32xf32> to vector<16x32xbf16>
    %c0_209 = arith.constant 0 : index
    %c0_210 = arith.constant 0 : index
    %419 = vector.load %arg19[%c0_209, %c0_210] : memref<32x128xbf16, #tpu.memory_space<vmem>>, vector<32x128xbf16>
    %cst_211 = arith.constant dense<0.000000e+00> : vector<16x128xf32>
    %420 = tpu.matmul %418, %419, %cst_211 {dimension_numbers = #tpu.dot_dimension_numbers<[1], [0], [0], [1], [0, 0, 1, 1], [], []>} : vector<16x32xbf16>, vector<32x128xbf16>, vector<16x128xf32> -> vector<16x128xf32>
    %c0_212 = arith.constant 0 : index
    %c0_213 = arith.constant 0 : index
    %421 = vector.load %arg20[%c0_212, %c0_213] : memref<1x128xf32, #tpu.memory_space<vmem>>, vector<1x128xf32>
    %422 = vector.broadcast %421 : vector<1x128xf32> to vector<16x128xf32>
    %423 = arith.addf %420, %422 : vector<16x128xf32>
    %cst_214 = arith.constant 0.000000e+00 : f32
    %424 = vector.broadcast %cst_214 : f32 to vector<16x128xf32>
    %425 = arith.maximumf %423, %424 : vector<16x128xf32>
    %426 = arith.truncf %425 : vector<16x128xf32> to vector<16x128xbf16>
    %c0_215 = arith.constant 0 : index
    %c0_216 = arith.constant 0 : index
    %427 = vector.load %arg21[%c0_215, %c0_216] : memref<128x32xbf16, #tpu.memory_space<vmem>>, vector<128x32xbf16>
    %cst_217 = arith.constant dense<0.000000e+00> : vector<16x32xf32>
    %428 = tpu.matmul %426, %427, %cst_217 {dimension_numbers = #tpu.dot_dimension_numbers<[1], [0], [0], [1], [0, 0, 1, 1], [], []>} : vector<16x128xbf16>, vector<128x32xbf16>, vector<16x32xf32> -> vector<16x32xf32>
    %429 = arith.addf %395, %428 : vector<16x32xf32>
    %c0_218 = arith.constant 0 : index
    %c0_219 = arith.constant 0 : index
    %430 = vector.load %arg22[%c0_218, %c0_219] : memref<1x32xf32, #tpu.memory_space<vmem>>, vector<1x32xf32>
    %431 = vector.broadcast %430 : vector<1x32xf32> to vector<16x32xf32>
    %432 = arith.addf %429, %431 : vector<16x32xf32>
    %433 = vector.shape_cast %432 : vector<16x32xf32> to vector<2x8x32xf32>
    %c0_220 = arith.constant 0 : index
    %c0_221 = arith.constant 0 : index
    %c0_222 = arith.constant 0 : index
    %434 = vector.load %arg23[%c0_220, %c0_221, %c0_222] : memref<2x8x32xf32, #tpu.memory_space<vmem>>, vector<2x8x32xf32>
    tpu.vector_store %arg23[%c0_220, %c0_221, %c0_222], %433 {strides = array<i32>} : memref<2x8x32xf32, #tpu.memory_space<vmem>>, vector<2x8x32xf32>,
    return
  }
  func.func @transform_0(%arg0: i32) -> (i32, i32, i32) {
    %c0_i32 = arith.constant 0 : i32
    %c0_i32_0 = arith.constant 0 : i32
    %c0_i32_1 = arith.constant 0 : i32
    return %arg0, %c0_i32, %c0_i32_0 : i32, i32, i32
  }
  func.func @transform_1(%arg0: i32) -> (i32, i32, i32) {
    %c0_i32 = arith.constant 0 : i32
    %c0_i32_0 = arith.constant 0 : i32
    %c0_i32_1 = arith.constant 0 : i32
    return %arg0, %c0_i32, %c0_i32_0 : i32, i32, i32
  }
  func.func @transform_2(%arg0: i32) -> (i32, i32) {
    %c0_i32 = arith.constant 0 : i32
    %c0_i32_0 = arith.constant 0 : i32
    %c0_i32_1 = arith.constant 0 : i32
    return %c0_i32, %c0_i32_0 : i32, i32
  }
  func.func @transform_3(%arg0: i32) -> (i32, i32) {
    %c0_i32 = arith.constant 0 : i32
    %c0_i32_0 = arith.constant 0 : i32
    %c0_i32_1 = arith.constant 0 : i32
    return %c0_i32, %c0_i32_0 : i32, i32
  }
  func.func @transform_4(%arg0: i32) -> (i32, i32) {
    %c0_i32 = arith.constant 0 : i32
    %c0_i32_0 = arith.constant 0 : i32
    %c0_i32_1 = arith.constant 0 : i32
    return %c0_i32, %c0_i32_0 : i32, i32
  }
  func.func @transform_5(%arg0: i32) -> (i32, i32) {
    %c0_i32 = arith.constant 0 : i32
    %c0_i32_0 = arith.constant 0 : i32
    %c0_i32_1 = arith.constant 0 : i32
    return %c0_i32, %c0_i32_0 : i32, i32
  }
  func.func @transform_6(%arg0: i32) -> (i32, i32) {
    %c0_i32 = arith.constant 0 : i32
    %c0_i32_0 = arith.constant 0 : i32
    %c0_i32_1 = arith.constant 0 : i32
    return %c0_i32, %c0_i32_0 : i32, i32
  }
  func.func @transform_7(%arg0: i32) -> (i32, i32) {
    %c0_i32 = arith.constant 0 : i32
    %c0_i32_0 = arith.constant 0 : i32
    %c0_i32_1 = arith.constant 0 : i32
    return %c0_i32, %c0_i32_0 : i32, i32
  }
  func.func @transform_8(%arg0: i32) -> (i32, i32, i32) {
    %c0_i32 = arith.constant 0 : i32
    %c0_i32_0 = arith.constant 0 : i32
    %c0_i32_1 = arith.constant 0 : i32
    %c0_i32_2 = arith.constant 0 : i32
    return %c0_i32, %c0_i32_0, %c0_i32_1 : i32, i32, i32
  }
  func.func @transform_9(%arg0: i32) -> (i32, i32, i32) {
    %c0_i32 = arith.constant 0 : i32
    %c0_i32_0 = arith.constant 0 : i32
    %c0_i32_1 = arith.constant 0 : i32
    %c0_i32_2 = arith.constant 0 : i32
    return %c0_i32, %c0_i32_0, %c0_i32_1 : i32, i32, i32
  }
  func.func @transform_10(%arg0: i32) -> (i32, i32, i32) {
    %c0_i32 = arith.constant 0 : i32
    %c0_i32_0 = arith.constant 0 : i32
    %c0_i32_1 = arith.constant 0 : i32
    %c0_i32_2 = arith.constant 0 : i32
    return %c0_i32, %c0_i32_0, %c0_i32_1 : i32, i32, i32
  }
  func.func @transform_11(%arg0: i32) -> (i32, i32, i32) {
    %c0_i32 = arith.constant 0 : i32
    %c0_i32_0 = arith.constant 0 : i32
    %c0_i32_1 = arith.constant 0 : i32
    %c0_i32_2 = arith.constant 0 : i32
    return %c0_i32, %c0_i32_0, %c0_i32_1 : i32, i32, i32
  }
  func.func @transform_12(%arg0: i32) -> (i32, i32) {
    %c0_i32 = arith.constant 0 : i32
    %c0_i32_0 = arith.constant 0 : i32
    %c0_i32_1 = arith.constant 0 : i32
    return %c0_i32, %c0_i32_0 : i32, i32
  }
  func.func @transform_13(%arg0: i32) -> (i32, i32, i32) {
    %c0_i32 = arith.constant 0 : i32
    %c0_i32_0 = arith.constant 0 : i32
    %c0_i32_1 = arith.constant 0 : i32
    %c0_i32_2 = arith.constant 0 : i32
    return %c0_i32, %c0_i32_0, %c0_i32_1 : i32, i32, i32
  }
  func.func @transform_14(%arg0: i32) -> (i32, i32, i32) {
    %c0_i32 = arith.constant 0 : i32
    %c0_i32_0 = arith.constant 0 : i32
    %c0_i32_1 = arith.constant 0 : i32
    %c0_i32_2 = arith.constant 0 : i32
    return %c0_i32, %c0_i32_0, %c0_i32_1 : i32, i32, i32
  }
  func.func @transform_15(%arg0: i32) -> (i32, i32, i32) {
    %c0_i32 = arith.constant 0 : i32
    %c0_i32_0 = arith.constant 0 : i32
    %c0_i32_1 = arith.constant 0 : i32
    %c0_i32_2 = arith.constant 0 : i32
    return %c0_i32, %c0_i32_0, %c0_i32_1 : i32, i32, i32
  }
  func.func @transform_16(%arg0: i32) -> (i32, i32, i32) {
    %c0_i32 = arith.constant 0 : i32
    %c0_i32_0 = arith.constant 0 : i32
    %c0_i32_1 = arith.constant 0 : i32
    %c0_i32_2 = arith.constant 0 : i32
    return %c0_i32, %c0_i32_0, %c0_i32_1 : i32, i32, i32
  }
  func.func @transform_17(%arg0: i32) -> (i32, i32) {
    %c0_i32 = arith.constant 0 : i32
    %c0_i32_0 = arith.constant 0 : i32
    %c0_i32_1 = arith.constant 0 : i32
    return %c0_i32, %c0_i32_0 : i32, i32
  }
  func.func @transform_18(%arg0: i32) -> (i32, i32) {
    %c0_i32 = arith.constant 0 : i32
    %c0_i32_0 = arith.constant 0 : i32
    %c0_i32_1 = arith.constant 0 : i32
    return %c0_i32, %c0_i32_0 : i32, i32
  }
  func.func @transform_19(%arg0: i32) -> (i32, i32) {
    %c0_i32 = arith.constant 0 : i32
    %c0_i32_0 = arith.constant 0 : i32
    %c0_i32_1 = arith.constant 0 : i32
    return %c0_i32, %c0_i32_0 : i32, i32
  }
  func.func @transform_20(%arg0: i32) -> (i32, i32) {
    %c0_i32 = arith.constant 0 : i32
    %c0_i32_0 = arith.constant 0 : i32
    %c0_i32_1 = arith.constant 0 : i32
    return %c0_i32, %c0_i32_0 : i32, i32
  }
  func.func @transform_21(%arg0: i32) -> (i32, i32) {
    %c0_i32 = arith.constant 0 : i32
    %c0_i32_0 = arith.constant 0 : i32
    %c0_i32_1 = arith.constant 0 : i32
    return %c0_i32, %c0_i32_0 : i32, i32
  }
  func.func @transform_22(%arg0: i32) -> (i32, i32, i32) {
    %c0_i32 = arith.constant 0 : i32
    %c0_i32_0 = arith.constant 0 : i32
    %c0_i32_1 = arith.constant 0 : i32
    return %arg0, %c0_i32, %c0_i32_0 : i32, i32, i32
  }
}

</mosaic_0001>

<bundles_post_ra>
// kernel: tpu_custom_call.1
= control target key start
LH: loop header
LB: loop body
LE: loop exit
PB: predicated region body
PF: predicated region fallthrough
CT: control target
= control target key end

     0   :  { %s5981_s0 = inlined_call_operand.vmem [shape: f32[2,8,32], index: 0, kind: input, shape index: {}]   ;;  %s5982_s1 = inlined_call_operand.vmem [shape: f32[2,16,32], index: 1, kind: input, shape index: {}]   ;;  %s5983_s2 = inlined_call_operand.vmem [shape: f32[1,32], index: 2, kind: input, shape index: {}]   ;;  %s5984_s3 = inlined_call_operand.vmem [shape: f32[1,32], index: 3, kind: input, shape index: {}]   ;;  %s5985_s4 = inlined_call_operand.vmem [shape: f32[1,32], index: 4, kind: input, shape index: {}]   ;;  %s5986_s5 = inlined_call_operand.vmem [shape: f32[1,32], index: 5, kind: input, shape index: {}]   ;;  %s5987_s6 = inlined_call_operand.vmem [shape: f32[1,32], index: 6, kind: input, shape index: {}]   ;;  %s5988_s7 = inlined_call_operand.vmem [shape: f32[1,32], index: 7, kind: input, shape index: {}]   ;;  %s5989_s8 = inlined_call_operand.vmem [shape: bf16[4,32,8], index: 8, kind: input, shape index: {}]   ;;  %s5990_s9 = inlined_call_operand.vmem [shape: bf16[4,32,8], index: 9, kind: input, shape index: {}]   ;;  %s5991_s10 = inlined_call_operand.vmem [shape: bf16[4,32,8], index: 10, kind: input, shape index: {}]   ;;  %s5992_s11 = inlined_call_operand.vmem [shape: bf16[4,8,32], index: 11, kind: input, shape index: {}]   ;;  %s5993_s12 = inlined_call_operand.vmem [shape: f32[1,32], index: 12, kind: input, shape index: {}]   ;;  %s5994_s13 = inlined_call_operand.vmem [shape: bf16[4,32,8], index: 13, kind: input, shape index: {}]   ;;  %s5995_s14 = inlined_call_operand.vmem [shape: bf16[4,32,8], index: 14, kind: input, shape index: {}]   ;;  %s5996_s15 = inlined_call_operand.vmem [shape: bf16[4,32,8], index: 15, kind: input, shape index: {}]   ;;  %s5997_s16 = inlined_call_operand.vmem [shape: bf16[4,8,32], index: 16, kind: input, shape index: {}]   ;;  %s5998_s17 = inlined_call_operand.vmem [shape: f32[1,32], index: 17, kind: input, shape index: {}]   ;;  %s5999_s18 = inlined_call_operand.vmem [shape: bf16[32,128], index: 18, kind: input, shape index: {}]   ;;  %s6000_s19 = inlined_call_operand.vmem [shape: f32[1,128], index: 19, kind: input, shape index: {}]   ;;  %s6001_s20 = inlined_call_operand.vmem [shape: bf16[128,32], index: 20, kind: input, shape index: {}]   ;;  %s6002_s21 = inlined_call_operand.vmem [shape: f32[1,32], index: 21, kind: input, shape index: {}]   ;;  %s6003_s22 = inlined_call_operand.hbm [shape: f32[2,8,32], index: 22, kind: output, shape index: {}]  }
   0x1   :  { %6008 = sst [smem:[#allocation5_spill]] %s5981_s0 }
   0x2   :  { %6009 = sst [smem:[#allocation6_spill]] %s5982_s1 }
   0x3   :  { %6010 = sst [smem:[#allocation7_spill]] %s5983_s2 }
   0x4   :  { %6011 = sst [smem:[#allocation8_spill]] %s5984_s3 }
   0x5   :  { %6012 = sst [smem:[#allocation9_spill]] %s5985_s4 }
   0x6   :  { %6013 = sst [smem:[#allocation10_spill]] %s5986_s5 }
   0x7   :  { %6014 = sst [smem:[#allocation11_spill]] %s5987_s6 }
   0x8   :  { %s6015_s29 = sld [smem:[#allocation5_spill]]  ;;  %vm91_vm0 = vcmask 261120  }
   0xe   :  { %v73_v0 = vld [vmem:[%s6015_s29] sm:$0xff]  ;;  %v74_v1 = vld [vmem:[%s6015_s29 + $0x8] sm:$0xff] }
   0xf   :  { %v92_v2 = vsel %vm91_vm0, %v73_v0, 0.0  ;;  %v95_v3 = vsel %vm91_vm0, %v74_v1, 0.0 }
  0x10   :  { %93 = vadd.xlane.f32.xlu0 %v92_v2 }
  0x14   :  { %96 = vadd.xlane.f32.xlu0 %v95_v3 }
  0x15   :  { %27 = vsyncpa [#allocation3], 0  ;;  %v4948_v14 = vld [vmem:[%s5989_s8 + $0x8] sm:$0xff]   ;;  %v5116_v15 = vmov 0.0   ;;  %v4949_v16 = vld [vmem:[%s5989_s8] sm:$0xff]   ;;  %vm5117_vm1 = vmmov 0   ;;  %v79_v62 = vlaneseq }
  0x16   :  { %4482 = vmatprep.subr.bf16.mxu0 %v5116_v15  ;;  %4506 = vmatprep.subr.bf16.mxu1 %v5116_v15  ;;  %s6016_s25 = sld [smem:[#allocation7_spill]]  ;;  %v4950_v33 = vld [vmem:[%s5990_s9 + $0x8] sm:$0xff]   ;;  %v4951_v35 = vld [vmem:[%s5990_s9] sm:$0xff]   ;;  %vm326_vm2 = vcmask 64512   ;;  %vm446_vm3 = vcmask 1043456   ;;  %vm2324_vm5 = vcmask 130048  }
  0x17   :  { %4483 = vmatpush3.bf16.msra.mxu0 %v4948_v14  ;;  %4486 = vmatprep.mubr.msk.bf16.mxu0 %vm5117_vm1, %v5116_v15  ;;  %s6017_s27 = sld [smem:[#allocation8_spill]]  ;;  %v4952_v36 = vld [vmem:[%s5991_s10 + $0x8] sm:$0xff]   ;;  %v4953_v37 = vld [vmem:[%s5991_s10] sm:$0xff]   ;;  %v80_v63 = vshrl.u32 %v79_v62, 7 }
  0x18   :  { %4484 = vmatprep.subr.bf16.mxu0 %v5116_v15  ;;  %4508 = vmatprep.mubr.msk.bf16.mxu1 %vm5117_vm1, %v5116_v15  ;;  %s6018_s4 = sld [smem:[#allocation6_spill]] }
  0x19   :  { %s6019_s30 = sld [smem:[#allocation9_spill]] }
  0x1a   :  { %s6020_s23 = sld [smem:[#allocation10_spill]] }
  0x1b   :  { %4485 = vmatpush3.bf16.msra.mxu0 %v4949_v16  ;;  %s6021_s26 = sld [smem:[#allocation11_spill]] }
  0x1c   :  { %4490 = vmatprep.subr.bf16.mxu0 %v5116_v15  ;;  %v4091_v25 = vld [vmem:[%s6016_s25] ss:$0 sm:$0xff] }
  0x1d   :  { %v4092_v29 = vld [vmem:[%s6017_s27] ss:$0 sm:$0xff] }
  0x99   :  { %v94_v4 = vpop.xlane.xlu0 %93 }
  0x9a   :  { %v99_v5 = vmul.f32 0.03125, %v94_v4 }
  0x9c   :  { %v101_v6 = vsub.f32 %v73_v0, %v99_v5  ;;  %v82_v0 = vand.u32 127, %v79_v62 }
  0x9d   :  { %v97_v7 = vpop.xlane.xlu0 %96 }
  0x9e   :  { %v100_v8 = vmul.f32 0.03125, %v97_v7  ;;  %v103_v9 = vmul.f32 %v101_v6, %v101_v6  ;;  %vm83_vm4 = vcmp.le.s32.totalorder %v82_v0, %v80_v63 }
  0xa0   :  { %v102_v10 = vsub.f32 %v74_v1, %v100_v8  ;;  %v105_v11 = vsel %vm91_vm0, %v103_v9, 0.0  ;;  %v5118_v1 = vmov -1e+30  }
  0xa1   :  { %106 = vadd.xlane.f32.xlu1 %v105_v11  ;;  %v5311_v2 = vsel %vm83_vm4, 0.0, %v5118_v1 }
  0xa2   :  { %v104_v12 = vmul.f32 %v102_v10, %v102_v10 }
  0xa4   :  { %v108_v13 = vsel %vm91_vm0, %v104_v12, 0.0 }
  0xa5   :  { %109 = vadd.xlane.f32.xlu1 %v108_v13 }
 0x12a   :  { %v107_v17 = vpop.xlane.xlu1 %106 }
 0x12b   :  { %v111_v18 = vmul.f32 0.03125, %v107_v17 }
 0x12d   :  { %v113_v19 = vadd.f32 1e-05, %v111_v18 }
 0x12e   :  { %v110_v20 = vpop.xlane.xlu1 %109 }
 0x12f   :  { %5006 = vrsqrt.f32 %v113_v19  ;;  %v112_v21 = vmul.f32 0.03125, %v110_v20 }
 0x131   :  { %v114_v22 = vadd.f32 1e-05, %v112_v21 }
 0x133   :  { %5008 = vrsqrt.f32 %v114_v22 }
 0x13c   :  { %v5007_v23 = vpop.eup %5006 }
 0x13d   :  { %v117_v24 = vmul.f32 %v5007_v23, %v101_v6 }
 0x13f   :  { %v125_v27 = vmul.f32 %v4091_v25, %v117_v24 }
 0x140   :  { %v5009_v26 = vpop.eup %5008 }
 0x141   :  { %v118_v28 = vmul.f32 %v5009_v26, %v102_v10  ;;  %v133_v31 = vadd.f32 %v4092_v29, %v125_v27 }
 0x143   :  { %v126_v30 = vmul.f32 %v4091_v25, %v118_v28 }
 0x145   :  { %v134_v32 = vadd.f32 %v4092_v29, %v126_v30 }
 0x147   :  { %v5270_v34 = vpack.c.bf16 %v134_v32, %v133_v31 }
 0x149   :  { %4487 = vmatmul.mubr.msk.bf16.vlgmr.msra.gmra.mxu0 %vm91_vm0, %v5270_v34 }
 0x14a   :  { %4491 = vmatpush3.bf16.msra.mxu0 %v4950_v33  ;;  %4494 = vmatprep.mubr.msk.bf16.mxu0 %vm5117_vm1, %v5116_v15  ;;  %v4954_v33 = vld [vmem:[%s5989_s8 + $0x18] sm:$0xff]  }
 0x14b   :  { %4492 = vmatprep.subr.bf16.mxu0 %v5116_v15 }
 0x14e   :  { %4493 = vmatpush3.bf16.msra.mxu0 %v4951_v35 }
 0x14f   :  { %4498 = vmatprep.subr.bf16.mxu0 %v5116_v15 }
 0x151   :  { %4495 = vmatmul.mubr.msk.bf16.vlgmr.msra.gmra.mxu0 %vm91_vm0, %v5270_v34 }
 0x152   :  { %4499 = vmatpush3.bf16.msra.mxu0 %v4952_v36  ;;  %4502 = vmatprep.mubr.msk.bf16.mxu0 %vm5117_vm1, %v5116_v15  ;;  %v4955_v36 = vld [vmem:[%s5989_s8 + $0x10] sm:$0xff]  }
 0x153   :  { %4500 = vmatprep.subr.bf16.mxu0 %v5116_v15 }
 0x156   :  { %4501 = vmatpush3.bf16.msra.mxu0 %v4953_v37  ;;  %v4956_v37 = vld [vmem:[%s5991_s10 + $0x18] sm:$0xff]  }
 0x157   :  { %4512 = vmatprep.subr.bf16.mxu0 %v5116_v15 }
 0x159   :  { %4503 = vmatmul.mubr.msk.bf16.vlgmr.msra.gmra.mxu0 %vm91_vm0, %v5270_v34 }
 0x15a   :  { %4514 = vmatprep.mubr.msk.bf16.mxu0 %vm5117_vm1, %v5116_v15 }
 0x209   :  { %v197_v38 = vpop.f32.mrf.mxu0 }
 0x20a   :  { %v204_v47 = vmul.f32 0.35355338, %v197_v38  ;;  %v4957_v38 = vld [vmem:[%s5991_s10 + $0x10] sm:$0xff]  }
 0x20b   :  { %v4488_v39 = vpop.f32.mrf.mxu0 }
 0x20c   :  { %v320_v52 = vpack.c.bf16 %v204_v47, %v204_v47  ;;  %v537_v39 = vld [vmem:[%s5992_s11] sm:$0xf] }
 0x20d   :  { %v200_v40 = vpop.f32.mrf.mxu0 }
 0x20e   :  { %v205_v53 = vmul.f32 0.35355338, %v200_v40  ;;  %v542_v40 = vsel %vm446_vm3, %v537_v39, 0 }
 0x20f   :  { %v4489_v41 = vpop.f32.mrf.mxu0 }
 0x210   :  { %v321_v58 = vpack.c.bf16 %v205_v53, %v205_v53 }
 0x211   :  { %v256_v42 = vpop.f32.mrf.mxu0 }
 0x212   :  { %v322_v43 = vpack.c.bf16 %v256_v42, %v256_v42 }
 0x213   :  { %v4496_v44 = vpop.f32.mrf.mxu0 }
 0x214   :  { %v331_v45 = vsel %vm326_vm2, %v322_v43, 0 }
 0x215   :  { %v259_v46 = vpop.f32.mrf.mxu0  ;;  %4507 = vmatpush3.bf16.xpose.msra.mxu1 %v331_v45  ;;  %v4958_v45 = vld [vmem:[%s5990_s9 + $0x18] sm:$0xff]  }
 0x216   :  { %v323_v48 = vpack.c.bf16 %v259_v46, %v259_v46  ;;  %4518 = vmatprep.subr.bf16.mxu1 %v5116_v15 }
 0x217   :  { %v4497_v49 = vpop.f32.mrf.mxu0 }
 0x218   :  { %v377_v50 = vsel %vm326_vm2, %v323_v48, 0 }
 0x219   :  { %v313_v51 = vpop.f32.mrf.mxu0  ;;  %4513 = vmatpush3.bf16.xpose.msra.mxu0 %v377_v50  ;;  %v4959_v50 = vld [vmem:[%s5990_s9 + $0x10] sm:$0xff]  }
 0x21a   :  { %v324_v54 = vpack.c.bf16 %v313_v51, %v313_v51  ;;  %4524 = vmatprep.subr.bf16.mxu0 %v5116_v15 }
 0x21b   :  { %v4504_v55 = vpop.f32.mrf.mxu0 }
 0x21c   :  { %v448_v56 = vsel %vm446_vm3, %v324_v54, 0  ;;  %4509 = vmatmul.mubr.msk.bf16.vlgmr.msra.gmra.mxu1 %vm326_vm2, %v320_v52 }
 0x21d   :  { %v316_v57 = vpop.f32.mrf.mxu0  ;;  %4519 = vmatpush3.bf16.msra.mxu1 %v448_v56  ;;  %4520 = vmatprep.mubr.msk.bf16.mxu1 %vm5117_vm1, %v5116_v15 }
 0x21e   :  { %v325_v59 = vpack.c.bf16 %v316_v57, %v316_v57  ;;  %4530 = vmatprep.subr.bf16.mxu1 %v5116_v15 }
 0x21f   :  { %v4505_v60 = vpop.f32.mrf.mxu0 }
 0x220   :  { %v494_v61 = vsel %vm446_vm3, %v325_v59, 0  ;;  %4515 = vmatmul.mubr.msk.bf16.vlgmr.msra.gmra.mxu0 %vm326_vm2, %v321_v58 }
 0x221   :  { %4525 = vmatpush3.bf16.msra.mxu0 %v494_v61  ;;  %4526 = vmatprep.mubr.msk.bf16.mxu0 %vm5117_vm1, %v5116_v15 }
 0x222   :  { %4536 = vmatprep.subr.bf16.mxu0 %v5116_v15 }
 0x2dc   :  { %v367_v3 = vpop.f32.mrf.mxu1 }
 0x2dd   :  { %v368_v4 = vadd.f32 %v367_v3, %v5311_v2 }
 0x2de   :  { %v4510_v5 = vpop.f32.mrf.mxu1 }
 0x2df   :  { %v419_v6 = vsel %vm326_vm2, %v368_v4, -inf }
 0x2e0   :  { %420 = vmax.xlane.f32.xlu0 %v419_v6  ;;  %v370_v7 = vpop.f32.mrf.mxu1  ;;  %v413_v8 = vpop.f32.mrf.mxu0 }
 0x2e1   :  { %v414_v9 = vadd.f32 %v413_v8, %v5311_v2 }
 0x2e2   :  { %v4511_v10 = vpop.f32.mrf.mxu1  ;;  %v4516_v11 = vpop.f32.mrf.mxu0 }
 0x2e3   :  { %v422_v12 = vsel %vm326_vm2, %v414_v9, -inf }
 0x2e4   :  { %423 = vmax.xlane.f32.xlu1 %v422_v12  ;;  %v416_v13 = vpop.f32.mrf.mxu0 }
 0x2e6   :  { %v4517_v14 = vpop.f32.mrf.mxu0 }
 0x369   :  { %v421_v16 = vpop.xlane.xlu0 %420 }
 0x36a   :  { %v425_v17 = vsub.f32 %v368_v4, %v421_v16 }
 0x36c   :  { %v427_v18 = vmul.f32 1.442695, %v425_v17 }
 0x36d   :  { %v424_v19 = vpop.xlane.xlu1 %423 }
 0x36e   :  { %5010 = vpow2.f32 %v427_v18  ;;  %v426_v20 = vsub.f32 %v414_v9, %v424_v19 }
 0x370   :  { %v429_v21 = vmul.f32 1.442695, %v426_v20 }
 0x372   :  { %5012 = vpow2.f32 %v429_v21 }
 0x37b   :  { %v5011_v22 = vpop.eup %5010 }
 0x37c   :  { %v431_v23 = vsel %vm326_vm2, %v5011_v22, 0.0 }
 0x37d   :  { %432 = vadd.xlane.f32.xlu0 %v431_v23 }
 0x37f   :  { %v5013_v24 = vpop.eup %5012 }
 0x380   :  { %v434_v25 = vsel %vm326_vm2, %v5013_v24, 0.0 }
 0x381   :  { %435 = vadd.xlane.f32.xlu1 %v434_v25 }
 0x406   :  { %v433_v26 = vpop.xlane.xlu0 %432 }
 0x407   :  { %5014 = vrcp.f32 %v433_v26 }
 0x40a   :  { %v436_v27 = vpop.xlane.xlu1 %435 }
 0x40b   :  { %5016 = vrcp.f32 %v436_v27 }
 0x414   :  { %v5015_v28 = vpop.eup %5014 }
 0x415   :  { %v439_v29 = vmul.f32 %v5015_v28, %v5011_v22 }
 0x417   :  { %v441_v30 = vpack.c.bf16 %v439_v29, %v439_v29 }
 0x418   :  { %v5017_v31 = vpop.eup %5016 }
 0x419   :  { %4521 = vmatmul.mubr.msk.bf16.vlgmr.msra.gmra.mxu1 %vm326_vm2, %v441_v30  ;;  %v440_v32 = vmul.f32 %v5017_v31, %v5013_v24 }
 0x41a   :  { %4532 = vmatprep.mubr.msk.bf16.mxu1 %vm5117_vm1, %v5116_v15  ;;  %4531 = vmatpush3.bf16.msra.mxu1 %v542_v40 }
 0x41b   :  { %v442_v35 = vpack.c.bf16 %v440_v32, %v440_v32  ;;  %4544 = vmatprep.subr.bf16.mxu1 %v5116_v15 }
 0x41d   :  { %4527 = vmatmul.mubr.msk.bf16.vlgmr.msra.gmra.mxu0 %vm326_vm2, %v442_v35 }
 0x41e   :  { %4537 = vmatpush3.bf16.msra.mxu0 %v4954_v33  ;;  %4540 = vmatprep.mubr.msk.bf16.mxu0 %vm5117_vm1, %v5116_v15 }
 0x41f   :  { %4538 = vmatprep.subr.bf16.mxu0 %v5116_v15 }
 0x422   :  { %4539 = vmatpush3.bf16.msra.mxu0 %v4955_v36 }
 0x423   :  { %4552 = vmatprep.subr.bf16.mxu0 %v5116_v15 }
 0x425   :  { %4541 = vmatmul.mubr.msk.bf16.vlgmr.msra.gmra.mxu0 %vm91_vm0, %v5270_v34 }
 0x426   :  { %4553 = vmatpush3.bf16.msra.mxu0 %v4956_v37  ;;  %4556 = vmatprep.mubr.msk.bf16.mxu0 %vm5117_vm1, %v5116_v15 }
 0x427   :  { %4554 = vmatprep.subr.bf16.mxu0 %v5116_v15 }
 0x42a   :  { %4555 = vmatpush3.bf16.msra.mxu0 %v4957_v38 }
 0x42b   :  { %4566 = vmatprep.subr.bf16.mxu0 %v5116_v15 }
 0x42d   :  { %4557 = vmatmul.mubr.msk.bf16.vlgmr.msra.gmra.mxu0 %vm91_vm0, %v5270_v34 }
 0x42e   :  { %4568 = vmatprep.mubr.msk.bf16.mxu0 %vm5117_vm1, %v5116_v15 }
 0x4d9   :  { %v484_v41 = vpop.f32.mrf.mxu1 }
 0x4db   :  { %v4522_v42 = vpop.f32.mrf.mxu1 }
 0x4dd   :  { %v487_v43 = vpop.f32.mrf.mxu1  ;;  %v530_v44 = vpop.f32.mrf.mxu0 }
 0x4de   :  { %v536_v46 = vpack.c.bf16 %v530_v44, %v484_v41 }
 0x4df   :  { %v4523_v47 = vpop.f32.mrf.mxu1  ;;  %v4528_v48 = vpop.f32.mrf.mxu0 }
 0x4e0   :  { %4533 = vmatmul.mubr.msk.bf16.vlgmr.msra.gmra.mxu1 %vm326_vm2, %v536_v46  ;;  %v4960_v48 = vld [vmem:[%s5989_s8 + $0x28] sm:$0xff]  }
 0x4e1   :  { %v533_v49 = vpop.f32.mrf.mxu0  ;;  %4545 = vmatpush3.bf16.msra.mxu1 %v4958_v45  ;;  %4548 = vmatprep.mubr.msk.bf16.mxu1 %vm5117_vm1, %v5116_v15 }
 0x4e2   :  { %4546 = vmatprep.subr.bf16.mxu1 %v5116_v15 }
 0x4e3   :  { %v4529_v51 = vpop.f32.mrf.mxu0 }
 0x4e4   :  { %v4962_v51 = vld [vmem:[%s5991_s10 + $0x28] sm:$0xff]  }
 0x4e5   :  { %v638_v52 = vpop.f32.mrf.mxu0  ;;  %4547 = vmatpush3.bf16.msra.mxu1 %v4959_v50  ;;  %v4961_v50 = vld [vmem:[%s5989_s8 + $0x20] sm:$0xff]  }
 0x4e6   :  { %4560 = vmatprep.subr.bf16.mxu1 %v5116_v15  ;;  %v645_v6 = vmul.f32 0.35355338, %v638_v52  ;;  %v4963_v52 = vld [vmem:[%s5991_s10 + $0x20] sm:$0xff]  }
 0x4e7   :  { %v4542_v53 = vpop.f32.mrf.mxu0 }
 0x4e8   :  { %4549 = vmatmul.mubr.msk.bf16.vlgmr.msra.gmra.mxu1 %vm91_vm0, %v5270_v34  ;;  %v763_v11 = vpack.c.bf16 %v645_v6, %v645_v6  ;;  %v4133_v53 = vld [vmem:[%s5992_s11 + $0x4] sm:$0xf] }
 0x4e9   :  { %v641_v54 = vpop.f32.mrf.mxu0  ;;  %4562 = vmatprep.mubr.msk.bf16.mxu1 %vm5117_vm1, %v5116_v15 }
 0x4ea   :  { %v646_v12 = vmul.f32 0.35355338, %v641_v54  ;;  %v984_v54 = vsel %vm446_vm3, %v4133_v53, 0 }
 0x4eb   :  { %v4543_v55 = vpop.f32.mrf.mxu0 }
 0x4ec   :  { %v764_v16 = vpack.c.bf16 %v646_v12, %v646_v12 }
 0x4ed   :  { %v756_v56 = vpop.f32.mrf.mxu0 }
 0x4ee   :  { %v767_v9 = vpack.c.bf16 %v756_v56, %v756_v56 }
 0x4ef   :  { %v4558_v57 = vpop.f32.mrf.mxu0 }
 0x4f0   :  { %v889_v13 = vsel %vm446_vm3, %v767_v9, 0 }
 0x4f1   :  { %v759_v58 = vpop.f32.mrf.mxu0 }
 0x4f2   :  { %v768_v14 = vpack.c.bf16 %v759_v58, %v759_v58 }
 0x4f3   :  { %v4559_v59 = vpop.f32.mrf.mxu0 }
 0x4f4   :  { %v935_v17 = vsel %vm446_vm3, %v768_v14, 0  ;;  %v4964_v59 = vld [vmem:[%s5990_s9 + $0x28] sm:$0xff]  }
 0x5a0   :  { %v5369_v60 = vpop.f32.mrf.mxu1 }
 0x5a2   :  { %v4534_v61 = vpop.f32.mrf.mxu1 }
 0x5a4   :  { %v5371_v62 = vpop.f32.mrf.mxu1 }
 0x5a6   :  { %v4535_v63 = vpop.f32.mrf.mxu1 }
 0x5a8   :  { %v698_v0 = vpop.f32.mrf.mxu1 }
 0x5a9   :  { %v765_v1 = vpack.c.bf16 %v698_v0, %v698_v0 }
 0x5aa   :  { %v4550_v3 = vpop.f32.mrf.mxu1 }
 0x5ab   :  { %v773_v4 = vsel %vm326_vm2, %v765_v1, 0  ;;  %v4965_v3 = vld [vmem:[%s5990_s9 + $0x20] sm:$0xff]  }
 0x5ac   :  { %v701_v5 = vpop.f32.mrf.mxu1  ;;  %4561 = vmatpush3.bf16.xpose.msra.mxu1 %v773_v4 }
 0x5ad   :  { %v766_v7 = vpack.c.bf16 %v701_v5, %v701_v5  ;;  %4572 = vmatprep.subr.bf16.mxu1 %v5116_v15 }
 0x5ae   :  { %v4551_v8 = vpop.f32.mrf.mxu1 }
 0x5af   :  { %v819_v10 = vsel %vm326_vm2, %v766_v7, 0 }
 0x5b0   :  { %4567 = vmatpush3.bf16.xpose.msra.mxu0 %v819_v10 }
 0x5b1   :  { %4578 = vmatprep.subr.bf16.mxu0 %v5116_v15 }
 0x5b3   :  { %4563 = vmatmul.mubr.msk.bf16.vlgmr.msra.gmra.mxu1 %vm326_vm2, %v763_v11 }
 0x5b4   :  { %4573 = vmatpush3.bf16.msra.mxu1 %v889_v13  ;;  %4574 = vmatprep.mubr.msk.bf16.mxu1 %vm5117_vm1, %v5116_v15  ;;  %v4093_v13 = vld [vmem:[%s5993_s12] ss:$0 sm:$0xff] }
 0x5b5   :  { %4584 = vmatprep.subr.bf16.mxu1 %v5116_v15  ;;  %v585_v14 = vadd.f32 %v4093_v13, %v5369_v60 }
 0x5b7   :  { %4569 = vmatmul.mubr.msk.bf16.vlgmr.msra.gmra.mxu0 %vm326_vm2, %v764_v16 }
 0x5b8   :  { %4579 = vmatpush3.bf16.msra.mxu0 %v935_v17  ;;  %4580 = vmatprep.mubr.msk.bf16.mxu0 %vm5117_vm1, %v5116_v15 }
 0x5b9   :  { %4590 = vmatprep.subr.bf16.mxu0 %v5116_v15 }
 0x673   :  { %v809_v18 = vpop.f32.mrf.mxu1 }
 0x674   :  { %v810_v19 = vadd.f32 %v809_v18, %v5311_v2 }
 0x675   :  { %v4564_v20 = vpop.f32.mrf.mxu1 }
 0x676   :  { %v861_v21 = vsel %vm326_vm2, %v810_v19, -inf }
 0x677   :  { %862 = vmax.xlane.f32.xlu0 %v861_v21  ;;  %v812_v22 = vpop.f32.mrf.mxu1  ;;  %v855_v23 = vpop.f32.mrf.mxu0 }
 0x678   :  { %v856_v24 = vadd.f32 %v855_v23, %v5311_v2 }
 0x679   :  { %v4565_v25 = vpop.f32.mrf.mxu1  ;;  %v4570_v26 = vpop.f32.mrf.mxu0 }
 0x67a   :  { %v864_v27 = vsel %vm326_vm2, %v856_v24, -inf }
 0x67b   :  { %865 = vmax.xlane.f32.xlu1 %v864_v27  ;;  %v858_v28 = vpop.f32.mrf.mxu0 }
 0x67d   :  { %v4571_v29 = vpop.f32.mrf.mxu0 }
 0x700   :  { %v863_v30 = vpop.xlane.xlu0 %862 }
 0x701   :  { %v867_v31 = vsub.f32 %v810_v19, %v863_v30  ;;  %v586_v19 = vadd.f32 %v4093_v13, %v5371_v62 }
 0x703   :  { %v869_v32 = vmul.f32 1.442695, %v867_v31 }
 0x704   :  { %v866_v33 = vpop.xlane.xlu1 %865 }
 0x705   :  { %5018 = vpow2.f32 %v869_v32  ;;  %v868_v35 = vsub.f32 %v856_v24, %v866_v33 }
 0x707   :  { %v871_v36 = vmul.f32 1.442695, %v868_v35 }
 0x709   :  { %5020 = vpow2.f32 %v871_v36 }
 0x712   :  { %v5019_v37 = vpop.eup %5018 }
 0x713   :  { %v873_v38 = vsel %vm326_vm2, %v5019_v37, 0.0 }
 0x714   :  { %874 = vadd.xlane.f32.xlu0 %v873_v38 }
 0x716   :  { %v5021_v39 = vpop.eup %5020 }
 0x717   :  { %v876_v40 = vsel %vm326_vm2, %v5021_v39, 0.0 }
 0x718   :  { %877 = vadd.xlane.f32.xlu1 %v876_v40 }
 0x79d   :  { %v875_v41 = vpop.xlane.xlu0 %874 }
 0x79e   :  { %5022 = vrcp.f32 %v875_v41 }
 0x7a1   :  { %v878_v42 = vpop.xlane.xlu1 %877 }
 0x7a2   :  { %5024 = vrcp.f32 %v878_v42 }
 0x7ab   :  { %v5023_v43 = vpop.eup %5022 }
 0x7ac   :  { %v881_v44 = vmul.f32 %v5023_v43, %v5019_v37 }
 0x7ae   :  { %v883_v45 = vpack.c.bf16 %v881_v44, %v881_v44 }
 0x7af   :  { %v5025_v46 = vpop.eup %5024 }
 0x7b0   :  { %4575 = vmatmul.mubr.msk.bf16.vlgmr.msra.gmra.mxu1 %vm326_vm2, %v883_v45  ;;  %v882_v47 = vmul.f32 %v5025_v46, %v5021_v39 }
 0x7b1   :  { %4586 = vmatprep.mubr.msk.bf16.mxu1 %vm5117_vm1, %v5116_v15  ;;  %4585 = vmatpush3.bf16.msra.mxu1 %v984_v54 }
 0x7b2   :  { %v884_v49 = vpack.c.bf16 %v882_v47, %v882_v47  ;;  %4598 = vmatprep.subr.bf16.mxu1 %v5116_v15 }
 0x7b4   :  { %4581 = vmatmul.mubr.msk.bf16.vlgmr.msra.gmra.mxu0 %vm326_vm2, %v884_v49 }
 0x7b5   :  { %4591 = vmatpush3.bf16.msra.mxu0 %v4960_v48  ;;  %4594 = vmatprep.mubr.msk.bf16.mxu0 %vm5117_vm1, %v5116_v15 }
 0x7b6   :  { %4592 = vmatprep.subr.bf16.mxu0 %v5116_v15 }
 0x7b9   :  { %4593 = vmatpush3.bf16.msra.mxu0 %v4961_v50 }
 0x7ba   :  { %4606 = vmatprep.subr.bf16.mxu0 %v5116_v15 }
 0x7bc   :  { %4595 = vmatmul.mubr.msk.bf16.vlgmr.msra.gmra.mxu0 %vm91_vm0, %v5270_v34 }
 0x7bd   :  { %4607 = vmatpush3.bf16.msra.mxu0 %v4962_v51  ;;  %4610 = vmatprep.mubr.msk.bf16.mxu0 %vm5117_vm1, %v5116_v15 }
 0x7be   :  { %4608 = vmatprep.subr.bf16.mxu0 %v5116_v15 }
 0x7c1   :  { %4609 = vmatpush3.bf16.msra.mxu0 %v4963_v52 }
 0x7c2   :  { %4620 = vmatprep.subr.bf16.mxu0 %v5116_v15 }
 0x7c4   :  { %4611 = vmatmul.mubr.msk.bf16.vlgmr.msra.gmra.mxu0 %vm91_vm0, %v5270_v34 }
 0x7c5   :  { %4622 = vmatprep.mubr.msk.bf16.mxu0 %vm5117_vm1, %v5116_v15 }
 0x870   :  { %v925_v55 = vpop.f32.mrf.mxu1 }
 0x872   :  { %v4576_v56 = vpop.f32.mrf.mxu1 }
 0x874   :  { %v928_v57 = vpop.f32.mrf.mxu1  ;;  %v971_v58 = vpop.f32.mrf.mxu0 }
 0x875   :  { %v977_v61 = vpack.c.bf16 %v971_v58, %v925_v55 }
 0x876   :  { %v4577_v63 = vpop.f32.mrf.mxu1  ;;  %v4582_v0 = vpop.f32.mrf.mxu0 }
 0x877   :  { %4587 = vmatmul.mubr.msk.bf16.vlgmr.msra.gmra.mxu1 %vm326_vm2, %v977_v61 }
 0x878   :  { %v974_v1 = vpop.f32.mrf.mxu0  ;;  %4599 = vmatpush3.bf16.msra.mxu1 %v4964_v59  ;;  %4602 = vmatprep.mubr.msk.bf16.mxu1 %vm5117_vm1, %v5116_v15 }
 0x879   :  { %4600 = vmatprep.subr.bf16.mxu1 %v5116_v15 }
 0x87a   :  { %v4583_v4 = vpop.f32.mrf.mxu0 }
 0x87c   :  { %v1080_v5 = vpop.f32.mrf.mxu0  ;;  %4601 = vmatpush3.bf16.msra.mxu1 %v4965_v3 }
 0x87d   :  { %4614 = vmatprep.subr.bf16.mxu1 %v5116_v15  ;;  %v1087_v28 = vmul.f32 0.35355338, %v1080_v5 }
 0x87e   :  { %v4596_v6 = vpop.f32.mrf.mxu0 }
 0x87f   :  { %4603 = vmatmul.mubr.msk.bf16.vlgmr.msra.gmra.mxu1 %vm91_vm0, %v5270_v34  ;;  %v1205_v62 = vpack.c.bf16 %v1087_v28, %v1087_v28  ;;  %v4966_v6 = vld [vmem:[%s5989_s8 + $0x38] sm:$0xff]  }
 0x880   :  { %v1083_v7 = vpop.f32.mrf.mxu0  ;;  %4616 = vmatprep.mubr.msk.bf16.mxu1 %vm5117_vm1, %v5116_v15 }
 0x881   :  { %v1088_v32 = vmul.f32 0.35355338, %v1083_v7 }
 0x882   :  { %v4597_v8 = vpop.f32.mrf.mxu0 }
 0x883   :  { %v1206_v36 = vpack.c.bf16 %v1088_v32, %v1088_v32  ;;  %v4967_v8 = vld [vmem:[%s5989_s8 + $0x30] sm:$0xff]  }
 0x884   :  { %v1198_v9 = vpop.f32.mrf.mxu0 }
 0x885   :  { %v1209_v30 = vpack.c.bf16 %v1198_v9, %v1198_v9  ;;  %v4968_v9 = vld [vmem:[%s5991_s10 + $0x38] sm:$0xff]  }
 0x886   :  { %v4612_v10 = vpop.f32.mrf.mxu0 }
 0x887   :  { %v1331_v33 = vsel %vm446_vm3, %v1209_v30, 0  ;;  %v4969_v10 = vld [vmem:[%s5991_s10 + $0x30] sm:$0xff]  }
 0x888   :  { %v1201_v11 = vpop.f32.mrf.mxu0 }
 0x889   :  { %v1210_v35 = vpack.c.bf16 %v1201_v11, %v1201_v11  ;;  %v4160_v11 = vld [vmem:[%s5992_s11 + $0x8] sm:$0xf] }
 0x88a   :  { %v4613_v12 = vpop.f32.mrf.mxu0 }
 0x88b   :  { %v1377_v37 = vsel %vm446_vm3, %v1210_v35, 0  ;;  %v1426_v12 = vsel %vm446_vm3, %v4160_v11, 0 }
 0x937   :  { %v1020_v16 = vpop.f32.mrf.mxu1 }
 0x938   :  { %v5447_v17 = vadd.f32 %v1020_v16, %v585_v14 }
 0x939   :  { %v4588_v18 = vpop.f32.mrf.mxu1 }
 0x93b   :  { %v1023_v20 = vpop.f32.mrf.mxu1 }
 0x93c   :  { %v5450_v21 = vadd.f32 %v1023_v20, %v586_v19  ;;  %v4970_v19 = vld [vmem:[%s5990_s9 + $0x38] sm:$0xff]  }
 0x93d   :  { %v4589_v22 = vpop.f32.mrf.mxu1 }
 0x93f   :  { %v1140_v23 = vpop.f32.mrf.mxu1 }
 0x940   :  { %v1207_v24 = vpack.c.bf16 %v1140_v23, %v1140_v23 }
 0x941   :  { %v4604_v25 = vpop.f32.mrf.mxu1 }
 0x942   :  { %v1215_v26 = vsel %vm326_vm2, %v1207_v24, 0  ;;  %v4971_v25 = vld [vmem:[%s5990_s9 + $0x30] sm:$0xff]  }
 0x943   :  { %v1143_v27 = vpop.f32.mrf.mxu1  ;;  %4615 = vmatpush3.bf16.xpose.msra.mxu1 %v1215_v26 }
 0x944   :  { %v1208_v29 = vpack.c.bf16 %v1143_v27, %v1143_v27  ;;  %4626 = vmatprep.subr.bf16.mxu1 %v5116_v15 }
 0x945   :  { %v4605_v60 = vpop.f32.mrf.mxu1 }
 0x946   :  { %v1261_v31 = vsel %vm326_vm2, %v1208_v29, 0 }
 0x947   :  { %4621 = vmatpush3.bf16.xpose.msra.mxu0 %v1261_v31 }
 0x948   :  { %4632 = vmatprep.subr.bf16.mxu0 %v5116_v15 }
 0x94a   :  { %4617 = vmatmul.mubr.msk.bf16.vlgmr.msra.gmra.mxu1 %vm326_vm2, %v1205_v62 }
 0x94b   :  { %4627 = vmatpush3.bf16.msra.mxu1 %v1331_v33  ;;  %4628 = vmatprep.mubr.msk.bf16.mxu1 %vm5117_vm1, %v5116_v15 }
 0x94c   :  { %4638 = vmatprep.subr.bf16.mxu1 %v5116_v15 }
 0x94e   :  { %4623 = vmatmul.mubr.msk.bf16.vlgmr.msra.gmra.mxu0 %vm326_vm2, %v1206_v36 }
 0x94f   :  { %4633 = vmatpush3.bf16.msra.mxu0 %v1377_v37  ;;  %4634 = vmatprep.mubr.msk.bf16.mxu0 %vm5117_vm1, %v5116_v15 }
 0x950   :  { %4644 = vmatprep.subr.bf16.mxu0 %v5116_v15 }
 0xa0a   :  { %v1251_v38 = vpop.f32.mrf.mxu1 }
 0xa0b   :  { %v1252_v39 = vadd.f32 %v1251_v38, %v5311_v2 }
 0xa0c   :  { %v4618_v40 = vpop.f32.mrf.mxu1 }
 0xa0d   :  { %v1303_v41 = vsel %vm326_vm2, %v1252_v39, -inf }
 0xa0e   :  { %1304 = vmax.xlane.f32.xlu0 %v1303_v41  ;;  %v1254_v42 = vpop.f32.mrf.mxu1  ;;  %v1297_v43 = vpop.f32.mrf.mxu0 }
 0xa0f   :  { %v1298_v44 = vadd.f32 %v1297_v43, %v5311_v2 }
 0xa10   :  { %v4619_v45 = vpop.f32.mrf.mxu1  ;;  %v4624_v46 = vpop.f32.mrf.mxu0 }
 0xa11   :  { %v1306_v47 = vsel %vm326_vm2, %v1298_v44, -inf }
 0xa12   :  { %1307 = vmax.xlane.f32.xlu1 %v1306_v47  ;;  %v1300_v48 = vpop.f32.mrf.mxu0 }
 0xa14   :  { %v4625_v49 = vpop.f32.mrf.mxu0 }
 0xa97   :  { %v1305_v50 = vpop.xlane.xlu0 %1304 }
 0xa98   :  { %v1309_v51 = vsub.f32 %v1252_v39, %v1305_v50 }
 0xa9a   :  { %v1311_v52 = vmul.f32 1.442695, %v1309_v51 }
 0xa9b   :  { %v1308_v53 = vpop.xlane.xlu1 %1307 }
 0xa9c   :  { %5026 = vpow2.f32 %v1311_v52  ;;  %v1310_v54 = vsub.f32 %v1298_v44, %v1308_v53 }
 0xa9e   :  { %v1313_v55 = vmul.f32 1.442695, %v1310_v54 }
 0xaa0   :  { %5028 = vpow2.f32 %v1313_v55 }
 0xaa9   :  { %v5027_v56 = vpop.eup %5026 }
 0xaaa   :  { %v1315_v57 = vsel %vm326_vm2, %v5027_v56, 0.0 }
 0xaab   :  { %1316 = vadd.xlane.f32.xlu0 %v1315_v57 }
 0xaad   :  { %v5029_v58 = vpop.eup %5028 }
 0xaae   :  { %v1318_v59 = vsel %vm326_vm2, %v5029_v58, 0.0 }
 0xaaf   :  { %1319 = vadd.xlane.f32.xlu1 %v1318_v59 }
 0xb34   :  { %v1317_v61 = vpop.xlane.xlu0 %1316 }
 0xb35   :  { %5030 = vrcp.f32 %v1317_v61 }
 0xb38   :  { %v1320_v63 = vpop.xlane.xlu1 %1319 }
 0xb39   :  { %5032 = vrcp.f32 %v1320_v63 }
 0xb42   :  { %v5031_v0 = vpop.eup %5030 }
 0xb43   :  { %v1323_v1 = vmul.f32 %v5031_v0, %v5027_v56 }
 0xb45   :  { %v1325_v3 = vpack.c.bf16 %v1323_v1, %v1323_v1 }
 0xb46   :  { %v5033_v4 = vpop.eup %5032 }
 0xb47   :  { %4629 = vmatmul.mubr.msk.bf16.vlgmr.msra.gmra.mxu1 %vm326_vm2, %v1325_v3  ;;  %v1324_v5 = vmul.f32 %v5033_v4, %v5029_v58 }
 0xb48   :  { %4640 = vmatprep.mubr.msk.bf16.mxu1 %vm5117_vm1, %v5116_v15  ;;  %4639 = vmatpush3.bf16.msra.mxu1 %v1426_v12 }
 0xb49   :  { %v1326_v7 = vpack.c.bf16 %v1324_v5, %v1324_v5  ;;  %4652 = vmatprep.subr.bf16.mxu1 %v5116_v15 }
 0xb4b   :  { %4635 = vmatmul.mubr.msk.bf16.vlgmr.msra.gmra.mxu0 %vm326_vm2, %v1326_v7 }
 0xb4c   :  { %4645 = vmatpush3.bf16.msra.mxu0 %v4966_v6  ;;  %4648 = vmatprep.mubr.msk.bf16.mxu0 %vm5117_vm1, %v5116_v15 }
 0xb4d   :  { %4646 = vmatprep.subr.bf16.mxu0 %v5116_v15 }
 0xb50   :  { %4647 = vmatpush3.bf16.msra.mxu0 %v4967_v8 }
 0xb51   :  { %4660 = vmatprep.subr.bf16.mxu0 %v5116_v15 }
 0xb53   :  { %4649 = vmatmul.mubr.msk.bf16.vlgmr.msra.gmra.mxu0 %vm91_vm0, %v5270_v34 }
 0xb54   :  { %4661 = vmatpush3.bf16.msra.mxu0 %v4968_v9  ;;  %4664 = vmatprep.mubr.msk.bf16.mxu0 %vm5117_vm1, %v5116_v15 }
 0xb55   :  { %4662 = vmatprep.subr.bf16.mxu0 %v5116_v15 }
 0xb58   :  { %4663 = vmatpush3.bf16.msra.mxu0 %v4969_v10 }
 0xb59   :  { %4674 = vmatprep.subr.bf16.mxu0 %v5116_v15 }
 0xb5b   :  { %4665 = vmatmul.mubr.msk.bf16.vlgmr.msra.gmra.mxu0 %vm91_vm0, %v5270_v34 }
 0xb5c   :  { %4676 = vmatprep.mubr.msk.bf16.mxu0 %vm5117_vm1, %v5116_v15 }
 0xc07   :  { %v1367_v13 = vpop.f32.mrf.mxu1 }
 0xc09   :  { %v4630_v14 = vpop.f32.mrf.mxu1 }
 0xc0b   :  { %v1370_v16 = vpop.f32.mrf.mxu1  ;;  %v1413_v18 = vpop.f32.mrf.mxu0 }
 0xc0c   :  { %v1419_v20 = vpack.c.bf16 %v1413_v18, %v1367_v13 }
 0xc0d   :  { %v4631_v22 = vpop.f32.mrf.mxu1  ;;  %v4636_v23 = vpop.f32.mrf.mxu0 }
 0xc0e   :  { %4641 = vmatmul.mubr.msk.bf16.vlgmr.msra.gmra.mxu1 %vm326_vm2, %v1419_v20 }
 0xc0f   :  { %v1416_v24 = vpop.f32.mrf.mxu0  ;;  %4653 = vmatpush3.bf16.msra.mxu1 %v4970_v19  ;;  %4656 = vmatprep.mubr.msk.bf16.mxu1 %vm5117_vm1, %v5116_v15 }
 0xc10   :  { %4654 = vmatprep.subr.bf16.mxu1 %v5116_v15  ;;  %v4187_v24 = vld [vmem:[%s5992_s11 + $0xc] sm:$0xf] }
 0xc11   :  { %v4637_v26 = vpop.f32.mrf.mxu0 }
 0xc12   :  { %v75_v26 = vld [vmem:[%s6018_s4] sm:$0xff] }
 0xc13   :  { %v1522_v27 = vpop.f32.mrf.mxu0  ;;  %4655 = vmatpush3.bf16.msra.mxu1 %v4971_v25  ;;  %v1868_v25 = vsel %vm446_vm3, %v4187_v24, 0 }
 0xc14   :  { %4668 = vmatprep.subr.bf16.mxu1 %v5116_v15  ;;  %v1529_v44 = vmul.f32 0.35355338, %v1522_v27  ;;  %v77_v27 = vld [vmem:[%s6018_s4 + $0x10] sm:$0xff] }
 0xc15   :  { %v4650_v28 = vpop.f32.mrf.mxu0 }
 0xc16   :  { %4657 = vmatmul.mubr.msk.bf16.vlgmr.msra.gmra.mxu1 %vm91_vm0, %v5270_v34  ;;  %v1647_v48 = vpack.c.bf16 %v1529_v44, %v1529_v44  ;;  %v76_v28 = vld [vmem:[%s6018_s4 + $0x8] sm:$0xff] }
 0xc17   :  { %v1525_v29 = vpop.f32.mrf.mxu0  ;;  %4670 = vmatprep.mubr.msk.bf16.mxu1 %vm5117_vm1, %v5116_v15 }
 0xc19   :  { %v4651_v60 = vpop.f32.mrf.mxu0 }
 0xc1a   :  { %v1948_v60 = vsel %vm91_vm0, %v76_v28, 0.0 }
 0xc1b   :  { %v1640_v30 = vpop.f32.mrf.mxu0 }
 0xc1d   :  { %v4666_v31 = vpop.f32.mrf.mxu0 }
 0xc1e   :  { %v1951_v31 = vsel %vm91_vm0, %v77_v27, 0.0 }
 0xc1f   :  { %v1643_v62 = vpop.f32.mrf.mxu0 }
 0xc20   :  { %v1652_v50 = vpack.c.bf16 %v1643_v62, %v1643_v62 }
 0xc21   :  { %v4667_v32 = vpop.f32.mrf.mxu0 }
 0xc22   :  { %v1819_v52 = vsel %vm446_vm3, %v1652_v50, 0 }
 0xcce   :  { %v1462_v33 = vpop.f32.mrf.mxu1 }
 0xccf   :  { %v5523_v35 = vadd.f32 %v1462_v33, %v5447_v17  ;;  %v1651_v17 = vpack.c.bf16 %v1640_v30, %v1640_v30  ;;  %v78_v30 = vld [vmem:[%s6018_s4 + $0x18] sm:$0xff] }
 0xcd0   :  { %v4642_v36 = vpop.f32.mrf.mxu1  ;;  %v1954_v62 = vsel %vm91_vm0, %v78_v30, 0.0 }
 0xcd1   :  { %v1773_v49 = vsel %vm446_vm3, %v1651_v17, 0 }
 0xcd2   :  { %v1465_v37 = vpop.f32.mrf.mxu1 }
 0xcd3   :  { %v5526_v38 = vadd.f32 %v1465_v37, %v5450_v21  ;;  %v1530_v21 = vmul.f32 0.35355338, %v1525_v29  ;;  %v1945_v29 = vsel %vm91_vm0, %v75_v26, 0.0 }
 0xcd4   :  { %v4643_v39 = vpop.f32.mrf.mxu1 }
 0xcd5   :  { %v1648_v51 = vpack.c.bf16 %v1530_v21, %v1530_v21 }
 0xcd6   :  { %v1582_v34 = vpop.f32.mrf.mxu1 }
 0xcd7   :  { %v1649_v40 = vpack.c.bf16 %v1582_v34, %v1582_v34 }
 0xcd8   :  { %v4658_v41 = vpop.f32.mrf.mxu1 }
 0xcd9   :  { %v1657_v42 = vsel %vm326_vm2, %v1649_v40, 0 }
 0xcda   :  { %v1585_v43 = vpop.f32.mrf.mxu1  ;;  %4669 = vmatpush3.bf16.xpose.msra.mxu1 %v1657_v42 }
 0xcdb   :  { %v1650_v45 = vpack.c.bf16 %v1585_v43, %v1585_v43  ;;  %4680 = vmatprep.subr.bf16.mxu1 %v5116_v15 }
 0xcdc   :  { %v4659_v46 = vpop.f32.mrf.mxu1 }
 0xcdd   :  { %v1703_v47 = vsel %vm326_vm2, %v1650_v45, 0 }
 0xcde   :  { %4675 = vmatpush3.bf16.xpose.msra.mxu0 %v1703_v47 }
 0xcdf   :  { %4686 = vmatprep.subr.bf16.mxu0 %v5116_v15 }
 0xce1   :  { %4671 = vmatmul.mubr.msk.bf16.vlgmr.msra.gmra.mxu1 %vm326_vm2, %v1647_v48 }
 0xce2   :  { %4681 = vmatpush3.bf16.msra.mxu1 %v1773_v49  ;;  %4682 = vmatprep.mubr.msk.bf16.mxu1 %vm5117_vm1, %v5116_v15 }
 0xce3   :  { %4692 = vmatprep.subr.bf16.mxu1 %v5116_v15 }
 0xce5   :  { %4677 = vmatmul.mubr.msk.bf16.vlgmr.msra.gmra.mxu0 %vm326_vm2, %v1648_v51 }
 0xce6   :  { %4687 = vmatpush3.bf16.msra.mxu0 %v1819_v52  ;;  %4688 = vmatprep.mubr.msk.bf16.mxu0 %vm5117_vm1, %v5116_v15 }
 0xce7   :  { %4698 = vmatprep.subr.bf16.mxu0 %v5116_v15 }
 0xda1   :  { %v1693_v53 = vpop.f32.mrf.mxu1 }
 0xda2   :  { %v1694_v54 = vadd.f32 %v1693_v53, %v5311_v2  ;;  %v5090_v53 = vld [vmem:[%s6015_s29] sm:$0xff] }
 0xda3   :  { %v4672_v55 = vpop.f32.mrf.mxu1 }
 0xda4   :  { %v1745_v56 = vsel %vm326_vm2, %v1694_v54, -inf }
 0xda5   :  { %1746 = vmax.xlane.f32.xlu0 %v1745_v56  ;;  %v1696_v57 = vpop.f32.mrf.mxu1  ;;  %v1739_v58 = vpop.f32.mrf.mxu0 }
 0xda6   :  { %v1740_v59 = vadd.f32 %v1739_v58, %v5311_v2 }
 0xda7   :  { %v4673_v61 = vpop.f32.mrf.mxu1  ;;  %v4678_v63 = vpop.f32.mrf.mxu0 }
 0xda8   :  { %v1748_v0 = vsel %vm326_vm2, %v1740_v59, -inf }
 0xda9   :  { %1749 = vmax.xlane.f32.xlu1 %v1748_v0  ;;  %v1742_v1 = vpop.f32.mrf.mxu0  ;;  %v5091_v0 = vld [vmem:[%s6015_s29 + $0x8] sm:$0xff] }
 0xdab   :  { %v4679_v3 = vpop.f32.mrf.mxu0 }
 0xe2e   :  { %v1747_v4 = vpop.xlane.xlu0 %1746 }
 0xe2f   :  { %v1751_v5 = vsub.f32 %v1694_v54, %v1747_v4 }
 0xe31   :  { %v1753_v6 = vmul.f32 1.442695, %v1751_v5 }
 0xe32   :  { %v1750_v7 = vpop.xlane.xlu1 %1749 }
 0xe33   :  { %5034 = vpow2.f32 %v1753_v6  ;;  %v1752_v8 = vsub.f32 %v1740_v59, %v1750_v7 }
 0xe35   :  { %v1755_v9 = vmul.f32 1.442695, %v1752_v8 }
 0xe37   :  { %5036 = vpow2.f32 %v1755_v9 }
 0xe40   :  { %v5035_v10 = vpop.eup %5034 }
 0xe41   :  { %v1757_v11 = vsel %vm326_vm2, %v5035_v10, 0.0 }
 0xe42   :  { %1758 = vadd.xlane.f32.xlu0 %v1757_v11  ;;  %v4973_v11 = vld [vmem:[%s5995_s14] sm:$0xff]  }
 0xe44   :  { %v5037_v2 = vpop.eup %5036 }
 0xe45   :  { %v1760_v12 = vsel %vm326_vm2, %v5037_v2, 0.0 }
 0xe46   :  { %1761 = vadd.xlane.f32.xlu1 %v1760_v12  ;;  %1946 = vadd.xlane.f32.xlu0 %v1945_v29 }
 0xe4a   :  { %1949 = vadd.xlane.f32.xlu1 %v1948_v60  ;;  %1952 = vadd.xlane.f32.xlu0 %v1951_v31 }
 0xe4e   :  { %1955 = vadd.xlane.f32.xlu1 %v1954_v62 }
 0xecb   :  { %v1759_v13 = vpop.xlane.xlu0 %1758 }
 0xecc   :  { %5038 = vrcp.f32 %v1759_v13 }
 0xecf   :  { %v1762_v14 = vpop.xlane.xlu1 %1761  ;;  %v1947_v43 = vpop.xlane.xlu0 %1946 }
 0xed0   :  { %5040 = vrcp.f32 %v1762_v14  ;;  %v1957_v44 = vmul.f32 0.03125, %v1947_v43 }
 0xed2   :  { %v5575_v17 = vsub.f32 %v75_v26, %v1957_v44  ;;  %v4190_v44 = vld [vmem:[%s6020_s23] ss:$0 sm:$0xff] }
 0xed3   :  { %v1950_v45 = vpop.xlane.xlu1 %1949  ;;  %v1953_v46 = vpop.xlane.xlu0 %1952 }
 0xed4   :  { %v1959_v47 = vmul.f32 0.03125, %v1953_v46  ;;  %v1958_v48 = vmul.f32 0.03125, %v1950_v45  ;;  %v1965_v52 = vmul.f32 %v5575_v17, %v5575_v17 }
 0xed6   :  { %v5585_v55 = vsub.f32 %v77_v27, %v1959_v47  ;;  %v5587_v56 = vsub.f32 %v76_v28, %v1958_v48  ;;  %v1969_v63 = vsel %vm91_vm0, %v1965_v52, 0.0 }
 0xed7   :  { %v1956_v49 = vpop.xlane.xlu1 %1955 }
 0xed8   :  { %v1960_v57 = vmul.f32 0.03125, %v1956_v49  ;;  %v1967_v4 = vmul.f32 %v5585_v55, %v5585_v55 }
 0xed9   :  { %v5039_v16 = vpop.eup %5038 }
 0xeda   :  { %v1765_v18 = vmul.f32 %v5039_v16, %v5035_v10  ;;  %v1964_v3 = vsub.f32 %v78_v30, %v1960_v57  ;;  %v1975_v6 = vsel %vm91_vm0, %v1967_v4, 0.0  ;;  %v4972_v10 = vld [vmem:[%s5995_s14 + $0x8] sm:$0xff]  }
 0xedb   :  { %v4976_v57 = vld [vmem:[%s5996_s15 + $0x8] sm:$0xff]  }
 0xedc   :  { %v1767_v19 = vpack.c.bf16 %v1765_v18, %v1765_v18  ;;  %v1968_v8 = vmul.f32 %v1964_v3, %v1964_v3 }
 0xedd   :  { %v5041_v20 = vpop.eup %5040 }
 0xede   :  { %4683 = vmatmul.mubr.msk.bf16.vlgmr.msra.gmra.mxu1 %vm326_vm2, %v1767_v19  ;;  %v1766_v22 = vmul.f32 %v5041_v20, %v5037_v2  ;;  %v1978_v9 = vsel %vm91_vm0, %v1968_v8, 0.0 }
 0xedf   :  { %4694 = vmatprep.mubr.msk.bf16.mxu1 %vm5117_vm1, %v5116_v15  ;;  %4693 = vmatpush3.bf16.msra.mxu1 %v1868_v25 }
 0xee0   :  { %v1768_v23 = vpack.c.bf16 %v1766_v22, %v1766_v22  ;;  %4706 = vmatprep.subr.bf16.mxu1 %v4972_v10 }
 0xee2   :  { %4689 = vmatmul.mubr.msk.bf16.vlgmr.msra.gmra.mxu0 %vm326_vm2, %v1768_v23 }
 0xee3   :  { %4702 = vmatprep.mubr.msk.bf16.mxu0 %vm5117_vm1, %v5116_v15 }
 0xf9e   :  { %v1809_v32 = vpop.f32.mrf.mxu1 }
 0xfa0   :  { %v4684_v33 = vpop.f32.mrf.mxu1 }
 0xfa2   :  { %v1812_v36 = vpop.f32.mrf.mxu1  ;;  %v1855_v37 = vpop.f32.mrf.mxu0 }
 0xfa3   :  { %v1861_v39 = vpack.c.bf16 %v1855_v37, %v1809_v32 }
 0xfa4   :  { %v4685_v34 = vpop.f32.mrf.mxu1  ;;  %v4690_v40 = vpop.f32.mrf.mxu0 }
 0xfa5   :  { %4695 = vmatmul.mubr.msk.bf16.vlgmr.msra.gmra.mxu1 %vm326_vm2, %v1861_v39  ;;  %v4189_v39 = vld [vmem:[%s6019_s30] ss:$0 sm:$0xff] }
 0xfa6   :  { %v1858_v41 = vpop.f32.mrf.mxu0  ;;  %4707 = vmatpush3.bf16.msra.mxu1 %v4972_v10 }
 0xfa7   :  { %4708 = vmatprep.subr.bf16.mxu1 %v4973_v11 }
 0xfa8   :  { %v4691_v42 = vpop.f32.mrf.mxu0 }
 0xfaa   :  { %4709 = vmatpush3.bf16.msra.mxu1 %v4973_v11 }
 0xfab   :  { %4722 = vmatprep.subr.bf16.mxu1 %v5116_v15 }
0x1065   :  { %v1904_v21 = vpop.f32.mrf.mxu1 }
0x1066   :  { %v1911_v50 = vadd.f32 %v1904_v21, %v5523_v35 }
0x1067   :  { %v4696_v51 = vpop.f32.mrf.mxu1 }
0x1068   :  { %v5583_v54 = vadd.f32 %v5090_v53, %v1911_v50 }
0x1069   :  { %v1907_v58 = vpop.f32.mrf.mxu1 }
0x106a   :  { %v1912_v59 = vadd.f32 %v1907_v58, %v5526_v38  ;;  %v1915_v35 = vsel %vm91_vm0, %v5583_v54, 0.0  ;;  %v1966_v38 = vmul.f32 %v5587_v56, %v5587_v56 }
0x106b   :  { %1916 = vadd.xlane.f32.xlu0 %v1915_v35  ;;  %v4697_v61 = vpop.f32.mrf.mxu1 }
0x106c   :  { %v5596_v1 = vadd.f32 %v5091_v0, %v1912_v59  ;;  %v1972_v7 = vsel %vm91_vm0, %v1966_v38, 0.0 }
0x106e   :  { %v1918_v5 = vsel %vm91_vm0, %v5596_v1, 0.0 }
0x106f   :  { %1970 = vadd.xlane.f32.xlu0 %v1969_v63  ;;  %1919 = vadd.xlane.f32.xlu1 %v1918_v5 }
0x1073   :  { %1976 = vadd.xlane.f32.xlu0 %v1975_v6  ;;  %1973 = vadd.xlane.f32.xlu1 %v1972_v7  ;;  %v5092_v6 = vld [vmem:[%s6016_s25] ss:$0 sm:$0xff] }
0x1077   :  { %1979 = vadd.xlane.f32.xlu1 %v1978_v9  ;;  %v5093_v9 = vld [vmem:[%s6017_s27] ss:$0 sm:$0xff] }
0x10f4   :  { %v1917_v2 = vpop.xlane.xlu0 %1916 }
0x10f5   :  { %v1921_v12 = vmul.f32 0.03125, %v1917_v2 }
0x10f7   :  { %v5615_v13 = vsub.f32 %v5583_v54, %v1921_v12  ;;  %v4977_v12 = vld [vmem:[%s5996_s15] sm:$0xff]  }
0x10f8   :  { %v1971_v14 = vpop.xlane.xlu0 %1970  ;;  %v1920_v16 = vpop.xlane.xlu1 %1919 }
0x10f9   :  { %v1981_v18 = vmul.f32 0.03125, %v1971_v14  ;;  %v1922_v19 = vmul.f32 0.03125, %v1920_v16  ;;  %v1925_v20 = vmul.f32 %v5615_v13, %v5615_v13 }
0x10fb   :  { %v1985_v22 = vadd.f32 1e-05, %v1981_v18  ;;  %v1924_v23 = vsub.f32 %v5596_v1, %v1922_v19  ;;  %v1927_v24 = vsel %vm91_vm0, %v1925_v20, 0.0 }
0x10fc   :  { %1928 = vadd.xlane.f32.xlu0 %v1927_v24  ;;  %v1977_v25 = vpop.xlane.xlu0 %1976  ;;  %v1974_v26 = vpop.xlane.xlu1 %1973 }
0x10fd   :  { %5042 = vrsqrt.f32 %v1985_v22  ;;  %v1983_v27 = vmul.f32 0.03125, %v1977_v25  ;;  %v1982_v28 = vmul.f32 0.03125, %v1974_v26  ;;  %v1926_v29 = vmul.f32 %v1924_v23, %v1924_v23 }
0x10ff   :  { %v1987_v60 = vadd.f32 1e-05, %v1983_v27  ;;  %v1986_v30 = vadd.f32 1e-05, %v1982_v28  ;;  %v1930_v31 = vsel %vm91_vm0, %v1926_v29, 0.0 }
0x1100   :  { %1931 = vadd.xlane.f32.xlu1 %v1930_v31  ;;  %v1980_v62 = vpop.xlane.xlu1 %1979 }
0x1101   :  { %5044 = vrsqrt.f32 %v1987_v60  ;;  %v1984_v32 = vmul.f32 0.03125, %v1980_v62 }
0x1102   :  { %5046 = vrsqrt.f32 %v1986_v30 }
0x1103   :  { %v1988_v33 = vadd.f32 1e-05, %v1984_v32 }
0x1105   :  { %5048 = vrsqrt.f32 %v1988_v33 }
0x110a   :  { %v5043_v36 = vpop.eup %5042 }
0x110b   :  { %v1993_v37 = vmul.f32 %v5043_v36, %v5575_v17 }
0x110d   :  { %v2003_v42 = vmul.f32 %v4189_v39, %v1993_v37 }
0x110e   :  { %v5045_v34 = vpop.eup %5044 }
0x110f   :  { %v5047_v40 = vpop.eup %5046  ;;  %v1995_v41 = vmul.f32 %v5045_v34, %v5585_v55  ;;  %v2013_v17 = vadd.f32 %v4190_v44, %v2003_v42  ;;  %v4974_v55 = vld [vmem:[%s5994_s13 + $0x8] sm:$0xff]  }
0x1110   :  { %v1994_v43 = vmul.f32 %v5047_v40, %v5587_v56  ;;  %4699 = vmatpush3.bf16.msra.mxu0 %v4974_v55  ;;  %v4975_v56 = vld [vmem:[%s5994_s13] sm:$0xff]  }
0x1111   :  { %v2005_v47 = vmul.f32 %v4189_v39, %v1995_v41  ;;  %4700 = vmatprep.subr.bf16.mxu0 %v5116_v15 }
0x1112   :  { %v5049_v45 = vpop.eup %5048  ;;  %v2004_v46 = vmul.f32 %v4189_v39, %v1994_v43 }
0x1113   :  { %v1996_v48 = vmul.f32 %v5049_v45, %v1964_v3  ;;  %v2015_v51 = vadd.f32 %v4190_v44, %v2005_v47 }
0x1114   :  { %v2014_v21 = vadd.f32 %v4190_v44, %v2004_v46  ;;  %4701 = vmatpush3.bf16.msra.mxu0 %v4975_v56 }
0x1115   :  { %v2006_v49 = vmul.f32 %v4189_v39, %v1996_v48  ;;  %4714 = vmatprep.subr.bf16.mxu0 %v4976_v57 }
0x1116   :  { %v5631_v50 = vpack.c.bf16 %v2014_v21, %v2013_v17 }
0x1117   :  { %v2016_v52 = vadd.f32 %v4190_v44, %v2006_v49 }
0x1118   :  { %4710 = vmatprep.mubr.msk.bf16.mxu1 %vm91_vm0, %v5631_v50 }
0x1119   :  { %v5635_v53 = vpack.c.bf16 %v2016_v52, %v2015_v51 }
0x111b   :  { %4711 = vmatmul.mubr.msk.bf16.vlgmr.msra.gmra.mxu1 %vm91_vm0, %v5635_v53 }
0x111c   :  { %4724 = vmatprep.mubr.msk.bf16.mxu1 %vm5117_vm1, %v5116_v15 }
0x1185   :  { %v1929_v58 = vpop.xlane.xlu0 %1928 }
0x1186   :  { %v1933_v59 = vmul.f32 0.03125, %v1929_v58 }
0x1188   :  { %v1935_v35 = vadd.f32 1e-05, %v1933_v59 }
0x1189   :  { %v1932_v61 = vpop.xlane.xlu1 %1931 }
0x118a   :  { %5050 = vrsqrt.f32 %v1935_v35  ;;  %v1934_v63 = vmul.f32 0.03125, %v1932_v61 }
0x118c   :  { %v1936_v0 = vadd.f32 1e-05, %v1934_v63 }
0x118e   :  { %5052 = vrsqrt.f32 %v1936_v0 }
0x1197   :  { %v5051_v3 = vpop.eup %5050 }
0x1198   :  { %v1939_v4 = vmul.f32 %v5051_v3, %v5615_v13 }
0x119a   :  { %v1941_v7 = vmul.f32 %v5092_v6, %v1939_v4 }
0x119b   :  { %v5053_v38 = vpop.eup %5052 }
0x119c   :  { %v1940_v5 = vmul.f32 %v5053_v38, %v1924_v23  ;;  %v1943_v10 = vadd.f32 %v5093_v9, %v1941_v7  ;;  %v4978_v38 = vld [vmem:[%s5994_s13 + $0x18] sm:$0xff]  }
0x119d   :  { %v4980_v7 = vld [vmem:[%s5996_s15 + $0x18] sm:$0xff]  }
0x119e   :  { %v1942_v8 = vmul.f32 %v5092_v6, %v1940_v5  ;;  %v4979_v6 = vld [vmem:[%s5994_s13 + $0x10] sm:$0xff]  }
0x11a0   :  { %v1944_v11 = vadd.f32 %v5093_v9, %v1942_v8  ;;  %v4981_v8 = vld [vmem:[%s5996_s15 + $0x10] sm:$0xff]   ;;  %v2436_v9 = vld [vmem:[%s5997_s16] sm:$0xf] }
0x11a2   :  { %v5658_v2 = vpack.c.bf16 %v1944_v11, %v1943_v10  ;;  %v2441_v10 = vsel %vm446_vm3, %v2436_v9, 0  ;;  %v4982_v11 = vld [vmem:[%s5995_s14 + $0x18] sm:$0xff]  }
0x11a4   :  { %4703 = vmatmul.mubr.msk.bf16.vlgmr.msra.gmra.mxu0 %vm91_vm0, %v5658_v2 }
0x11a5   :  { %4715 = vmatpush3.bf16.msra.mxu0 %v4976_v57  ;;  %4718 = vmatprep.mubr.msk.bf16.mxu0 %vm91_vm0, %v5631_v50 }
0x11a6   :  { %4716 = vmatprep.subr.bf16.mxu0 %v4977_v12 }
0x11a9   :  { %4717 = vmatpush3.bf16.msra.mxu0 %v4977_v12 }
0x11aa   :  { %4728 = vmatprep.subr.bf16.mxu0 %v5116_v15 }
0x11ac   :  { %4719 = vmatmul.mubr.msk.bf16.vlgmr.msra.gmra.mxu0 %vm91_vm0, %v5635_v53 }
0x11ad   :  { %4730 = vmatprep.mubr.msk.bf16.mxu0 %vm5117_vm1, %v5116_v15 }
0x11db   :  { %v4712_v13 = vpop.f32.mrf.mxu1 }
0x11dd   :  { %v2146_v14 = vpop.f32.mrf.mxu1 }
0x11df   :  { %v4713_v16 = vpop.f32.mrf.mxu1 }
0x11e0   :  { %v2229_v18 = vpack.c.bf16 %v4713_v16, %v4712_v13 }
0x11e1   :  { %v2149_v19 = vpop.f32.mrf.mxu1 }
0x11e2   :  { %v2282_v20 = vsel %vm326_vm2, %v2229_v18, 0  ;;  %v2228_v22 = vpack.c.bf16 %v2149_v19, %v2146_v14  ;;  %v4983_v19 = vld [vmem:[%s5995_s14 + $0x10] sm:$0xff]  }
0x11e3   :  { %4729 = vmatpush3.bf16.xpose.msra.mxu0 %v2282_v20 }
0x11e4   :  { %v2236_v23 = vsel %vm326_vm2, %v2228_v22, 0  ;;  %4740 = vmatprep.subr.bf16.mxu0 %v5116_v15 }
0x11e5   :  { %4723 = vmatpush3.bf16.xpose.msra.mxu1 %v2236_v23 }
0x11e6   :  { %4734 = vmatprep.subr.bf16.mxu1 %v5116_v15 }
0x1264   :  { %v2081_v24 = vpop.f32.mrf.mxu0 }
0x1265   :  { %v2088_v25 = vmul.f32 0.35355338, %v2081_v24 }
0x1266   :  { %v4704_v26 = vpop.f32.mrf.mxu0 }
0x1267   :  { %v2226_v27 = vpack.c.bf16 %v2088_v25, %v2088_v25 }
0x1268   :  { %v2084_v28 = vpop.f32.mrf.mxu0 }
0x1269   :  { %v2089_v29 = vmul.f32 0.35355338, %v2084_v28  ;;  %4725 = vmatmul.mubr.msk.bf16.vlgmr.msra.gmra.mxu1 %vm326_vm2, %v2226_v27 }
0x126a   :  { %v4705_v60 = vpop.f32.mrf.mxu0  ;;  %4736 = vmatprep.mubr.msk.bf16.mxu1 %vm5117_vm1, %v5116_v15 }
0x126b   :  { %v2227_v30 = vpack.c.bf16 %v2089_v29, %v2089_v29 }
0x126c   :  { %v4720_v31 = vpop.f32.mrf.mxu0 }
0x126d   :  { %4731 = vmatmul.mubr.msk.bf16.vlgmr.msra.gmra.mxu0 %vm326_vm2, %v2227_v30 }
0x126e   :  { %v2211_v62 = vpop.f32.mrf.mxu0  ;;  %4742 = vmatprep.mubr.msk.bf16.mxu0 %vm5117_vm1, %v5116_v15 }
0x1270   :  { %v4721_v32 = vpop.f32.mrf.mxu0 }
0x1271   :  { %v2231_v33 = vpack.c.bf16 %v4721_v32, %v4720_v31 }
0x1272   :  { %v2214_v36 = vpop.f32.mrf.mxu0 }
0x1273   :  { %v2230_v37 = vpack.c.bf16 %v2214_v36, %v2211_v62  ;;  %4741 = vmatpush3.bf16.msra.mxu0 %v2231_v33 }
0x1274   :  { %4752 = vmatprep.subr.bf16.mxu0 %v5116_v15 }
0x1275   :  { %4735 = vmatpush3.bf16.msra.mxu1 %v2230_v37 }
0x1276   :  { %4746 = vmatprep.subr.bf16.mxu1 %v5116_v15 }
0x1329   :  { %v2272_v39 = vpop.f32.mrf.mxu1 }
0x132a   :  { %v2325_v34 = vsel %vm2324_vm5, %v2272_v39, -inf }
0x132b   :  { %2326 = vmax.xlane.f32.xlu0 %v2325_v34  ;;  %v4726_v40 = vpop.f32.mrf.mxu1 }
0x132d   :  { %v2275_v41 = vpop.f32.mrf.mxu1  ;;  %v2318_v42 = vpop.f32.mrf.mxu0 }
0x132e   :  { %v2328_v43 = vsel %vm2324_vm5, %v2318_v42, -inf }
0x132f   :  { %v4727_v44 = vpop.f32.mrf.mxu1  ;;  %2329 = vmax.xlane.f32.xlu1 %v2328_v43  ;;  %v4732_v45 = vpop.f32.mrf.mxu0 }
0x1331   :  { %v2321_v46 = vpop.f32.mrf.mxu0 }
0x1333   :  { %v4733_v47 = vpop.f32.mrf.mxu0 }
0x13b4   :  { %v2327_v48 = vpop.xlane.xlu0 %2326 }
0x13b5   :  { %v2331_v17 = vsub.f32 %v2272_v39, %v2327_v48 }
0x13b7   :  { %v2333_v21 = vmul.f32 1.442695, %v2331_v17 }
0x13b8   :  { %v2330_v49 = vpop.xlane.xlu1 %2329 }
0x13b9   :  { %5054 = vpow2.f32 %v2333_v21  ;;  %v2332_v51 = vsub.f32 %v2318_v42, %v2330_v49 }
0x13bb   :  { %v2335_v52 = vmul.f32 1.442695, %v2332_v51 }
0x13bd   :  { %5056 = vpow2.f32 %v2335_v52 }
0x13c6   :  { %v5055_v55 = vpop.eup %5054 }
0x13c7   :  { %v2337_v56 = vsel %vm2324_vm5, %v5055_v55, 0.0 }
0x13c8   :  { %2338 = vadd.xlane.f32.xlu0 %v2337_v56 }
0x13ca   :  { %v5057_v57 = vpop.eup %5056 }
0x13cb   :  { %v2340_v58 = vsel %vm2324_vm5, %v5057_v57, 0.0 }
0x13cc   :  { %2341 = vadd.xlane.f32.xlu1 %v2340_v58 }
0x1451   :  { %v2339_v59 = vpop.xlane.xlu0 %2338 }
0x1452   :  { %5058 = vrcp.f32 %v2339_v59 }
0x1455   :  { %v2342_v35 = vpop.xlane.xlu1 %2341 }
0x1456   :  { %5060 = vrcp.f32 %v2342_v35 }
0x145f   :  { %v5059_v61 = vpop.eup %5058 }
0x1460   :  { %v2345_v63 = vmul.f32 %v5059_v61, %v5055_v55 }
0x1462   :  { %v2347_v0 = vpack.c.bf16 %v2345_v63, %v2345_v63 }
0x1463   :  { %v5061_v3 = vpop.eup %5060 }
0x1464   :  { %4737 = vmatmul.mubr.msk.bf16.vlgmr.msra.gmra.mxu1 %vm2324_vm5, %v2347_v0  ;;  %v2346_v4 = vmul.f32 %v5061_v3, %v5057_v57 }
0x1465   :  { %4748 = vmatprep.mubr.msk.bf16.mxu1 %vm5117_vm1, %v5116_v15  ;;  %4747 = vmatpush3.bf16.msra.mxu1 %v2441_v10 }
0x1466   :  { %v2348_v5 = vpack.c.bf16 %v2346_v4, %v2346_v4  ;;  %4760 = vmatprep.subr.bf16.mxu1 %v4982_v11 }
0x1468   :  { %4743 = vmatmul.mubr.msk.bf16.vlgmr.msra.gmra.mxu0 %vm2324_vm5, %v2348_v5 }
0x1469   :  { %4753 = vmatpush3.bf16.msra.mxu0 %v4978_v38  ;;  %4756 = vmatprep.mubr.msk.bf16.mxu0 %vm5117_vm1, %v5116_v15 }
0x146a   :  { %4754 = vmatprep.subr.bf16.mxu0 %v5116_v15 }
0x146d   :  { %4755 = vmatpush3.bf16.msra.mxu0 %v4979_v6 }
0x146e   :  { %4768 = vmatprep.subr.bf16.mxu0 %v4980_v7 }
0x1470   :  { %4757 = vmatmul.mubr.msk.bf16.vlgmr.msra.gmra.mxu0 %vm91_vm0, %v5658_v2 }
0x1471   :  { %4769 = vmatpush3.bf16.msra.mxu0 %v4980_v7  ;;  %4772 = vmatprep.mubr.msk.bf16.mxu0 %vm91_vm0, %v5631_v50 }
0x1472   :  { %4770 = vmatprep.subr.bf16.mxu0 %v4981_v8 }
0x1475   :  { %4771 = vmatpush3.bf16.msra.mxu0 %v4981_v8 }
0x1476   :  { %4782 = vmatprep.subr.bf16.mxu0 %v5116_v15 }
0x1478   :  { %4773 = vmatmul.mubr.msk.bf16.vlgmr.msra.gmra.mxu0 %vm91_vm0, %v5635_v53 }
0x1479   :  { %4784 = vmatprep.mubr.msk.bf16.mxu0 %vm5117_vm1, %v5116_v15 }
0x1524   :  { %v2386_v12 = vpop.f32.mrf.mxu1 }
0x1526   :  { %v4738_v13 = vpop.f32.mrf.mxu1 }
0x1528   :  { %v2389_v14 = vpop.f32.mrf.mxu1  ;;  %v2429_v16 = vpop.f32.mrf.mxu0 }
0x1529   :  { %v2435_v18 = vpack.c.bf16 %v2429_v16, %v2386_v12  ;;  %v4984_v16 = vld [vmem:[%s5994_s13 + $0x28] sm:$0xff]  }
0x152a   :  { %v4739_v20 = vpop.f32.mrf.mxu1  ;;  %v4744_v22 = vpop.f32.mrf.mxu0 }
0x152b   :  { %4749 = vmatmul.mubr.msk.bf16.vlgmr.msra.gmra.mxu1 %vm326_vm2, %v2435_v18  ;;  %v4235_v18 = vld [vmem:[%s5997_s16 + $0x4] sm:$0xf] }
0x152c   :  { %v2432_v23 = vpop.f32.mrf.mxu0  ;;  %4761 = vmatpush3.bf16.msra.mxu1 %v4982_v11  ;;  %4764 = vmatprep.mubr.msk.bf16.mxu1 %vm91_vm0, %v5631_v50 }
0x152d   :  { %4762 = vmatprep.subr.bf16.mxu1 %v4983_v19  ;;  %v2893_v23 = vsel %vm446_vm3, %v4235_v18, 0 }
0x152e   :  { %v4745_v24 = vpop.f32.mrf.mxu0 }
0x152f   :  { %v4985_v24 = vld [vmem:[%s5994_s13 + $0x20] sm:$0xff]  }
0x1530   :  { %v2537_v25 = vpop.f32.mrf.mxu0  ;;  %4763 = vmatpush3.bf16.msra.mxu1 %v4983_v19 }
0x1531   :  { %4776 = vmatprep.subr.bf16.mxu1 %v5116_v15  ;;  %v2544_v45 = vmul.f32 0.35355338, %v2537_v25  ;;  %v4986_v25 = vld [vmem:[%s5996_s15 + $0x28] sm:$0xff]  }
0x1532   :  { %v4758_v26 = vpop.f32.mrf.mxu0 }
0x1533   :  { %4765 = vmatmul.mubr.msk.bf16.vlgmr.msra.gmra.mxu1 %vm91_vm0, %v5635_v53  ;;  %v2678_v17 = vpack.c.bf16 %v2544_v45, %v2544_v45  ;;  %v4987_v26 = vld [vmem:[%s5996_s15 + $0x20] sm:$0xff]  }
0x1534   :  { %v2540_v27 = vpop.f32.mrf.mxu0  ;;  %4778 = vmatprep.mubr.msk.bf16.mxu1 %vm5117_vm1, %v5116_v15 }
0x1535   :  { %v2545_v42 = vmul.f32 0.35355338, %v2540_v27  ;;  %v4988_v27 = vld [vmem:[%s5995_s14 + $0x28] sm:$0xff]  }
0x1536   :  { %v4759_v28 = vpop.f32.mrf.mxu0 }
0x1537   :  { %v2679_v46 = vpack.c.bf16 %v2545_v42, %v2545_v42 }
0x1538   :  { %v4774_v32 = vpop.f32.mrf.mxu0 }
0x153a   :  { %v2663_v37 = vpop.f32.mrf.mxu0 }
0x153c   :  { %v4775_v43 = vpop.f32.mrf.mxu0 }
0x153d   :  { %v2683_v48 = vpack.c.bf16 %v4775_v43, %v4774_v32  ;;  %v4989_v32 = vld [vmem:[%s5995_s14 + $0x20] sm:$0xff]  }
0x153e   :  { %v2666_v47 = vpop.f32.mrf.mxu0 }
0x153f   :  { %v2682_v21 = vpack.c.bf16 %v2666_v47, %v2663_v37 }
0x15eb   :  { %v5734_v29 = vpop.f32.mrf.mxu1 }
0x15ed   :  { %v4750_v60 = vpop.f32.mrf.mxu1 }
0x15ef   :  { %v5736_v30 = vpop.f32.mrf.mxu1 }
0x15f1   :  { %v4751_v31 = vpop.f32.mrf.mxu1 }
0x15f3   :  { %v4766_v62 = vpop.f32.mrf.mxu1 }
0x15f5   :  { %v2597_v33 = vpop.f32.mrf.mxu1 }
0x15f7   :  { %v4767_v36 = vpop.f32.mrf.mxu1 }
0x15f8   :  { %v2681_v39 = vpack.c.bf16 %v4767_v36, %v4766_v62 }
0x15f9   :  { %v2600_v34 = vpop.f32.mrf.mxu1 }
0x15fa   :  { %v2734_v40 = vsel %vm326_vm2, %v2681_v39, 0  ;;  %v2680_v41 = vpack.c.bf16 %v2600_v34, %v2597_v33 }
0x15fb   :  { %4783 = vmatpush3.bf16.xpose.msra.mxu0 %v2734_v40 }
0x15fc   :  { %v2688_v44 = vsel %vm326_vm2, %v2680_v41, 0  ;;  %4794 = vmatprep.subr.bf16.mxu0 %v5116_v15 }
0x15fd   :  { %4777 = vmatpush3.bf16.xpose.msra.mxu1 %v2688_v44  ;;  %v4191_v44 = vld [vmem:[%s5998_s17] ss:$0 sm:$0xff] }
0x15fe   :  { %4788 = vmatprep.subr.bf16.mxu1 %v5116_v15  ;;  %v2484_v45 = vadd.f32 %v4191_v44, %v5734_v29 }
0x1602   :  { %4785 = vmatmul.mubr.msk.bf16.vlgmr.msra.gmra.mxu0 %vm326_vm2, %v2679_v46 }
0x1603   :  { %4795 = vmatpush3.bf16.msra.mxu0 %v2683_v48  ;;  %4796 = vmatprep.mubr.msk.bf16.mxu0 %vm5117_vm1, %v5116_v15 }
0x1604   :  { %4779 = vmatmul.mubr.msk.bf16.vlgmr.msra.gmra.mxu1 %vm326_vm2, %v2678_v17  ;;  %4806 = vmatprep.subr.bf16.mxu0 %v5116_v15  ;;  %v2485_v17 = vadd.f32 %v4191_v44, %v5736_v30  ;;  %v4991_v44 = vld [vmem:[%s5994_s13 + $0x30] sm:$0xff]  }
0x1605   :  { %4789 = vmatpush3.bf16.msra.mxu1 %v2682_v21  ;;  %4790 = vmatprep.mubr.msk.bf16.mxu1 %vm5117_vm1, %v5116_v15 }
0x1606   :  { %4800 = vmatprep.subr.bf16.mxu1 %v5116_v15 }
0x16c2   :  { %v2770_v49 = vpop.f32.mrf.mxu0 }
0x16c3   :  { %v2779_v51 = vsel %vm2324_vm5, %v2770_v49, -inf }
0x16c4   :  { %2780 = vmax.xlane.f32.xlu1 %v2779_v51  ;;  %v2724_v52 = vpop.f32.mrf.mxu1  ;;  %v4786_v55 = vpop.f32.mrf.mxu0 }
0x16c5   :  { %v2776_v56 = vsel %vm2324_vm5, %v2724_v52, -inf }
0x16c6   :  { %v2773_v57 = vpop.f32.mrf.mxu0  ;;  %2777 = vmax.xlane.f32.xlu0 %v2776_v56  ;;  %v4780_v58 = vpop.f32.mrf.mxu1 }
0x16c8   :  { %v2727_v59 = vpop.f32.mrf.mxu1  ;;  %v4787_v35 = vpop.f32.mrf.mxu0 }
0x16ca   :  { %v4781_v61 = vpop.f32.mrf.mxu1 }
0x174d   :  { %v2781_v63 = vpop.xlane.xlu1 %2780 }
0x174e   :  { %v2783_v0 = vsub.f32 %v2770_v49, %v2781_v63 }
0x174f   :  { %v2778_v3 = vpop.xlane.xlu0 %2777 }
0x1750   :  { %v2786_v4 = vmul.f32 1.442695, %v2783_v0  ;;  %v2782_v38 = vsub.f32 %v2724_v52, %v2778_v3 }
0x1752   :  { %5062 = vpow2.f32 %v2786_v4  ;;  %v2784_v5 = vmul.f32 1.442695, %v2782_v38 }
0x1754   :  { %5064 = vpow2.f32 %v2784_v5 }
0x175f   :  { %v5063_v6 = vpop.eup %5062 }
0x1760   :  { %v2791_v7 = vsel %vm2324_vm5, %v5063_v6, 0.0 }
0x1761   :  { %v5065_v8 = vpop.eup %5064  ;;  %2792 = vadd.xlane.f32.xlu1 %v2791_v7 }
0x1762   :  { %v2788_v9 = vsel %vm2324_vm5, %v5065_v8, 0.0 }
0x1763   :  { %2789 = vadd.xlane.f32.xlu0 %v2788_v9 }
0x17ea   :  { %v2793_v10 = vpop.xlane.xlu1 %2792 }
0x17eb   :  { %5066 = vrcp.f32 %v2793_v10 }
0x17ec   :  { %v2790_v11 = vpop.xlane.xlu0 %2789 }
0x17ed   :  { %5068 = vrcp.f32 %v2790_v11 }
0x17f8   :  { %v5067_v12 = vpop.eup %5066 }
0x17f9   :  { %v2797_v13 = vmul.f32 %v5067_v12, %v5063_v6 }
0x17fa   :  { %v5069_v14 = vpop.eup %5068 }
0x17fb   :  { %v2799_v19 = vpack.c.bf16 %v2797_v13, %v2797_v13  ;;  %v2796_v20 = vmul.f32 %v5069_v14, %v5065_v8 }
0x17fd   :  { %4797 = vmatmul.mubr.msk.bf16.vlgmr.msra.gmra.mxu0 %vm2324_vm5, %v2799_v19  ;;  %v2798_v22 = vpack.c.bf16 %v2796_v20, %v2796_v20 }
0x17fe   :  { %4807 = vmatpush3.bf16.msra.mxu0 %v4984_v16  ;;  %4810 = vmatprep.mubr.msk.bf16.mxu0 %vm5117_vm1, %v5116_v15 }
0x17ff   :  { %4791 = vmatmul.mubr.msk.bf16.vlgmr.msra.gmra.mxu1 %vm2324_vm5, %v2798_v22  ;;  %4808 = vmatprep.subr.bf16.mxu0 %v5116_v15 }
0x1800   :  { %4801 = vmatpush3.bf16.msra.mxu1 %v2893_v23  ;;  %4802 = vmatprep.mubr.msk.bf16.mxu1 %vm5117_vm1, %v5116_v15 }
0x1801   :  { %4814 = vmatprep.subr.bf16.mxu1 %v4988_v27 }
0x1802   :  { %4809 = vmatpush3.bf16.msra.mxu0 %v4985_v24 }
0x1803   :  { %4822 = vmatprep.subr.bf16.mxu0 %v4986_v25 }
0x1805   :  { %4811 = vmatmul.mubr.msk.bf16.vlgmr.msra.gmra.mxu0 %vm91_vm0, %v5658_v2 }
0x1806   :  { %4823 = vmatpush3.bf16.msra.mxu0 %v4986_v25  ;;  %4826 = vmatprep.mubr.msk.bf16.mxu0 %vm91_vm0, %v5631_v50 }
0x1807   :  { %4824 = vmatprep.subr.bf16.mxu0 %v4987_v26 }
0x180a   :  { %4825 = vmatpush3.bf16.msra.mxu0 %v4987_v26 }
0x180b   :  { %4836 = vmatprep.subr.bf16.mxu0 %v5116_v15 }
0x180d   :  { %4827 = vmatmul.mubr.msk.bf16.vlgmr.msra.gmra.mxu0 %vm91_vm0, %v5635_v53 }
0x180e   :  { %4838 = vmatprep.mubr.msk.bf16.mxu0 %vm5117_vm1, %v5116_v15 }
0x18bd   :  { %v2880_v28 = vpop.f32.mrf.mxu0 }
0x18bf   :  { %v2837_v60 = vpop.f32.mrf.mxu1  ;;  %v4798_v31 = vpop.f32.mrf.mxu0 }
0x18c0   :  { %v2886_v62 = vpack.c.bf16 %v2880_v28, %v2837_v60 }
0x18c1   :  { %v4792_v33 = vpop.f32.mrf.mxu1  ;;  %v2883_v36 = vpop.f32.mrf.mxu0 }
0x18c2   :  { %4803 = vmatmul.mubr.msk.bf16.vlgmr.msra.gmra.mxu1 %vm326_vm2, %v2886_v62 }
0x18c3   :  { %v2840_v37 = vpop.f32.mrf.mxu1  ;;  %v4799_v39 = vpop.f32.mrf.mxu0  ;;  %4815 = vmatpush3.bf16.msra.mxu1 %v4988_v27  ;;  %4818 = vmatprep.mubr.msk.bf16.mxu1 %vm91_vm0, %v5631_v50 }
0x18c4   :  { %4816 = vmatprep.subr.bf16.mxu1 %v4989_v32  ;;  %v4990_v39 = vld [vmem:[%s5994_s13 + $0x38] sm:$0xff]  }
0x18c5   :  { %v4793_v34 = vpop.f32.mrf.mxu1  ;;  %v2989_v40 = vpop.f32.mrf.mxu0 }
0x18c6   :  { %v2996_v30 = vmul.f32 0.35355338, %v2989_v40  ;;  %v4264_v34 = vld [vmem:[%s5997_s16 + $0x8] sm:$0xf] }
0x18c7   :  { %v4812_v41 = vpop.f32.mrf.mxu0  ;;  %4817 = vmatpush3.bf16.msra.mxu1 %v4989_v32 }
0x18c8   :  { %4830 = vmatprep.subr.bf16.mxu1 %v5116_v15  ;;  %v3130_v6 = vpack.c.bf16 %v2996_v30, %v2996_v30 }
0x18c9   :  { %v2992_v42 = vpop.f32.mrf.mxu0 }
0x18ca   :  { %4819 = vmatmul.mubr.msk.bf16.vlgmr.msra.gmra.mxu1 %vm91_vm0, %v5635_v53  ;;  %v2997_v63 = vmul.f32 0.35355338, %v2992_v42 }
0x18cb   :  { %v4813_v43 = vpop.f32.mrf.mxu0  ;;  %4832 = vmatprep.mubr.msk.bf16.mxu1 %vm5117_vm1, %v5116_v15 }
0x18cc   :  { %v3131_v4 = vpack.c.bf16 %v2997_v63, %v2997_v63  ;;  %v3345_v43 = vsel %vm446_vm3, %v4264_v34, 0 }
0x18cd   :  { %v4828_v55 = vpop.f32.mrf.mxu0 }
0x18cf   :  { %v3115_v58 = vpop.f32.mrf.mxu0 }
0x18d1   :  { %v4829_v0 = vpop.f32.mrf.mxu0 }
0x18d2   :  { %v3135_v5 = vpack.c.bf16 %v4829_v0, %v4828_v55 }
0x18d3   :  { %v3118_v38 = vpop.f32.mrf.mxu0 }
0x18d4   :  { %v3134_v7 = vpack.c.bf16 %v3118_v38, %v3115_v58 }
0x1982   :  { %v2929_v46 = vpop.f32.mrf.mxu1 }
0x1983   :  { %v5804_v47 = vadd.f32 %v2929_v46, %v2484_v45  ;;  %v4992_v45 = vld [vmem:[%s5996_s15 + $0x38] sm:$0xff]   ;;  %v4993_v46 = vld [vmem:[%s5996_s15 + $0x30] sm:$0xff]  }
0x1984   :  { %v4804_v48 = vpop.f32.mrf.mxu1 }
0x1985   :  { %v4994_v48 = vld [vmem:[%s5995_s14 + $0x38] sm:$0xff]  }
0x1986   :  { %v2932_v21 = vpop.f32.mrf.mxu1 }
0x1987   :  { %v5807_v49 = vadd.f32 %v2932_v21, %v2485_v17 }
0x1988   :  { %v4805_v51 = vpop.f32.mrf.mxu1 }
0x198a   :  { %v4820_v52 = vpop.f32.mrf.mxu1 }
0x198c   :  { %v3049_v56 = vpop.f32.mrf.mxu1 }
0x198e   :  { %v4821_v57 = vpop.f32.mrf.mxu1 }
0x198f   :  { %v3133_v59 = vpack.c.bf16 %v4821_v57, %v4820_v52  ;;  %v4995_v52 = vld [vmem:[%s5995_s14 + $0x30] sm:$0xff]  }
0x1990   :  { %v3052_v35 = vpop.f32.mrf.mxu1 }
0x1991   :  { %v3186_v61 = vsel %vm326_vm2, %v3133_v59, 0  ;;  %v3132_v29 = vpack.c.bf16 %v3052_v35, %v3049_v56 }
0x1992   :  { %4837 = vmatpush3.bf16.xpose.msra.mxu0 %v3186_v61 }
0x1993   :  { %v3140_v3 = vsel %vm326_vm2, %v3132_v29, 0  ;;  %4848 = vmatprep.subr.bf16.mxu0 %v5116_v15 }
0x1994   :  { %4831 = vmatpush3.bf16.xpose.msra.mxu1 %v3140_v3 }
0x1995   :  { %4842 = vmatprep.subr.bf16.mxu1 %v5116_v15 }
0x1999   :  { %4839 = vmatmul.mubr.msk.bf16.vlgmr.msra.gmra.mxu0 %vm326_vm2, %v3131_v4 }
0x199a   :  { %4849 = vmatpush3.bf16.msra.mxu0 %v3135_v5  ;;  %4850 = vmatprep.mubr.msk.bf16.mxu0 %vm5117_vm1, %v5116_v15 }
0x199b   :  { %4833 = vmatmul.mubr.msk.bf16.vlgmr.msra.gmra.mxu1 %vm326_vm2, %v3130_v6  ;;  %4860 = vmatprep.subr.bf16.mxu0 %v5116_v15 }
0x199c   :  { %4843 = vmatpush3.bf16.msra.mxu1 %v3134_v7  ;;  %4844 = vmatprep.mubr.msk.bf16.mxu1 %vm5117_vm1, %v5116_v15 }
0x199d   :  { %4854 = vmatprep.subr.bf16.mxu1 %v5116_v15 }
0x1a59   :  { %v3222_v8 = vpop.f32.mrf.mxu0 }
0x1a5a   :  { %v3231_v9 = vsel %vm2324_vm5, %v3222_v8, -inf }
0x1a5b   :  { %3232 = vmax.xlane.f32.xlu1 %v3231_v9  ;;  %v3176_v10 = vpop.f32.mrf.mxu1  ;;  %v4840_v11 = vpop.f32.mrf.mxu0 }
0x1a5c   :  { %v3228_v12 = vsel %vm2324_vm5, %v3176_v10, -inf }
0x1a5d   :  { %v3225_v13 = vpop.f32.mrf.mxu0  ;;  %3229 = vmax.xlane.f32.xlu0 %v3228_v12  ;;  %v4834_v14 = vpop.f32.mrf.mxu1 }
0x1a5f   :  { %v3179_v16 = vpop.f32.mrf.mxu1  ;;  %v4841_v18 = vpop.f32.mrf.mxu0 }
0x1a61   :  { %v4835_v19 = vpop.f32.mrf.mxu1 }
0x1ae4   :  { %v3233_v20 = vpop.xlane.xlu1 %3232 }
0x1ae5   :  { %v3235_v22 = vsub.f32 %v3222_v8, %v3233_v20 }
0x1ae6   :  { %v3230_v23 = vpop.xlane.xlu0 %3229 }
0x1ae7   :  { %v3238_v24 = vmul.f32 1.442695, %v3235_v22  ;;  %v3234_v25 = vsub.f32 %v3176_v10, %v3230_v23 }
0x1ae9   :  { %5070 = vpow2.f32 %v3238_v24  ;;  %v3236_v26 = vmul.f32 1.442695, %v3234_v25 }
0x1aeb   :  { %5072 = vpow2.f32 %v3236_v26 }
0x1af6   :  { %v5071_v27 = vpop.eup %5070 }
0x1af7   :  { %v3243_v28 = vsel %vm2324_vm5, %v5071_v27, 0.0 }
0x1af8   :  { %v5073_v60 = vpop.eup %5072  ;;  %3244 = vadd.xlane.f32.xlu1 %v3243_v28 }
0x1af9   :  { %v3240_v31 = vsel %vm2324_vm5, %v5073_v60, 0.0 }
0x1afa   :  { %3241 = vadd.xlane.f32.xlu0 %v3240_v31 }
0x1b81   :  { %v3245_v62 = vpop.xlane.xlu1 %3244 }
0x1b82   :  { %5074 = vrcp.f32 %v3245_v62 }
0x1b83   :  { %v3242_v32 = vpop.xlane.xlu0 %3241 }
0x1b84   :  { %5076 = vrcp.f32 %v3242_v32 }
0x1b8f   :  { %v5075_v33 = vpop.eup %5074 }
0x1b90   :  { %v3249_v36 = vmul.f32 %v5075_v33, %v5071_v27 }
0x1b91   :  { %v5077_v37 = vpop.eup %5076 }
0x1b92   :  { %v3251_v40 = vpack.c.bf16 %v3249_v36, %v3249_v36  ;;  %v3248_v41 = vmul.f32 %v5077_v37, %v5073_v60 }
0x1b94   :  { %4851 = vmatmul.mubr.msk.bf16.vlgmr.msra.gmra.mxu0 %vm2324_vm5, %v3251_v40  ;;  %v3250_v42 = vpack.c.bf16 %v3248_v41, %v3248_v41 }
0x1b95   :  { %4861 = vmatpush3.bf16.msra.mxu0 %v4990_v39  ;;  %4864 = vmatprep.mubr.msk.bf16.mxu0 %vm5117_vm1, %v5116_v15 }
0x1b96   :  { %4845 = vmatmul.mubr.msk.bf16.vlgmr.msra.gmra.mxu1 %vm2324_vm5, %v3250_v42  ;;  %4862 = vmatprep.subr.bf16.mxu0 %v5116_v15 }
0x1b97   :  { %4855 = vmatpush3.bf16.msra.mxu1 %v3345_v43  ;;  %4856 = vmatprep.mubr.msk.bf16.mxu1 %vm5117_vm1, %v5116_v15 }
0x1b98   :  { %4868 = vmatprep.subr.bf16.mxu1 %v4994_v48 }
0x1b99   :  { %4863 = vmatpush3.bf16.msra.mxu0 %v4991_v44 }
0x1b9a   :  { %4876 = vmatprep.subr.bf16.mxu0 %v4992_v45 }
0x1b9c   :  { %4865 = vmatmul.mubr.msk.bf16.vlgmr.msra.gmra.mxu0 %vm91_vm0, %v5658_v2 }
0x1b9d   :  { %4877 = vmatpush3.bf16.msra.mxu0 %v4992_v45  ;;  %4880 = vmatprep.mubr.msk.bf16.mxu0 %vm91_vm0, %v5631_v50 }
0x1b9e   :  { %4878 = vmatprep.subr.bf16.mxu0 %v4993_v46 }
0x1ba1   :  { %4879 = vmatpush3.bf16.msra.mxu0 %v4993_v46 }
0x1ba2   :  { %4890 = vmatprep.subr.bf16.mxu0 %v5116_v15 }
0x1ba4   :  { %4881 = vmatmul.mubr.msk.bf16.vlgmr.msra.gmra.mxu0 %vm91_vm0, %v5635_v53 }
0x1ba5   :  { %4892 = vmatprep.mubr.msk.bf16.mxu0 %vm5117_vm1, %v5116_v15 }
0x1c54   :  { %v3332_v2 = vpop.f32.mrf.mxu0 }
0x1c56   :  { %v3289_v17 = vpop.f32.mrf.mxu1  ;;  %v4852_v21 = vpop.f32.mrf.mxu0 }
0x1c57   :  { %v3338_v51 = vpack.c.bf16 %v3332_v2, %v3289_v17  ;;  %v4293_v21 = vld [vmem:[%s5997_s16 + $0xc] sm:$0xf] }
0x1c58   :  { %v4846_v55 = vpop.f32.mrf.mxu1  ;;  %v3335_v56 = vpop.f32.mrf.mxu0 }
0x1c59   :  { %4857 = vmatmul.mubr.msk.bf16.vlgmr.msra.gmra.mxu1 %vm326_vm2, %v3338_v51  ;;  %v3797_v56 = vsel %vm446_vm3, %v4293_v21, 0 }
0x1c5a   :  { %v3292_v57 = vpop.f32.mrf.mxu1  ;;  %v4853_v58 = vpop.f32.mrf.mxu0  ;;  %4869 = vmatpush3.bf16.msra.mxu1 %v4994_v48  ;;  %4872 = vmatprep.mubr.msk.bf16.mxu1 %vm91_vm0, %v5631_v50 }
0x1c5b   :  { %4870 = vmatprep.subr.bf16.mxu1 %v4995_v52 }
0x1c5c   :  { %v4847_v59 = vpop.f32.mrf.mxu1  ;;  %v3441_v35 = vpop.f32.mrf.mxu0 }
0x1c5e   :  { %v4866_v61 = vpop.f32.mrf.mxu0  ;;  %4871 = vmatpush3.bf16.msra.mxu1 %v4995_v52 }
0x1c5f   :  { %4884 = vmatprep.subr.bf16.mxu1 %v5116_v15 }
0x1c60   :  { %v3444_v29 = vpop.f32.mrf.mxu0 }
0x1c61   :  { %4873 = vmatmul.mubr.msk.bf16.vlgmr.msra.gmra.mxu1 %vm91_vm0, %v5635_v53  ;;  %v3449_v13 = vmul.f32 0.35355338, %v3444_v29 }
0x1c62   :  { %v4867_v63 = vpop.f32.mrf.mxu0  ;;  %4886 = vmatprep.mubr.msk.bf16.mxu1 %vm5117_vm1, %v5116_v15 }
0x1c63   :  { %v3583_v16 = vpack.c.bf16 %v3449_v13, %v3449_v13 }
0x1c64   :  { %v4882_v6 = vpop.f32.mrf.mxu0 }
0x1c66   :  { %v3567_v9 = vpop.f32.mrf.mxu0 }
0x1d19   :  { %v3381_v0 = vpop.f32.mrf.mxu1 }
0x1d1a   :  { %v5872_v3 = vadd.f32 %v3381_v0, %v5804_v47  ;;  %v4883_v47 = vpop.f32.mrf.mxu0 }
0x1d1b   :  { %v4858_v50 = vpop.f32.mrf.mxu1  ;;  %v3587_v19 = vpack.c.bf16 %v4883_v47, %v4882_v6 }
0x1d1c   :  { %v3570_v18 = vpop.f32.mrf.mxu0 }
0x1d1d   :  { %v3384_v30 = vpop.f32.mrf.mxu1  ;;  %v3586_v22 = vpack.c.bf16 %v3570_v18, %v3567_v9  ;;  %v4996_v18 = vld [vmem:[%s5999_s18 + $0x8] sm:$0xff]  }
0x1d1e   :  { %v5875_v4 = vadd.f32 %v3384_v30, %v5807_v49  ;;  %v3448_v49 = vmul.f32 0.35355338, %v3441_v35 }
0x1d1f   :  { %v4859_v38 = vpop.f32.mrf.mxu1 }
0x1d20   :  { %v3582_v20 = vpack.c.bf16 %v3448_v49, %v3448_v49 }
0x1d21   :  { %v4874_v5 = vpop.f32.mrf.mxu1 }
0x1d23   :  { %v3501_v7 = vpop.f32.mrf.mxu1 }
0x1d25   :  { %v4875_v8 = vpop.f32.mrf.mxu1 }
0x1d26   :  { %v3585_v53 = vpack.c.bf16 %v4875_v8, %v4874_v5 }
0x1d27   :  { %v3504_v10 = vpop.f32.mrf.mxu1 }
0x1d28   :  { %v3638_v11 = vsel %vm326_vm2, %v3585_v53, 0  ;;  %v3584_v12 = vpack.c.bf16 %v3504_v10, %v3501_v7 }
0x1d29   :  { %4891 = vmatpush3.bf16.xpose.msra.mxu0 %v3638_v11 }
0x1d2a   :  { %v3592_v14 = vsel %vm326_vm2, %v3584_v12, 0  ;;  %4902 = vmatprep.subr.bf16.mxu0 %v5116_v15 }
0x1d2b   :  { %4885 = vmatpush3.bf16.xpose.msra.mxu1 %v3592_v14 }
0x1d2c   :  { %4896 = vmatprep.subr.bf16.mxu1 %v5116_v15 }
0x1d30   :  { %4893 = vmatmul.mubr.msk.bf16.vlgmr.msra.gmra.mxu0 %vm326_vm2, %v3583_v16 }
0x1d31   :  { %4903 = vmatpush3.bf16.msra.mxu0 %v3587_v19  ;;  %4904 = vmatprep.mubr.msk.bf16.mxu0 %vm5117_vm1, %v5116_v15  ;;  %v4997_v19 = vld [vmem:[%s5999_s18] sm:$0xff]  }
0x1d32   :  { %4887 = vmatmul.mubr.msk.bf16.vlgmr.msra.gmra.mxu1 %vm326_vm2, %v3582_v20  ;;  %4914 = vmatprep.subr.bf16.mxu0 %v5116_v15  ;;  %v4998_v20 = vld [vmem:[%s6001_s20 + $0x38] sm:$0xff]  }
0x1d33   :  { %4897 = vmatpush3.bf16.msra.mxu1 %v3586_v22  ;;  %4898 = vmatprep.mubr.msk.bf16.mxu1 %vm5117_vm1, %v5116_v15  ;;  %v4999_v22 = vld [vmem:[%s6001_s20 + $0x30] sm:$0xff]  }
0x1d34   :  { %4908 = vmatprep.subr.bf16.mxu1 %v5116_v15 }
0x1df0   :  { %v3674_v23 = vpop.f32.mrf.mxu0 }
0x1df1   :  { %v3683_v24 = vsel %vm2324_vm5, %v3674_v23, -inf }
0x1df2   :  { %3684 = vmax.xlane.f32.xlu1 %v3683_v24  ;;  %v3628_v25 = vpop.f32.mrf.mxu1  ;;  %v4894_v26 = vpop.f32.mrf.mxu0  ;;  %v5001_v24 = vld [vmem:[%s6001_s20 + $0x20] sm:$0xff]  }
0x1df3   :  { %v3680_v27 = vsel %vm2324_vm5, %v3628_v25, -inf }
0x1df4   :  { %v3677_v28 = vpop.f32.mrf.mxu0  ;;  %3681 = vmax.xlane.f32.xlu0 %v3680_v27  ;;  %v4888_v60 = vpop.f32.mrf.mxu1 }
0x1df6   :  { %v3631_v31 = vpop.f32.mrf.mxu1  ;;  %v4895_v62 = vpop.f32.mrf.mxu0 }
0x1df8   :  { %v4889_v32 = vpop.f32.mrf.mxu1 }
0x1e7b   :  { %v3685_v33 = vpop.xlane.xlu1 %3684 }
0x1e7c   :  { %v3687_v36 = vsub.f32 %v3674_v23, %v3685_v33  ;;  %v5000_v23 = vld [vmem:[%s6001_s20 + $0x28] sm:$0xff]  }
0x1e7d   :  { %v3682_v37 = vpop.xlane.xlu0 %3681 }
0x1e7e   :  { %v3690_v39 = vmul.f32 1.442695, %v3687_v36  ;;  %v3686_v34 = vsub.f32 %v3628_v25, %v3682_v37  ;;  %v5002_v25 = vld [vmem:[%s6001_s20 + $0x18] sm:$0xff]   ;;  %v4295_v36 = vld [vmem:[%s6021_s26] ss:$0 sm:$0xff] }
0x1e80   :  { %5078 = vpow2.f32 %v3690_v39  ;;  %v3688_v40 = vmul.f32 1.442695, %v3686_v34 }
0x1e82   :  { %5080 = vpow2.f32 %v3688_v40  ;;  %v4296_v40 = vld [vmem:[%s5988_s7] ss:$0 sm:$0xff] }
0x1e8d   :  { %v5079_v41 = vpop.eup %5078 }
0x1e8e   :  { %v3695_v42 = vsel %vm2324_vm5, %v5079_v41, 0.0 }
0x1e8f   :  { %v5081_v43 = vpop.eup %5080  ;;  %3696 = vadd.xlane.f32.xlu1 %v3695_v42 }
0x1e90   :  { %v3692_v44 = vsel %vm2324_vm5, %v5081_v43, 0.0 }
0x1e91   :  { %3693 = vadd.xlane.f32.xlu0 %v3692_v44 }
0x1f18   :  { %v3697_v45 = vpop.xlane.xlu1 %3696 }
0x1f19   :  { %5082 = vrcp.f32 %v3697_v45  ;;  %v5003_v45 = vld [vmem:[%s6001_s20 + $0x10] sm:$0xff]  }
0x1f1a   :  { %v3694_v46 = vpop.xlane.xlu0 %3693 }
0x1f1b   :  { %5084 = vrcp.f32 %v3694_v46  ;;  %v5004_v46 = vld [vmem:[%s6001_s20 + $0x8] sm:$0xff]  }
0x1f26   :  { %v5083_v48 = vpop.eup %5082 }
0x1f27   :  { %v3701_v2 = vmul.f32 %v5083_v48, %v5079_v41  ;;  %v5005_v48 = vld [vmem:[%s6001_s20] sm:$0xff]  }
0x1f28   :  { %v5085_v17 = vpop.eup %5084 }
0x1f29   :  { %v3703_v51 = vpack.c.bf16 %v3701_v2, %v3701_v2  ;;  %v3700_v52 = vmul.f32 %v5085_v17, %v5081_v43  ;;  %v4297_v2 = vld [vmem:[%s6000_s19] ss:$0 sm:$0xff]  ;;  %s5119_s19 = smov [#allocation2]  }
0x1f2a   :  { %s4080_s20 = sshll.u32 %s5119_s19, 4  ;;  %s4081_s20 = int_to_ptr.vmem [resolvable:$true] %s4080_s20 }
0x1f2b   :  { %v3702_v55 = vpack.c.bf16 %v3700_v52, %v3700_v52  ;;  %4905 = vmatmul.mubr.msk.bf16.vlgmr.msra.gmra.mxu0 %vm2324_vm5, %v3703_v51  ;;  %s5094_s12 = scalar_lea.vmem %s4081_s20, 256  ;;  %p5099_p1 = scmp.lt.s32.totalorder %s4081_s20, %s4081_s20 }
0x1f2c   :  { %4918 = vmatprep.mubr.msk.bf16.mxu0 %vm5117_vm1, %v5116_v15  ;;  %4915 = vmatpush3.bf16.msra.mxu0 %v4996_v18  ;;  %p5095_p0 = scmp.ne.s32.totalorder %s4081_s20, %s5094_s12  ;;  %p5100_p2 = scmp.lt.s32.totalorder %s5094_s12, %s5094_s12 }
0x1f2d   :  { %4899 = vmatmul.mubr.msk.bf16.vlgmr.msra.gmra.mxu1 %vm2324_vm5, %v3702_v55  ;;  %4916 = vmatprep.subr.bf16.mxu0 %v5116_v15 }
0x1f2e   :  { %4909 = vmatpush3.bf16.msra.mxu1 %v3797_v56  ;;  %4910 = vmatprep.mubr.msk.bf16.mxu1 %vm5117_vm1, %v5116_v15  ;;  %p5101_p3 = por %p5100_p2, %p5099_p1 }
0x1f2f   :  { %4922 = vmatprep.subr.bf16.mxu1 %v5116_v15 }
0x1f30   :  { %4917 = vmatpush3.bf16.msra.mxu0 %v4997_v19  ;;  %p5102_p4 = pnand %p5101_p3, %p5095_p0 }
0x1feb   :  { %v3784_v57 = vpop.f32.mrf.mxu0 }
0x1fed   :  { %v3741_v58 = vpop.f32.mrf.mxu1  ;;  %v4906_v59 = vpop.f32.mrf.mxu0 }
0x1fee   :  { %v3790_v35 = vpack.c.bf16 %v3784_v57, %v3741_v58 }
0x1fef   :  { %v4900_v61 = vpop.f32.mrf.mxu1  ;;  %v3787_v29 = vpop.f32.mrf.mxu0 }
0x1ff0   :  { %4911 = vmatmul.mubr.msk.bf16.vlgmr.msra.gmra.mxu1 %vm326_vm2, %v3790_v35  ;;  %v4309_v35 = vld [vmem:[%s6002_s21] ss:$0 sm:$0xff] }
0x1ff1   :  { %v3744_v63 = vpop.f32.mrf.mxu1  ;;  %v4907_v0 = vpop.f32.mrf.mxu0  ;;  %4938 = vmatprep.mubr.msk.bf16.mxu1 %vm5117_vm1, %v5116_v15  ;;  %4923 = vmatpush3.bf16.msra.mxu1 %v4998_v20 }
0x1ff2   :  { %4924 = vmatprep.subr.bf16.mxu1 %v5116_v15 }
0x1ff3   :  { %v4901_v50 = vpop.f32.mrf.mxu1 }
0x1ff5   :  { %4925 = vmatpush3.bf16.msra.mxu1 %v4999_v22 }
0x1ff6   :  { %4926 = vmatprep.subr.bf16.mxu1 %v5116_v15 }
0x1ff9   :  { %4927 = vmatpush3.bf16.msra.mxu1 %v5000_v23 }
0x1ffa   :  { %4928 = vmatprep.subr.bf16.mxu1 %v5116_v15 }
0x1ffd   :  { %4929 = vmatpush3.bf16.msra.mxu1 %v5001_v24 }
0x1ffe   :  { %4930 = vmatprep.subr.bf16.mxu1 %v5116_v15 }
0x2001   :  { %4931 = vmatpush3.bf16.msra.mxu1 %v5002_v25 }
0x2002   :  { %4932 = vmatprep.subr.bf16.mxu1 %v5116_v15 }
0x2005   :  { %4933 = vmatpush3.bf16.msra.mxu1 %v5003_v45 }
0x2006   :  { %4934 = vmatprep.subr.bf16.mxu1 %v5116_v15 }
0x2009   :  { %4935 = vmatpush3.bf16.msra.mxu1 %v5004_v46 }
0x200a   :  { %4936 = vmatprep.subr.bf16.mxu1 %v5116_v15 }
0x200d   :  { %4937 = vmatpush3.bf16.msra.mxu1 %v5005_v48 }
0x20b0   :  { %v3833_v30 = vpop.f32.mrf.mxu1 }
0x20b1   :  { %v3840_v38 = vadd.f32 %v3833_v30, %v5872_v3 }
0x20b2   :  { %v4912_v5 = vpop.f32.mrf.mxu1 }
0x20b3   :  { %v5909_v6 = vadd.f32 %v3840_v38, %v5583_v54 }
0x20b4   :  { %v3836_v7 = vpop.f32.mrf.mxu1 }
0x20b5   :  { %v3841_v8 = vadd.f32 %v3836_v7, %v5875_v4  ;;  %v3844_v9 = vsel %vm91_vm0, %v5909_v6, 0.0 }
0x20b6   :  { %3845 = vadd.xlane.f32.xlu0 %v3844_v9  ;;  %v4913_v53 = vpop.f32.mrf.mxu1 }
0x20b7   :  { %v5915_v10 = vadd.f32 %v3841_v8, %v5596_v1 }
0x20b9   :  { %v3847_v11 = vsel %vm91_vm0, %v5915_v10, 0.0 }
0x20ba   :  { %3848 = vadd.xlane.f32.xlu1 %v3847_v11 }
0x213f   :  { %v3846_v3 = vpop.xlane.xlu0 %3845 }
0x2140   :  { %v3850_v12 = vmul.f32 0.03125, %v3846_v3 }
0x2142   :  { %v3852_v54 = vsub.f32 %v5909_v6, %v3850_v12 }
0x2143   :  { %v3849_v13 = vpop.xlane.xlu1 %3848 }
0x2144   :  { %v3851_v47 = vmul.f32 0.03125, %v3849_v13  ;;  %v3854_v14 = vmul.f32 %v3852_v54, %v3852_v54 }
0x2146   :  { %v3853_v4 = vsub.f32 %v5915_v10, %v3851_v47  ;;  %v3856_v49 = vsel %vm91_vm0, %v3854_v14, 0.0 }
0x2147   :  { %3857 = vadd.xlane.f32.xlu0 %v3856_v49 }
0x2148   :  { %v3855_v16 = vmul.f32 %v3853_v4, %v3853_v4 }
0x214a   :  { %v3859_v1 = vsel %vm91_vm0, %v3855_v16, 0.0 }
0x214b   :  { %3860 = vadd.xlane.f32.xlu1 %v3859_v1 }
0x21d0   :  { %v3858_v26 = vpop.xlane.xlu0 %3857 }
0x21d1   :  { %v3862_v27 = vmul.f32 0.03125, %v3858_v26 }
0x21d3   :  { %v3864_v28 = vadd.f32 1e-05, %v3862_v27 }
0x21d4   :  { %v3861_v60 = vpop.xlane.xlu1 %3860 }
0x21d5   :  { %5086 = vrsqrt.f32 %v3864_v28  ;;  %v3863_v31 = vmul.f32 0.03125, %v3861_v60 }
0x21d7   :  { %v3865_v62 = vadd.f32 1e-05, %v3863_v31 }
0x21d9   :  { %5088 = vrsqrt.f32 %v3865_v62 }
0x21e2   :  { %v5087_v32 = vpop.eup %5086 }
0x21e3   :  { %v3868_v33 = vmul.f32 %v5087_v32, %v3852_v54 }
0x21e5   :  { %v3876_v39 = vmul.f32 %v4295_v36, %v3868_v33 }
0x21e6   :  { %v5089_v37 = vpop.eup %5088 }
0x21e7   :  { %v3869_v34 = vmul.f32 %v5089_v37, %v3853_v4  ;;  %v3884_v42 = vadd.f32 %v4296_v40, %v3876_v39 }
0x21e9   :  { %v3877_v41 = vmul.f32 %v4295_v36, %v3869_v34 }
0x21eb   :  { %v3885_v43 = vadd.f32 %v4296_v40, %v3877_v41 }
0x21ed   :  { %v3886_v44 = vpack.c.bf16 %v3885_v43, %v3884_v42 }
0x21ef   :  { %4919 = vmatmul.mubr.msk.bf16.vlgmr.msra.gmra.mxu0 %vm91_vm0, %v3886_v44 }
0x22af   :  { %v3947_v17 = vpop.f32.mrf.mxu0 }
0x22b0   :  { %v3948_v51 = vadd.f32 %v4297_v2, %v3947_v17 }
0x22b1   :  { %v4920_v21 = vpop.f32.mrf.mxu0 }
0x22b2   :  { %v3954_v57 = vmax.f32 %v3948_v51, 0.0 }
0x22b3   :  { %v3950_v52 = vpop.f32.mrf.mxu0 }
0x22b4   :  { %v3951_v55 = vadd.f32 %v4297_v2, %v3950_v52 }
0x22b5   :  { %v4921_v56 = vpop.f32.mrf.mxu0 }
0x22b6   :  { %v3955_v58 = vmax.f32 %v3951_v55, 0.0 }
0x22b8   :  { %v3956_v59 = vpack.c.bf16 %v3955_v58, %v3954_v57 }
0x22ba   :  { %4939 = vmatmul.mubr.bf16.vlgmr.msra.gmra.mxu1 %v3956_v59 }
0x237a   :  { %v4055_v15 = vpop.f32.mrf.mxu1 }
0x237b   :  { %v4062_v61 = vadd.f32 %v4055_v15, %v5909_v6 }
0x237c   :  { %v4940_v29 = vpop.f32.mrf.mxu1 }
0x237d   :  { %v4071_v63 = vadd.f32 %v4309_v35, %v4062_v61 }
0x237e   :  { %v4058_v0 = vpop.f32.mrf.mxu1 }
0x237f   :  { %4073 = vst.msk [vmem:[#allocation2] sm:$0xff] %vm91_vm0, %v4071_v63  ;;  %v4063_v50 = vadd.f32 %v4058_v0, %v5915_v10 }
0x2380   :  { %v4941_v30 = vpop.f32.mrf.mxu1 }
0x2381   :  { %v4072_v38 = vadd.f32 %v4309_v35, %v4063_v50 }
0x2383   :  { %4074 = vst.msk [vmem:[#allocation2 + $0x8] sm:$0xff] %vm91_vm0, %v4072_v38 }
0x2384   :  { %5105 = shalt.err (!%p5102_p4)
}
0x2385   :  { %s5120_s21 = smov 128   ;;  %s5121_s30 = smov 8  }
0x2386   :  { %4086 = dma.vmem_to_hbm [thread:$0]  %s4081_s20, 256, %s6003_s22, [#allocation3], %s5120_s21, %s5120_s21, %s5121_s30  }
0x2387   :  { %5114 = dma.done.wait [#allocation3], 256  }
0x2388   :  { %5115 = vsyncadd [#allocation3], 4294967040 }
0x2389   :  { %4090 = vsyncpa [#allocation3], 1 }

</bundles_post_ra>
